<compile_context>
chip_gen: v7x
topology: tpu7x:2x2x1
jax: 0.10.0
libtpu: 0.0.40
codegen_flags: <defaults>
</compile_context>

<pallas_src>
import functools

import jax
import jax.numpy as jnp
from jax import lax
from jax.experimental import pallas as pl
from jax.experimental.pallas import tpu as pltpu


def _mm(x, w):
    # MXU matmul with f32 accumulation; casts the activation operand to the
    # weight dtype (bf16 weights -> bf16 MXU inputs, f32 accumulate).
    return jnp.dot(x.astype(w.dtype), w, preferred_element_type=jnp.float32)


# --------------------------------------------------------------------------- #
# Kernel 1: serial GRU recurrence (latency-bound, M = batch).                  #
# --------------------------------------------------------------------------- #
def _recurrent_kernel(num_layers, hidden_size, max_len, batch,
                      h0_ref, wih_ref, whh_ref, bih_ref, bhh_ref,
                      top_ref):
    H = hidden_size
    B = batch

    # origin_hidden = hidden.clone().sum(0) -- constant across the decode loop.
    origin = jnp.sum(h0_ref[...].astype(jnp.float32), axis=0)          # (B, H)

    # Hoist loop-invariants: weights, pre-broadcast biases (JAX does not CSE
    # broadcast_in_dim; doing this inside the loop re-materializes it per step).
    wih = [wih_ref[l] for l in range(num_layers)]
    whh = [whh_ref[l] for l in range(num_layers)]
    bih = [jnp.broadcast_to(bih_ref[l], (B, 3 * H)).astype(jnp.float32)
           for l in range(num_layers)]
    bhh = [jnp.broadcast_to(bhh_ref[l], (B, 3 * H)).astype(jnp.float32)
           for l in range(num_layers)]

    # Hoisted: in 'self' mode the layer-0 GRU input is `origin` every step,
    # so its input-gate matmul is time-invariant (saves 1 of 4 gate matmuls/step).
    gi0 = _mm(origin, wih[0]) + bih[0]                                  # (B, 3H)

    # Hidden state carried in vregs (fori_loop carry), not VMEM scratch.
    h_init = tuple(h0_ref[l].astype(jnp.float32) for l in range(num_layers))

    def step(t, carry):
        hs = list(carry)
        x = origin
        for layer in range(num_layers):
            h_prev = hs[layer]
            gi = gi0 if layer == 0 else _mm(x, wih[layer]) + bih[layer]
            gh = _mm(h_prev, whh[layer]) + bhh[layer]
            # PyTorch GRUCell gate order: r, z, n  (H is a lane multiple, so
            # these slices are zero-cost vreg views).
            r = jax.nn.sigmoid(gi[:, 0:H] + gh[:, 0:H])
            z = jax.nn.sigmoid(gi[:, H:2 * H] + gh[:, H:2 * H])
            n = jnp.tanh(gi[:, 2 * H:3 * H] + r * gh[:, 2 * H:3 * H])
            h_new = (1.0 - z) * n + z * h_prev
            hs[layer] = h_new
            x = h_new  # inter-layer dropout is identity in eval mode
        # Full-tile aligned per-step store of top_hidden (epilogue is deferred).
        top_ref[t] = x.astype(top_ref.dtype)
        return tuple(hs)

    # Fully unroll small static decode loops for LLO scheduling visibility.
    unroll = True if max_len <= 32 else 2
    lax.fori_loop(0, max_len, step, h_init, unroll=unroll)
    # TODO(synk): weight-stationary MXU driving (matmul_push_rhs/acc_lhs/pop)
    # would avoid re-pushing whh each step at M=batch; not needed at demo sizes.


# --------------------------------------------------------------------------- #
# Kernel 2: batched epilogue over all max_len*batch rows, gridded over         #
# (row_tiles, vocab_tiles) so the tied generator streams from HBM.             #
# --------------------------------------------------------------------------- #
def _epilogue_kernel(top_ref, w1_ref, b1_ref, w2_ref, b2_ref, wf_ref, bf_ref,
                     logit_ref, out_ref, proj_sc):
    # proj depends only on the row tile: compute once at the first vocab tile,
    # keep it in VMEM scratch (persists across the "arbitrary" vocab axis).
    @pl.when(pl.program_id(1) == 0)
    def _():
        proj = jnp.tanh(_mm(top_ref[...], w1_ref[...]) + b1_ref[...])
        proj_sc[...] = proj
        # output_asp = Linear(H,E) of proj; dropoutL is identity in eval mode.
        out_ref[...] = (_mm(proj, w2_ref[...]) + b2_ref[...]).astype(out_ref.dtype)

    # logit = out @ wg + bg, folded as proj @ (w2@wg) + (b2@wg + bg):
    # independent of the `out` matmul above (breaks the serial MXU chain).
    logit_ref[...] = (_mm(proj_sc[...], wf_ref[...]) + bf_ref[...]).astype(
        logit_ref.dtype)


def _pick_tile(n, candidates, quantum):
    if n % quantum != 0:
        return n
    for c in candidates:
        if n % c == 0:
            return c
    return n


def decoder_forward(hidden0, params, max_len):
    """hidden0: (num_layers, batch, hidden) f32. Returns (logit, output_asp) with
    shapes (batch, max_len, vocab) and (batch, max_len, embed)."""
    num_layers, batch, hidden_size = hidden0.shape
    embed_size = params["w2"].shape[1]
    vocab_size = params["wg"].shape[1]
    rows = max_len * batch

    # ---- recurrent phase (gridless, everything VMEM-resident; tiny) --------
    rec_kernel = functools.partial(_recurrent_kernel, num_layers, hidden_size,
                                   max_len, batch)
    top = pl.pallas_call(
        rec_kernel,
        out_shape=jax.ShapeDtypeStruct((max_len, batch, hidden_size),
                                       jnp.float32),
    )(hidden0, params["wih"], params["whh"], params["bih"], params["bhh"])
    top_flat = top.reshape(rows, hidden_size)        # time-major flat (T*B, H)

    # ---- fold w2@wg / b2@wg+bg in f32, cast the fused weight back -----------
    w2_f32 = params["w2"].astype(jnp.float32)
    wg_f32 = params["wg"].astype(jnp.float32)
    wf = (w2_f32 @ wg_f32).astype(params["wg"].dtype)                 # (E==H, V)
    bf = (params["b2"].astype(jnp.float32) @ wg_f32
          + params["bg"].astype(jnp.float32))                         # (1, V)

    # ---- epilogue phase: grid over (row tiles, vocab tiles) -----------------
    row_tile = _pick_tile(rows, (256, 128, 64, 32, 16, 8), 8)
    vocab_tile = _pick_tile(vocab_size, (512, 256, 128), 128)
    grid = (rows // row_tile, vocab_size // vocab_tile)

    logit_flat, out_flat = pl.pallas_call(
        _epilogue_kernel,
        out_shape=(
            jax.ShapeDtypeStruct((rows, vocab_size), jnp.float32),
            jax.ShapeDtypeStruct((rows, embed_size), jnp.float32),
        ),
        grid_spec=pltpu.PrefetchScalarGridSpec(
            num_scalar_prefetch=0,
            grid=grid,
            in_specs=[
                pl.BlockSpec((row_tile, hidden_size), lambda i, j: (i, 0)),
                pl.BlockSpec((hidden_size, hidden_size), lambda i, j: (0, 0)),
                pl.BlockSpec((1, hidden_size), lambda i, j: (0, 0)),
                pl.BlockSpec((hidden_size, embed_size), lambda i, j: (0, 0)),
                pl.BlockSpec((1, embed_size), lambda i, j: (0, 0)),
                pl.BlockSpec((hidden_size, vocab_tile), lambda i, j: (0, j)),
                pl.BlockSpec((1, vocab_tile), lambda i, j: (0, j)),
            ],
            out_specs=[
                pl.BlockSpec((row_tile, vocab_tile), lambda i, j: (i, j)),
                pl.BlockSpec((row_tile, embed_size), lambda i, j: (i, 0)),
            ],
            scratch_shapes=[pltpu.VMEM((row_tile, hidden_size), jnp.float32)],
        ),
        compiler_params=pltpu.CompilerParams(
            dimension_semantics=("parallel", "arbitrary")),
    )(top_flat, params["w1"], params["b1"], params["w2"], params["b2"], wf, bf)

    # time-major flat -> (batch, max_len, feature)
    logit = logit_flat.reshape(max_len, batch, vocab_size).transpose(1, 0, 2)
    output_asp = out_flat.reshape(max_len, batch, embed_size).transpose(1, 0, 2)
    return logit, output_asp


def init_params(key, vocab_size, embed_size, hidden_size, num_layers):
    ks = jax.random.split(key, 10)
    s = 0.1
    # Embedding weight (vocab, embed); weight_tying=True -> generator.weight = embedding.weight
    emb = jax.random.normal(ks[0], (vocab_size, embed_size), jnp.float32) * s
    params = dict(
        wih=jax.random.normal(ks[1], (num_layers, hidden_size, 3 * hidden_size), jnp.float32) * s,
        whh=jax.random.normal(ks[2], (num_layers, hidden_size, 3 * hidden_size), jnp.float32) * s,
        bih=jax.random.normal(ks[3], (num_layers, 1, 3 * hidden_size), jnp.float32) * s,
        bhh=jax.random.normal(ks[4], (num_layers, 1, 3 * hidden_size), jnp.float32) * s,
        w1=jax.random.normal(ks[5], (hidden_size, hidden_size), jnp.float32) * s,
        b1=jax.random.normal(ks[6], (1, hidden_size), jnp.float32) * s,
        w2=jax.random.normal(ks[7], (hidden_size, embed_size), jnp.float32) * s,
        b2=jax.random.normal(ks[8], (1, embed_size), jnp.float32) * s,
        wg=emb.T,                                                 # (embed, vocab), tied
        bg=jax.random.normal(ks[9], (1, vocab_size), jnp.float32) * s,
    )
    return params


def cast_weights(params, dtype, cast_recurrent=False):
    """Cast weight matrices (not biases / activations) for the bf16 MXU path.
    By default only the epilogue weights are cast so recurrent rounding error
    does not compound over the decode loop."""
    p = dict(params)
    keys = ("w1", "w2", "wg") + (("wih", "whh") if cast_recurrent else ())
    for k in keys:
        p[k] = params[k].astype(dtype)
    return p


def reference_forward(hidden0, params, max_len):
    """Pure-JAX reference mirroring the PyTorch forward (decoder_type='self', eval)."""
    H = hidden0.shape[-1]
    origin = hidden0.sum(0)
    h = hidden0
    logits, outs = [], []
    for _ in range(max_len):
        x = origin
        new_h = []
        for layer in range(h.shape[0]):
            gi = x @ params["wih"][layer] + params["bih"][layer][0]
            gh = h[layer] @ params["whh"][layer] + params["bhh"][layer][0]
            r = jax.nn.sigmoid(gi[:, :H] + gh[:, :H])
            z = jax.nn.sigmoid(gi[:, H:2 * H] + gh[:, H:2 * H])
            n = jnp.tanh(gi[:, 2 * H:] + r * gh[:, 2 * H:])
            hn = (1.0 - z) * n + z * h[layer]
            new_h.append(hn)
            x = hn
        h = jnp.stack(new_h)
        proj = jnp.tanh(x @ params["w1"] + params["b1"])
        out = proj @ params["w2"] + params["b2"]
        logit = out @ params["wg"] + params["bg"]
        logits.append(logit)
        outs.append(out)
    return jnp.stack(logits, axis=1), jnp.stack(outs, axis=1)


if __name__ == "__main__":
    vocab_size, embed_size, hidden_size = 384, 128, 128
    num_layers, batch, max_len = 2, 8, 6

    key = jax.random.PRNGKey(0)
    kp, kh, kt = jax.random.split(key, 3)

    params = init_params(kp, vocab_size, embed_size, hidden_size, num_layers)
    hidden0 = jax.random.normal(kh, (num_layers, batch, hidden_size), jnp.float32)
    # trg only determines max_len; step() never reads the token in this path.
    trg = jax.random.randint(kt, (batch, max_len), 0, vocab_size)
    # linear_hidden is an unused argument of Decoder.forward in 'self' mode.
    # TODO(synk): Decoder.decode (greedy argmax loop) not implemented; forward() only.

    fwd = jax.jit(decoder_forward, static_argnames=("max_len",))

    ref_logit, ref_out = reference_forward(hidden0, params, max_len)

    # --- f32 weights ---------------------------------------------------------
    logit, output_asp = fwd(hidden0, params, max_len=int(trg.shape[1]))
    jax.block_until_ready((logit, output_asp))
    assert logit.shape == (batch, max_len, vocab_size)
    assert output_asp.shape == (batch, max_len, embed_size)
    assert jnp.allclose(logit, ref_logit, rtol=5e-3, atol=5e-3)
    assert jnp.allclose(output_asp, ref_out, rtol=5e-3, atol=5e-3)

    # --- bf16 epilogue weights / f32 recurrence & accumulation ---------------
    params_bf16 = cast_weights(params, jnp.bfloat16)
    logit_b, out_b = fwd(hidden0, params_bf16, max_len=int(trg.shape[1]))
    jax.block_until_ready((logit_b, out_b))
    assert jnp.allclose(logit_b, ref_logit, rtol=7.5e-2, atol=7.5e-2)
    assert jnp.allclose(out_b, ref_out, rtol=7.5e-2, atol=7.5e-2)

    print("KERNEL_OK")
</pallas_src>

<mosaic_0001>
module attributes {stable_mosaic.version = 11 : i64} {
  func.func @_recurrent_kernel(%arg0: memref<2x8x128xf32, #tpu.memory_space<vmem>>, %arg1: memref<2x128x384xf32, #tpu.memory_space<vmem>>, %arg2: memref<2x128x384xf32, #tpu.memory_space<vmem>>, %arg3: memref<2x1x384xf32, #tpu.memory_space<vmem>>, %arg4: memref<2x1x384xf32, #tpu.memory_space<vmem>>, %arg5: memref<6x8x128xf32, #tpu.memory_space<vmem>>) attributes {dimension_semantics = [], scalar_prefetch = 0 : i64, scratch_operands = 0 : i64, tpu.core_type = #tpu.core_type<tc>} {
    %c0 = arith.constant 0 : index
    %c0_0 = arith.constant 0 : index
    %c0_1 = arith.constant 0 : index
    %0 = vector.load %arg0[%c0, %c0_0, %c0_1] : memref<2x8x128xf32, #tpu.memory_space<vmem>>, vector<2x8x128xf32>
    %cst = arith.constant dense<0.000000e+00> : vector<8x128xf32>
    %1 = vector.multi_reduction <add>, %0, %cst [0] : vector<2x8x128xf32> to vector<8x128xf32>
    %c0_2 = arith.constant 0 : index
    %c0_3 = arith.constant 0 : index
    %c0_4 = arith.constant 0 : index
    %2 = vector.load %arg1[%c0_2, %c0_3, %c0_4] : memref<2x128x384xf32, #tpu.memory_space<vmem>>, vector<1x128x384xf32>
    %3 = vector.shape_cast %2 : vector<1x128x384xf32> to vector<128x384xf32>
    %c1 = arith.constant 1 : index
    %c0_5 = arith.constant 0 : index
    %c0_6 = arith.constant 0 : index
    %4 = vector.load %arg1[%c1, %c0_5, %c0_6] : memref<2x128x384xf32, #tpu.memory_space<vmem>>, vector<1x128x384xf32>
    %5 = vector.shape_cast %4 : vector<1x128x384xf32> to vector<128x384xf32>
    %c0_7 = arith.constant 0 : index
    %c0_8 = arith.constant 0 : index
    %c0_9 = arith.constant 0 : index
    %6 = vector.load %arg2[%c0_7, %c0_8, %c0_9] : memref<2x128x384xf32, #tpu.memory_space<vmem>>, vector<1x128x384xf32>
    %7 = vector.shape_cast %6 : vector<1x128x384xf32> to vector<128x384xf32>
    %c1_10 = arith.constant 1 : index
    %c0_11 = arith.constant 0 : index
    %c0_12 = arith.constant 0 : index
    %8 = vector.load %arg2[%c1_10, %c0_11, %c0_12] : memref<2x128x384xf32, #tpu.memory_space<vmem>>, vector<1x128x384xf32>
    %9 = vector.shape_cast %8 : vector<1x128x384xf32> to vector<128x384xf32>
    %c0_13 = arith.constant 0 : index
    %c0_14 = arith.constant 0 : index
    %c0_15 = arith.constant 0 : index
    %10 = vector.load %arg3[%c0_13, %c0_14, %c0_15] : memref<2x1x384xf32, #tpu.memory_space<vmem>>, vector<1x1x384xf32>
    %11 = vector.shape_cast %10 : vector<1x1x384xf32> to vector<1x384xf32>
    %12 = vector.shape_cast %11 : vector<1x384xf32> to vector<1x384xf32>
    %13 = vector.broadcast %12 : vector<1x384xf32> to vector<8x384xf32>
    %c1_16 = arith.constant 1 : index
    %c0_17 = arith.constant 0 : index
    %c0_18 = arith.constant 0 : index
    %14 = vector.load %arg3[%c1_16, %c0_17, %c0_18] : memref<2x1x384xf32, #tpu.memory_space<vmem>>, vector<1x1x384xf32>
    %15 = vector.shape_cast %14 : vector<1x1x384xf32> to vector<1x384xf32>
    %16 = vector.shape_cast %15 : vector<1x384xf32> to vector<1x384xf32>
    %17 = vector.broadcast %16 : vector<1x384xf32> to vector<8x384xf32>
    %c0_19 = arith.constant 0 : index
    %c0_20 = arith.constant 0 : index
    %c0_21 = arith.constant 0 : index
    %18 = vector.load %arg4[%c0_19, %c0_20, %c0_21] : memref<2x1x384xf32, #tpu.memory_space<vmem>>, vector<1x1x384xf32>
    %19 = vector.shape_cast %18 : vector<1x1x384xf32> to vector<1x384xf32>
    %20 = vector.shape_cast %19 : vector<1x384xf32> to vector<1x384xf32>
    %21 = vector.broadcast %20 : vector<1x384xf32> to vector<8x384xf32>
    %c1_22 = arith.constant 1 : index
    %c0_23 = arith.constant 0 : index
    %c0_24 = arith.constant 0 : index
    %22 = vector.load %arg4[%c1_22, %c0_23, %c0_24] : memref<2x1x384xf32, #tpu.memory_space<vmem>>, vector<1x1x384xf32>
    %23 = vector.shape_cast %22 : vector<1x1x384xf32> to vector<1x384xf32>
    %24 = vector.shape_cast %23 : vector<1x384xf32> to vector<1x384xf32>
    %25 = vector.broadcast %24 : vector<1x384xf32> to vector<8x384xf32>
    %cst_25 = arith.constant dense<0.000000e+00> : vector<8x384xf32>
    %26 = tpu.matmul %1, %3, %cst_25 {dimension_numbers = #tpu.dot_dimension_numbers<[1], [0], [0], [1], [0, 0, 1, 1], [], []>} : vector<8x128xf32>, vector<128x384xf32>, vector<8x384xf32> -> vector<8x384xf32>
    %27 = arith.addf %26, %13 : vector<8x384xf32>
    %c0_26 = arith.constant 0 : index
    %c0_27 = arith.constant 0 : index
    %c0_28 = arith.constant 0 : index
    %28 = vector.load %arg0[%c0_26, %c0_27, %c0_28] : memref<2x8x128xf32, #tpu.memory_space<vmem>>, vector<1x8x128xf32>
    %29 = vector.shape_cast %28 : vector<1x8x128xf32> to vector<8x128xf32>
    %c1_29 = arith.constant 1 : index
    %c0_30 = arith.constant 0 : index
    %c0_31 = arith.constant 0 : index
    %30 = vector.load %arg0[%c1_29, %c0_30, %c0_31] : memref<2x8x128xf32, #tpu.memory_space<vmem>>, vector<1x8x128xf32>
    %31 = vector.shape_cast %30 : vector<1x8x128xf32> to vector<8x128xf32>
    %c0_i32 = arith.constant 0 : i32
    %cst_32 = arith.constant dense<0.000000e+00> : vector<8x384xf32>
    %32 = tpu.matmul %29, %7, %cst_32 {dimension_numbers = #tpu.dot_dimension_numbers<[1], [0], [0], [1], [0, 0, 1, 1], [], []>} : vector<8x128xf32>, vector<128x384xf32>, vector<8x384xf32> -> vector<8x384xf32>
    %33 = arith.addf %32, %21 : vector<8x384xf32>
    %34 = vector.extract_strided_slice %27 {offsets = [0, 0], sizes = [8, 128], strides = [1, 1]} : vector<8x384xf32> to vector<8x128xf32>
    %35 = vector.extract_strided_slice %33 {offsets = [0, 0], sizes = [8, 128], strides = [1, 1]} : vector<8x384xf32> to vector<8x128xf32>
    %36 = arith.addf %34, %35 : vector<8x128xf32>
    %37 = arith.negf %36 : vector<8x128xf32>
    %38 = math.exp %37 : vector<8x128xf32>
    %cst_33 = arith.constant 1.000000e+00 : f32
    %39 = vector.broadcast %cst_33 : f32 to vector<8x128xf32>
    %40 = arith.addf %39, %38 : vector<8x128xf32>
    %41 = arith.divf %39, %40 : vector<8x128xf32>
    %42 = vector.extract_strided_slice %27 {offsets = [0, 128], sizes = [8, 128], strides = [1, 1]} : vector<8x384xf32> to vector<8x128xf32>
    %43 = vector.extract_strided_slice %33 {offsets = [0, 128], sizes = [8, 128], strides = [1, 1]} : vector<8x384xf32> to vector<8x128xf32>
    %44 = arith.addf %42, %43 : vector<8x128xf32>
    %45 = arith.negf %44 : vector<8x128xf32>
    %46 = math.exp %45 : vector<8x128xf32>
    %cst_34 = arith.constant 1.000000e+00 : f32
    %47 = vector.broadcast %cst_34 : f32 to vector<8x128xf32>
    %48 = arith.addf %47, %46 : vector<8x128xf32>
    %49 = arith.divf %47, %48 : vector<8x128xf32>
    %50 = vector.extract_strided_slice %27 {offsets = [0, 256], sizes = [8, 128], strides = [1, 1]} : vector<8x384xf32> to vector<8x128xf32>
    %51 = vector.extract_strided_slice %33 {offsets = [0, 256], sizes = [8, 128], strides = [1, 1]} : vector<8x384xf32> to vector<8x128xf32>
    %52 = arith.mulf %41, %51 : vector<8x128xf32>
    %53 = arith.addf %50, %52 : vector<8x128xf32>
    %54 = math.tanh %53 : vector<8x128xf32>
    %cst_35 = arith.constant 1.000000e+00 : f32
    %55 = vector.broadcast %cst_35 : f32 to vector<8x128xf32>
    %56 = arith.subf %55, %49 : vector<8x128xf32>
    %57 = arith.mulf %56, %54 : vector<8x128xf32>
    %58 = arith.mulf %49, %29 : vector<8x128xf32>
    %59 = arith.addf %57, %58 : vector<8x128xf32>
    %cst_36 = arith.constant dense<0.000000e+00> : vector<8x384xf32>
    %60 = tpu.matmul %59, %5, %cst_36 {dimension_numbers = #tpu.dot_dimension_numbers<[1], [0], [0], [1], [0, 0, 1, 1], [], []>} : vector<8x128xf32>, vector<128x384xf32>, vector<8x384xf32> -> vector<8x384xf32>
    %61 = arith.addf %60, %17 : vector<8x384xf32>
    %cst_37 = arith.constant dense<0.000000e+00> : vector<8x384xf32>
    %62 = tpu.matmul %31, %9, %cst_37 {dimension_numbers = #tpu.dot_dimension_numbers<[1], [0], [0], [1], [0, 0, 1, 1], [], []>} : vector<8x128xf32>, vector<128x384xf32>, vector<8x384xf32> -> vector<8x384xf32>
    %63 = arith.addf %62, %25 : vector<8x384xf32>
    %64 = vector.extract_strided_slice %61 {offsets = [0, 0], sizes = [8, 128], strides = [1, 1]} : vector<8x384xf32> to vector<8x128xf32>
    %65 = vector.extract_strided_slice %63 {offsets = [0, 0], sizes = [8, 128], strides = [1, 1]} : vector<8x384xf32> to vector<8x128xf32>
    %66 = arith.addf %64, %65 : vector<8x128xf32>
    %67 = arith.negf %66 : vector<8x128xf32>
    %68 = math.exp %67 : vector<8x128xf32>
    %cst_38 = arith.constant 1.000000e+00 : f32
    %69 = vector.broadcast %cst_38 : f32 to vector<8x128xf32>
    %70 = arith.addf %69, %68 : vector<8x128xf32>
    %71 = arith.divf %69, %70 : vector<8x128xf32>
    %72 = vector.extract_strided_slice %61 {offsets = [0, 128], sizes = [8, 128], strides = [1, 1]} : vector<8x384xf32> to vector<8x128xf32>
    %73 = vector.extract_strided_slice %63 {offsets = [0, 128], sizes = [8, 128], strides = [1, 1]} : vector<8x384xf32> to vector<8x128xf32>
    %74 = arith.addf %72, %73 : vector<8x128xf32>
    %75 = arith.negf %74 : vector<8x128xf32>
    %76 = math.exp %75 : vector<8x128xf32>
    %cst_39 = arith.constant 1.000000e+00 : f32
    %77 = vector.broadcast %cst_39 : f32 to vector<8x128xf32>
    %78 = arith.addf %77, %76 : vector<8x128xf32>
    %79 = arith.divf %77, %78 : vector<8x128xf32>
    %80 = vector.extract_strided_slice %61 {offsets = [0, 256], sizes = [8, 128], strides = [1, 1]} : vector<8x384xf32> to vector<8x128xf32>
    %81 = vector.extract_strided_slice %63 {offsets = [0, 256], sizes = [8, 128], strides = [1, 1]} : vector<8x384xf32> to vector<8x128xf32>
    %82 = arith.mulf %71, %81 : vector<8x128xf32>
    %83 = arith.addf %80, %82 : vector<8x128xf32>
    %84 = math.tanh %83 : vector<8x128xf32>
    %cst_40 = arith.constant 1.000000e+00 : f32
    %85 = vector.broadcast %cst_40 : f32 to vector<8x128xf32>
    %86 = arith.subf %85, %79 : vector<8x128xf32>
    %87 = arith.mulf %86, %84 : vector<8x128xf32>
    %88 = arith.mulf %79, %31 : vector<8x128xf32>
    %89 = arith.addf %87, %88 : vector<8x128xf32>
    %90 = arith.index_cast %c0_i32 : i32 to index
    %c0_41 = arith.constant 0 : index
    %c0_42 = arith.constant 0 : index
    %91 = vector.load %arg5[%90, %c0_41, %c0_42] : memref<6x8x128xf32, #tpu.memory_space<vmem>>, vector<1x8x128xf32>
    %92 = vector.shape_cast %91 : vector<1x8x128xf32> to vector<8x128xf32>
    %93 = vector.shape_cast %89 : vector<8x128xf32> to vector<1x8x128xf32>
    tpu.vector_store %arg5[%90, %c0_41, %c0_42], %93 {strides = array<i32>} : memref<6x8x128xf32, #tpu.memory_space<vmem>>, vector<1x8x128xf32>,
    %c1_i32 = arith.constant 1 : i32
    %cst_43 = arith.constant dense<0.000000e+00> : vector<8x384xf32>
    %94 = tpu.matmul %59, %7, %cst_43 {dimension_numbers = #tpu.dot_dimension_numbers<[1], [0], [0], [1], [0, 0, 1, 1], [], []>} : vector<8x128xf32>, vector<128x384xf32>, vector<8x384xf32> -> vector<8x384xf32>
    %95 = arith.addf %94, %21 : vector<8x384xf32>
    %96 = vector.extract_strided_slice %27 {offsets = [0, 0], sizes = [8, 128], strides = [1, 1]} : vector<8x384xf32> to vector<8x128xf32>
    %97 = vector.extract_strided_slice %95 {offsets = [0, 0], sizes = [8, 128], strides = [1, 1]} : vector<8x384xf32> to vector<8x128xf32>
    %98 = arith.addf %96, %97 : vector<8x128xf32>
    %99 = arith.negf %98 : vector<8x128xf32>
    %100 = math.exp %99 : vector<8x128xf32>
    %cst_44 = arith.constant 1.000000e+00 : f32
    %101 = vector.broadcast %cst_44 : f32 to vector<8x128xf32>
    %102 = arith.addf %101, %100 : vector<8x128xf32>
    %103 = arith.divf %101, %102 : vector<8x128xf32>
    %104 = vector.extract_strided_slice %27 {offsets = [0, 128], sizes = [8, 128], strides = [1, 1]} : vector<8x384xf32> to vector<8x128xf32>
    %105 = vector.extract_strided_slice %95 {offsets = [0, 128], sizes = [8, 128], strides = [1, 1]} : vector<8x384xf32> to vector<8x128xf32>
    %106 = arith.addf %104, %105 : vector<8x128xf32>
    %107 = arith.negf %106 : vector<8x128xf32>
    %108 = math.exp %107 : vector<8x128xf32>
    %cst_45 = arith.constant 1.000000e+00 : f32
    %109 = vector.broadcast %cst_45 : f32 to vector<8x128xf32>
    %110 = arith.addf %109, %108 : vector<8x128xf32>
    %111 = arith.divf %109, %110 : vector<8x128xf32>
    %112 = vector.extract_strided_slice %27 {offsets = [0, 256], sizes = [8, 128], strides = [1, 1]} : vector<8x384xf32> to vector<8x128xf32>
    %113 = vector.extract_strided_slice %95 {offsets = [0, 256], sizes = [8, 128], strides = [1, 1]} : vector<8x384xf32> to vector<8x128xf32>
    %114 = arith.mulf %103, %113 : vector<8x128xf32>
    %115 = arith.addf %112, %114 : vector<8x128xf32>
    %116 = math.tanh %115 : vector<8x128xf32>
    %cst_46 = arith.constant 1.000000e+00 : f32
    %117 = vector.broadcast %cst_46 : f32 to vector<8x128xf32>
    %118 = arith.subf %117, %111 : vector<8x128xf32>
    %119 = arith.mulf %118, %116 : vector<8x128xf32>
    %120 = arith.mulf %111, %59 : vector<8x128xf32>
    %121 = arith.addf %119, %120 : vector<8x128xf32>
    %cst_47 = arith.constant dense<0.000000e+00> : vector<8x384xf32>
    %122 = tpu.matmul %121, %5, %cst_47 {dimension_numbers = #tpu.dot_dimension_numbers<[1], [0], [0], [1], [0, 0, 1, 1], [], []>} : vector<8x128xf32>, vector<128x384xf32>, vector<8x384xf32> -> vector<8x384xf32>
    %123 = arith.addf %122, %17 : vector<8x384xf32>
    %cst_48 = arith.constant dense<0.000000e+00> : vector<8x384xf32>
    %124 = tpu.matmul %89, %9, %cst_48 {dimension_numbers = #tpu.dot_dimension_numbers<[1], [0], [0], [1], [0, 0, 1, 1], [], []>} : vector<8x128xf32>, vector<128x384xf32>, vector<8x384xf32> -> vector<8x384xf32>
    %125 = arith.addf %124, %25 : vector<8x384xf32>
    %126 = vector.extract_strided_slice %123 {offsets = [0, 0], sizes = [8, 128], strides = [1, 1]} : vector<8x384xf32> to vector<8x128xf32>
    %127 = vector.extract_strided_slice %125 {offsets = [0, 0], sizes = [8, 128], strides = [1, 1]} : vector<8x384xf32> to vector<8x128xf32>
    %128 = arith.addf %126, %127 : vector<8x128xf32>
    %129 = arith.negf %128 : vector<8x128xf32>
    %130 = math.exp %129 : vector<8x128xf32>
    %cst_49 = arith.constant 1.000000e+00 : f32
    %131 = vector.broadcast %cst_49 : f32 to vector<8x128xf32>
    %132 = arith.addf %131, %130 : vector<8x128xf32>
    %133 = arith.divf %131, %132 : vector<8x128xf32>
    %134 = vector.extract_strided_slice %123 {offsets = [0, 128], sizes = [8, 128], strides = [1, 1]} : vector<8x384xf32> to vector<8x128xf32>
    %135 = vector.extract_strided_slice %125 {offsets = [0, 128], sizes = [8, 128], strides = [1, 1]} : vector<8x384xf32> to vector<8x128xf32>
    %136 = arith.addf %134, %135 : vector<8x128xf32>
    %137 = arith.negf %136 : vector<8x128xf32>
    %138 = math.exp %137 : vector<8x128xf32>
    %cst_50 = arith.constant 1.000000e+00 : f32
    %139 = vector.broadcast %cst_50 : f32 to vector<8x128xf32>
    %140 = arith.addf %139, %138 : vector<8x128xf32>
    %141 = arith.divf %139, %140 : vector<8x128xf32>
    %142 = vector.extract_strided_slice %123 {offsets = [0, 256], sizes = [8, 128], strides = [1, 1]} : vector<8x384xf32> to vector<8x128xf32>
    %143 = vector.extract_strided_slice %125 {offsets = [0, 256], sizes = [8, 128], strides = [1, 1]} : vector<8x384xf32> to vector<8x128xf32>
    %144 = arith.mulf %133, %143 : vector<8x128xf32>
    %145 = arith.addf %142, %144 : vector<8x128xf32>
    %146 = math.tanh %145 : vector<8x128xf32>
    %cst_51 = arith.constant 1.000000e+00 : f32
    %147 = vector.broadcast %cst_51 : f32 to vector<8x128xf32>
    %148 = arith.subf %147, %141 : vector<8x128xf32>
    %149 = arith.mulf %148, %146 : vector<8x128xf32>
    %150 = arith.mulf %141, %89 : vector<8x128xf32>
    %151 = arith.addf %149, %150 : vector<8x128xf32>
    %152 = arith.index_cast %c1_i32 : i32 to index
    %c0_52 = arith.constant 0 : index
    %c0_53 = arith.constant 0 : index
    %153 = vector.load %arg5[%152, %c0_52, %c0_53] : memref<6x8x128xf32, #tpu.memory_space<vmem>>, vector<1x8x128xf32>
    %154 = vector.shape_cast %153 : vector<1x8x128xf32> to vector<8x128xf32>
    %155 = vector.shape_cast %151 : vector<8x128xf32> to vector<1x8x128xf32>
    tpu.vector_store %arg5[%152, %c0_52, %c0_53], %155 {strides = array<i32>} : memref<6x8x128xf32, #tpu.memory_space<vmem>>, vector<1x8x128xf32>,
    %c2_i32 = arith.constant 2 : i32
    %cst_54 = arith.constant dense<0.000000e+00> : vector<8x384xf32>
    %156 = tpu.matmul %121, %7, %cst_54 {dimension_numbers = #tpu.dot_dimension_numbers<[1], [0], [0], [1], [0, 0, 1, 1], [], []>} : vector<8x128xf32>, vector<128x384xf32>, vector<8x384xf32> -> vector<8x384xf32>
    %157 = arith.addf %156, %21 : vector<8x384xf32>
    %158 = vector.extract_strided_slice %27 {offsets = [0, 0], sizes = [8, 128], strides = [1, 1]} : vector<8x384xf32> to vector<8x128xf32>
    %159 = vector.extract_strided_slice %157 {offsets = [0, 0], sizes = [8, 128], strides = [1, 1]} : vector<8x384xf32> to vector<8x128xf32>
    %160 = arith.addf %158, %159 : vector<8x128xf32>
    %161 = arith.negf %160 : vector<8x128xf32>
    %162 = math.exp %161 : vector<8x128xf32>
    %cst_55 = arith.constant 1.000000e+00 : f32
    %163 = vector.broadcast %cst_55 : f32 to vector<8x128xf32>
    %164 = arith.addf %163, %162 : vector<8x128xf32>
    %165 = arith.divf %163, %164 : vector<8x128xf32>
    %166 = vector.extract_strided_slice %27 {offsets = [0, 128], sizes = [8, 128], strides = [1, 1]} : vector<8x384xf32> to vector<8x128xf32>
    %167 = vector.extract_strided_slice %157 {offsets = [0, 128], sizes = [8, 128], strides = [1, 1]} : vector<8x384xf32> to vector<8x128xf32>
    %168 = arith.addf %166, %167 : vector<8x128xf32>
    %169 = arith.negf %168 : vector<8x128xf32>
    %170 = math.exp %169 : vector<8x128xf32>
    %cst_56 = arith.constant 1.000000e+00 : f32
    %171 = vector.broadcast %cst_56 : f32 to vector<8x128xf32>
    %172 = arith.addf %171, %170 : vector<8x128xf32>
    %173 = arith.divf %171, %172 : vector<8x128xf32>
    %174 = vector.extract_strided_slice %27 {offsets = [0, 256], sizes = [8, 128], strides = [1, 1]} : vector<8x384xf32> to vector<8x128xf32>
    %175 = vector.extract_strided_slice %157 {offsets = [0, 256], sizes = [8, 128], strides = [1, 1]} : vector<8x384xf32> to vector<8x128xf32>
    %176 = arith.mulf %165, %175 : vector<8x128xf32>
    %177 = arith.addf %174, %176 : vector<8x128xf32>
    %178 = math.tanh %177 : vector<8x128xf32>
    %cst_57 = arith.constant 1.000000e+00 : f32
    %179 = vector.broadcast %cst_57 : f32 to vector<8x128xf32>
    %180 = arith.subf %179, %173 : vector<8x128xf32>
    %181 = arith.mulf %180, %178 : vector<8x128xf32>
    %182 = arith.mulf %173, %121 : vector<8x128xf32>
    %183 = arith.addf %181, %182 : vector<8x128xf32>
    %cst_58 = arith.constant dense<0.000000e+00> : vector<8x384xf32>
    %184 = tpu.matmul %183, %5, %cst_58 {dimension_numbers = #tpu.dot_dimension_numbers<[1], [0], [0], [1], [0, 0, 1, 1], [], []>} : vector<8x128xf32>, vector<128x384xf32>, vector<8x384xf32> -> vector<8x384xf32>
    %185 = arith.addf %184, %17 : vector<8x384xf32>
    %cst_59 = arith.constant dense<0.000000e+00> : vector<8x384xf32>
    %186 = tpu.matmul %151, %9, %cst_59 {dimension_numbers = #tpu.dot_dimension_numbers<[1], [0], [0], [1], [0, 0, 1, 1], [], []>} : vector<8x128xf32>, vector<128x384xf32>, vector<8x384xf32> -> vector<8x384xf32>
    %187 = arith.addf %186, %25 : vector<8x384xf32>
    %188 = vector.extract_strided_slice %185 {offsets = [0, 0], sizes = [8, 128], strides = [1, 1]} : vector<8x384xf32> to vector<8x128xf32>
    %189 = vector.extract_strided_slice %187 {offsets = [0, 0], sizes = [8, 128], strides = [1, 1]} : vector<8x384xf32> to vector<8x128xf32>
    %190 = arith.addf %188, %189 : vector<8x128xf32>
    %191 = arith.negf %190 : vector<8x128xf32>
    %192 = math.exp %191 : vector<8x128xf32>
    %cst_60 = arith.constant 1.000000e+00 : f32
    %193 = vector.broadcast %cst_60 : f32 to vector<8x128xf32>
    %194 = arith.addf %193, %192 : vector<8x128xf32>
    %195 = arith.divf %193, %194 : vector<8x128xf32>
    %196 = vector.extract_strided_slice %185 {offsets = [0, 128], sizes = [8, 128], strides = [1, 1]} : vector<8x384xf32> to vector<8x128xf32>
    %197 = vector.extract_strided_slice %187 {offsets = [0, 128], sizes = [8, 128], strides = [1, 1]} : vector<8x384xf32> to vector<8x128xf32>
    %198 = arith.addf %196, %197 : vector<8x128xf32>
    %199 = arith.negf %198 : vector<8x128xf32>
    %200 = math.exp %199 : vector<8x128xf32>
    %cst_61 = arith.constant 1.000000e+00 : f32
    %201 = vector.broadcast %cst_61 : f32 to vector<8x128xf32>
    %202 = arith.addf %201, %200 : vector<8x128xf32>
    %203 = arith.divf %201, %202 : vector<8x128xf32>
    %204 = vector.extract_strided_slice %185 {offsets = [0, 256], sizes = [8, 128], strides = [1, 1]} : vector<8x384xf32> to vector<8x128xf32>
    %205 = vector.extract_strided_slice %187 {offsets = [0, 256], sizes = [8, 128], strides = [1, 1]} : vector<8x384xf32> to vector<8x128xf32>
    %206 = arith.mulf %195, %205 : vector<8x128xf32>
    %207 = arith.addf %204, %206 : vector<8x128xf32>
    %208 = math.tanh %207 : vector<8x128xf32>
    %cst_62 = arith.constant 1.000000e+00 : f32
    %209 = vector.broadcast %cst_62 : f32 to vector<8x128xf32>
    %210 = arith.subf %209, %203 : vector<8x128xf32>
    %211 = arith.mulf %210, %208 : vector<8x128xf32>
    %212 = arith.mulf %203, %151 : vector<8x128xf32>
    %213 = arith.addf %211, %212 : vector<8x128xf32>
    %214 = arith.index_cast %c2_i32 : i32 to index
    %c0_63 = arith.constant 0 : index
    %c0_64 = arith.constant 0 : index
    %215 = vector.load %arg5[%214, %c0_63, %c0_64] : memref<6x8x128xf32, #tpu.memory_space<vmem>>, vector<1x8x128xf32>
    %216 = vector.shape_cast %215 : vector<1x8x128xf32> to vector<8x128xf32>
    %217 = vector.shape_cast %213 : vector<8x128xf32> to vector<1x8x128xf32>
    tpu.vector_store %arg5[%214, %c0_63, %c0_64], %217 {strides = array<i32>} : memref<6x8x128xf32, #tpu.memory_space<vmem>>, vector<1x8x128xf32>,
    %c3_i32 = arith.constant 3 : i32
    %cst_65 = arith.constant dense<0.000000e+00> : vector<8x384xf32>
    %218 = tpu.matmul %183, %7, %cst_65 {dimension_numbers = #tpu.dot_dimension_numbers<[1], [0], [0], [1], [0, 0, 1, 1], [], []>} : vector<8x128xf32>, vector<128x384xf32>, vector<8x384xf32> -> vector<8x384xf32>
    %219 = arith.addf %218, %21 : vector<8x384xf32>
    %220 = vector.extract_strided_slice %27 {offsets = [0, 0], sizes = [8, 128], strides = [1, 1]} : vector<8x384xf32> to vector<8x128xf32>
    %221 = vector.extract_strided_slice %219 {offsets = [0, 0], sizes = [8, 128], strides = [1, 1]} : vector<8x384xf32> to vector<8x128xf32>
    %222 = arith.addf %220, %221 : vector<8x128xf32>
    %223 = arith.negf %222 : vector<8x128xf32>
    %224 = math.exp %223 : vector<8x128xf32>
    %cst_66 = arith.constant 1.000000e+00 : f32
    %225 = vector.broadcast %cst_66 : f32 to vector<8x128xf32>
    %226 = arith.addf %225, %224 : vector<8x128xf32>
    %227 = arith.divf %225, %226 : vector<8x128xf32>
    %228 = vector.extract_strided_slice %27 {offsets = [0, 128], sizes = [8, 128], strides = [1, 1]} : vector<8x384xf32> to vector<8x128xf32>
    %229 = vector.extract_strided_slice %219 {offsets = [0, 128], sizes = [8, 128], strides = [1, 1]} : vector<8x384xf32> to vector<8x128xf32>
    %230 = arith.addf %228, %229 : vector<8x128xf32>
    %231 = arith.negf %230 : vector<8x128xf32>
    %232 = math.exp %231 : vector<8x128xf32>
    %cst_67 = arith.constant 1.000000e+00 : f32
    %233 = vector.broadcast %cst_67 : f32 to vector<8x128xf32>
    %234 = arith.addf %233, %232 : vector<8x128xf32>
    %235 = arith.divf %233, %234 : vector<8x128xf32>
    %236 = vector.extract_strided_slice %27 {offsets = [0, 256], sizes = [8, 128], strides = [1, 1]} : vector<8x384xf32> to vector<8x128xf32>
    %237 = vector.extract_strided_slice %219 {offsets = [0, 256], sizes = [8, 128], strides = [1, 1]} : vector<8x384xf32> to vector<8x128xf32>
    %238 = arith.mulf %227, %237 : vector<8x128xf32>
    %239 = arith.addf %236, %238 : vector<8x128xf32>
    %240 = math.tanh %239 : vector<8x128xf32>
    %cst_68 = arith.constant 1.000000e+00 : f32
    %241 = vector.broadcast %cst_68 : f32 to vector<8x128xf32>
    %242 = arith.subf %241, %235 : vector<8x128xf32>
    %243 = arith.mulf %242, %240 : vector<8x128xf32>
    %244 = arith.mulf %235, %183 : vector<8x128xf32>
    %245 = arith.addf %243, %244 : vector<8x128xf32>
    %cst_69 = arith.constant dense<0.000000e+00> : vector<8x384xf32>
    %246 = tpu.matmul %245, %5, %cst_69 {dimension_numbers = #tpu.dot_dimension_numbers<[1], [0], [0], [1], [0, 0, 1, 1], [], []>} : vector<8x128xf32>, vector<128x384xf32>, vector<8x384xf32> -> vector<8x384xf32>
    %247 = arith.addf %246, %17 : vector<8x384xf32>
    %cst_70 = arith.constant dense<0.000000e+00> : vector<8x384xf32>
    %248 = tpu.matmul %213, %9, %cst_70 {dimension_numbers = #tpu.dot_dimension_numbers<[1], [0], [0], [1], [0, 0, 1, 1], [], []>} : vector<8x128xf32>, vector<128x384xf32>, vector<8x384xf32> -> vector<8x384xf32>
    %249 = arith.addf %248, %25 : vector<8x384xf32>
    %250 = vector.extract_strided_slice %247 {offsets = [0, 0], sizes = [8, 128], strides = [1, 1]} : vector<8x384xf32> to vector<8x128xf32>
    %251 = vector.extract_strided_slice %249 {offsets = [0, 0], sizes = [8, 128], strides = [1, 1]} : vector<8x384xf32> to vector<8x128xf32>
    %252 = arith.addf %250, %251 : vector<8x128xf32>
    %253 = arith.negf %252 : vector<8x128xf32>
    %254 = math.exp %253 : vector<8x128xf32>
    %cst_71 = arith.constant 1.000000e+00 : f32
    %255 = vector.broadcast %cst_71 : f32 to vector<8x128xf32>
    %256 = arith.addf %255, %254 : vector<8x128xf32>
    %257 = arith.divf %255, %256 : vector<8x128xf32>
    %258 = vector.extract_strided_slice %247 {offsets = [0, 128], sizes = [8, 128], strides = [1, 1]} : vector<8x384xf32> to vector<8x128xf32>
    %259 = vector.extract_strided_slice %249 {offsets = [0, 128], sizes = [8, 128], strides = [1, 1]} : vector<8x384xf32> to vector<8x128xf32>
    %260 = arith.addf %258, %259 : vector<8x128xf32>
    %261 = arith.negf %260 : vector<8x128xf32>
    %262 = math.exp %261 : vector<8x128xf32>
    %cst_72 = arith.constant 1.000000e+00 : f32
    %263 = vector.broadcast %cst_72 : f32 to vector<8x128xf32>
    %264 = arith.addf %263, %262 : vector<8x128xf32>
    %265 = arith.divf %263, %264 : vector<8x128xf32>
    %266 = vector.extract_strided_slice %247 {offsets = [0, 256], sizes = [8, 128], strides = [1, 1]} : vector<8x384xf32> to vector<8x128xf32>
    %267 = vector.extract_strided_slice %249 {offsets = [0, 256], sizes = [8, 128], strides = [1, 1]} : vector<8x384xf32> to vector<8x128xf32>
    %268 = arith.mulf %257, %267 : vector<8x128xf32>
    %269 = arith.addf %266, %268 : vector<8x128xf32>
    %270 = math.tanh %269 : vector<8x128xf32>
    %cst_73 = arith.constant 1.000000e+00 : f32
    %271 = vector.broadcast %cst_73 : f32 to vector<8x128xf32>
    %272 = arith.subf %271, %265 : vector<8x128xf32>
    %273 = arith.mulf %272, %270 : vector<8x128xf32>
    %274 = arith.mulf %265, %213 : vector<8x128xf32>
    %275 = arith.addf %273, %274 : vector<8x128xf32>
    %276 = arith.index_cast %c3_i32 : i32 to index
    %c0_74 = arith.constant 0 : index
    %c0_75 = arith.constant 0 : index
    %277 = vector.load %arg5[%276, %c0_74, %c0_75] : memref<6x8x128xf32, #tpu.memory_space<vmem>>, vector<1x8x128xf32>
    %278 = vector.shape_cast %277 : vector<1x8x128xf32> to vector<8x128xf32>
    %279 = vector.shape_cast %275 : vector<8x128xf32> to vector<1x8x128xf32>
    tpu.vector_store %arg5[%276, %c0_74, %c0_75], %279 {strides = array<i32>} : memref<6x8x128xf32, #tpu.memory_space<vmem>>, vector<1x8x128xf32>,
    %c4_i32 = arith.constant 4 : i32
    %cst_76 = arith.constant dense<0.000000e+00> : vector<8x384xf32>
    %280 = tpu.matmul %245, %7, %cst_76 {dimension_numbers = #tpu.dot_dimension_numbers<[1], [0], [0], [1], [0, 0, 1, 1], [], []>} : vector<8x128xf32>, vector<128x384xf32>, vector<8x384xf32> -> vector<8x384xf32>
    %281 = arith.addf %280, %21 : vector<8x384xf32>
    %282 = vector.extract_strided_slice %27 {offsets = [0, 0], sizes = [8, 128], strides = [1, 1]} : vector<8x384xf32> to vector<8x128xf32>
    %283 = vector.extract_strided_slice %281 {offsets = [0, 0], sizes = [8, 128], strides = [1, 1]} : vector<8x384xf32> to vector<8x128xf32>
    %284 = arith.addf %282, %283 : vector<8x128xf32>
    %285 = arith.negf %284 : vector<8x128xf32>
    %286 = math.exp %285 : vector<8x128xf32>
    %cst_77 = arith.constant 1.000000e+00 : f32
    %287 = vector.broadcast %cst_77 : f32 to vector<8x128xf32>
    %288 = arith.addf %287, %286 : vector<8x128xf32>
    %289 = arith.divf %287, %288 : vector<8x128xf32>
    %290 = vector.extract_strided_slice %27 {offsets = [0, 128], sizes = [8, 128], strides = [1, 1]} : vector<8x384xf32> to vector<8x128xf32>
    %291 = vector.extract_strided_slice %281 {offsets = [0, 128], sizes = [8, 128], strides = [1, 1]} : vector<8x384xf32> to vector<8x128xf32>
    %292 = arith.addf %290, %291 : vector<8x128xf32>
    %293 = arith.negf %292 : vector<8x128xf32>
    %294 = math.exp %293 : vector<8x128xf32>
    %cst_78 = arith.constant 1.000000e+00 : f32
    %295 = vector.broadcast %cst_78 : f32 to vector<8x128xf32>
    %296 = arith.addf %295, %294 : vector<8x128xf32>
    %297 = arith.divf %295, %296 : vector<8x128xf32>
    %298 = vector.extract_strided_slice %27 {offsets = [0, 256], sizes = [8, 128], strides = [1, 1]} : vector<8x384xf32> to vector<8x128xf32>
    %299 = vector.extract_strided_slice %281 {offsets = [0, 256], sizes = [8, 128], strides = [1, 1]} : vector<8x384xf32> to vector<8x128xf32>
    %300 = arith.mulf %289, %299 : vector<8x128xf32>
    %301 = arith.addf %298, %300 : vector<8x128xf32>
    %302 = math.tanh %301 : vector<8x128xf32>
    %cst_79 = arith.constant 1.000000e+00 : f32
    %303 = vector.broadcast %cst_79 : f32 to vector<8x128xf32>
    %304 = arith.subf %303, %297 : vector<8x128xf32>
    %305 = arith.mulf %304, %302 : vector<8x128xf32>
    %306 = arith.mulf %297, %245 : vector<8x128xf32>
    %307 = arith.addf %305, %306 : vector<8x128xf32>
    %cst_80 = arith.constant dense<0.000000e+00> : vector<8x384xf32>
    %308 = tpu.matmul %307, %5, %cst_80 {dimension_numbers = #tpu.dot_dimension_numbers<[1], [0], [0], [1], [0, 0, 1, 1], [], []>} : vector<8x128xf32>, vector<128x384xf32>, vector<8x384xf32> -> vector<8x384xf32>
    %309 = arith.addf %308, %17 : vector<8x384xf32>
    %cst_81 = arith.constant dense<0.000000e+00> : vector<8x384xf32>
    %310 = tpu.matmul %275, %9, %cst_81 {dimension_numbers = #tpu.dot_dimension_numbers<[1], [0], [0], [1], [0, 0, 1, 1], [], []>} : vector<8x128xf32>, vector<128x384xf32>, vector<8x384xf32> -> vector<8x384xf32>
    %311 = arith.addf %310, %25 : vector<8x384xf32>
    %312 = vector.extract_strided_slice %309 {offsets = [0, 0], sizes = [8, 128], strides = [1, 1]} : vector<8x384xf32> to vector<8x128xf32>
    %313 = vector.extract_strided_slice %311 {offsets = [0, 0], sizes = [8, 128], strides = [1, 1]} : vector<8x384xf32> to vector<8x128xf32>
    %314 = arith.addf %312, %313 : vector<8x128xf32>
    %315 = arith.negf %314 : vector<8x128xf32>
    %316 = math.exp %315 : vector<8x128xf32>
    %cst_82 = arith.constant 1.000000e+00 : f32
    %317 = vector.broadcast %cst_82 : f32 to vector<8x128xf32>
    %318 = arith.addf %317, %316 : vector<8x128xf32>
    %319 = arith.divf %317, %318 : vector<8x128xf32>
    %320 = vector.extract_strided_slice %309 {offsets = [0, 128], sizes = [8, 128], strides = [1, 1]} : vector<8x384xf32> to vector<8x128xf32>
    %321 = vector.extract_strided_slice %311 {offsets = [0, 128], sizes = [8, 128], strides = [1, 1]} : vector<8x384xf32> to vector<8x128xf32>
    %322 = arith.addf %320, %321 : vector<8x128xf32>
    %323 = arith.negf %322 : vector<8x128xf32>
    %324 = math.exp %323 : vector<8x128xf32>
    %cst_83 = arith.constant 1.000000e+00 : f32
    %325 = vector.broadcast %cst_83 : f32 to vector<8x128xf32>
    %326 = arith.addf %325, %324 : vector<8x128xf32>
    %327 = arith.divf %325, %326 : vector<8x128xf32>
    %328 = vector.extract_strided_slice %309 {offsets = [0, 256], sizes = [8, 128], strides = [1, 1]} : vector<8x384xf32> to vector<8x128xf32>
    %329 = vector.extract_strided_slice %311 {offsets = [0, 256], sizes = [8, 128], strides = [1, 1]} : vector<8x384xf32> to vector<8x128xf32>
    %330 = arith.mulf %319, %329 : vector<8x128xf32>
    %331 = arith.addf %328, %330 : vector<8x128xf32>
    %332 = math.tanh %331 : vector<8x128xf32>
    %cst_84 = arith.constant 1.000000e+00 : f32
    %333 = vector.broadcast %cst_84 : f32 to vector<8x128xf32>
    %334 = arith.subf %333, %327 : vector<8x128xf32>
    %335 = arith.mulf %334, %332 : vector<8x128xf32>
    %336 = arith.mulf %327, %275 : vector<8x128xf32>
    %337 = arith.addf %335, %336 : vector<8x128xf32>
    %338 = arith.index_cast %c4_i32 : i32 to index
    %c0_85 = arith.constant 0 : index
    %c0_86 = arith.constant 0 : index
    %339 = vector.load %arg5[%338, %c0_85, %c0_86] : memref<6x8x128xf32, #tpu.memory_space<vmem>>, vector<1x8x128xf32>
    %340 = vector.shape_cast %339 : vector<1x8x128xf32> to vector<8x128xf32>
    %341 = vector.shape_cast %337 : vector<8x128xf32> to vector<1x8x128xf32>
    tpu.vector_store %arg5[%338, %c0_85, %c0_86], %341 {strides = array<i32>} : memref<6x8x128xf32, #tpu.memory_space<vmem>>, vector<1x8x128xf32>,
    %c5_i32 = arith.constant 5 : i32
    %cst_87 = arith.constant dense<0.000000e+00> : vector<8x384xf32>
    %342 = tpu.matmul %307, %7, %cst_87 {dimension_numbers = #tpu.dot_dimension_numbers<[1], [0], [0], [1], [0, 0, 1, 1], [], []>} : vector<8x128xf32>, vector<128x384xf32>, vector<8x384xf32> -> vector<8x384xf32>
    %343 = arith.addf %342, %21 : vector<8x384xf32>
    %344 = vector.extract_strided_slice %27 {offsets = [0, 0], sizes = [8, 128], strides = [1, 1]} : vector<8x384xf32> to vector<8x128xf32>
    %345 = vector.extract_strided_slice %343 {offsets = [0, 0], sizes = [8, 128], strides = [1, 1]} : vector<8x384xf32> to vector<8x128xf32>
    %346 = arith.addf %344, %345 : vector<8x128xf32>
    %347 = arith.negf %346 : vector<8x128xf32>
    %348 = math.exp %347 : vector<8x128xf32>
    %cst_88 = arith.constant 1.000000e+00 : f32
    %349 = vector.broadcast %cst_88 : f32 to vector<8x128xf32>
    %350 = arith.addf %349, %348 : vector<8x128xf32>
    %351 = arith.divf %349, %350 : vector<8x128xf32>
    %352 = vector.extract_strided_slice %27 {offsets = [0, 128], sizes = [8, 128], strides = [1, 1]} : vector<8x384xf32> to vector<8x128xf32>
    %353 = vector.extract_strided_slice %343 {offsets = [0, 128], sizes = [8, 128], strides = [1, 1]} : vector<8x384xf32> to vector<8x128xf32>
    %354 = arith.addf %352, %353 : vector<8x128xf32>
    %355 = arith.negf %354 : vector<8x128xf32>
    %356 = math.exp %355 : vector<8x128xf32>
    %cst_89 = arith.constant 1.000000e+00 : f32
    %357 = vector.broadcast %cst_89 : f32 to vector<8x128xf32>
    %358 = arith.addf %357, %356 : vector<8x128xf32>
    %359 = arith.divf %357, %358 : vector<8x128xf32>
    %360 = vector.extract_strided_slice %27 {offsets = [0, 256], sizes = [8, 128], strides = [1, 1]} : vector<8x384xf32> to vector<8x128xf32>
    %361 = vector.extract_strided_slice %343 {offsets = [0, 256], sizes = [8, 128], strides = [1, 1]} : vector<8x384xf32> to vector<8x128xf32>
    %362 = arith.mulf %351, %361 : vector<8x128xf32>
    %363 = arith.addf %360, %362 : vector<8x128xf32>
    %364 = math.tanh %363 : vector<8x128xf32>
    %cst_90 = arith.constant 1.000000e+00 : f32
    %365 = vector.broadcast %cst_90 : f32 to vector<8x128xf32>
    %366 = arith.subf %365, %359 : vector<8x128xf32>
    %367 = arith.mulf %366, %364 : vector<8x128xf32>
    %368 = arith.mulf %359, %307 : vector<8x128xf32>
    %369 = arith.addf %367, %368 : vector<8x128xf32>
    %cst_91 = arith.constant dense<0.000000e+00> : vector<8x384xf32>
    %370 = tpu.matmul %369, %5, %cst_91 {dimension_numbers = #tpu.dot_dimension_numbers<[1], [0], [0], [1], [0, 0, 1, 1], [], []>} : vector<8x128xf32>, vector<128x384xf32>, vector<8x384xf32> -> vector<8x384xf32>
    %371 = arith.addf %370, %17 : vector<8x384xf32>
    %cst_92 = arith.constant dense<0.000000e+00> : vector<8x384xf32>
    %372 = tpu.matmul %337, %9, %cst_92 {dimension_numbers = #tpu.dot_dimension_numbers<[1], [0], [0], [1], [0, 0, 1, 1], [], []>} : vector<8x128xf32>, vector<128x384xf32>, vector<8x384xf32> -> vector<8x384xf32>
    %373 = arith.addf %372, %25 : vector<8x384xf32>
    %374 = vector.extract_strided_slice %371 {offsets = [0, 0], sizes = [8, 128], strides = [1, 1]} : vector<8x384xf32> to vector<8x128xf32>
    %375 = vector.extract_strided_slice %373 {offsets = [0, 0], sizes = [8, 128], strides = [1, 1]} : vector<8x384xf32> to vector<8x128xf32>
    %376 = arith.addf %374, %375 : vector<8x128xf32>
    %377 = arith.negf %376 : vector<8x128xf32>
    %378 = math.exp %377 : vector<8x128xf32>
    %cst_93 = arith.constant 1.000000e+00 : f32
    %379 = vector.broadcast %cst_93 : f32 to vector<8x128xf32>
    %380 = arith.addf %379, %378 : vector<8x128xf32>
    %381 = arith.divf %379, %380 : vector<8x128xf32>
    %382 = vector.extract_strided_slice %371 {offsets = [0, 128], sizes = [8, 128], strides = [1, 1]} : vector<8x384xf32> to vector<8x128xf32>
    %383 = vector.extract_strided_slice %373 {offsets = [0, 128], sizes = [8, 128], strides = [1, 1]} : vector<8x384xf32> to vector<8x128xf32>
    %384 = arith.addf %382, %383 : vector<8x128xf32>
    %385 = arith.negf %384 : vector<8x128xf32>
    %386 = math.exp %385 : vector<8x128xf32>
    %cst_94 = arith.constant 1.000000e+00 : f32
    %387 = vector.broadcast %cst_94 : f32 to vector<8x128xf32>
    %388 = arith.addf %387, %386 : vector<8x128xf32>
    %389 = arith.divf %387, %388 : vector<8x128xf32>
    %390 = vector.extract_strided_slice %371 {offsets = [0, 256], sizes = [8, 128], strides = [1, 1]} : vector<8x384xf32> to vector<8x128xf32>
    %391 = vector.extract_strided_slice %373 {offsets = [0, 256], sizes = [8, 128], strides = [1, 1]} : vector<8x384xf32> to vector<8x128xf32>
    %392 = arith.mulf %381, %391 : vector<8x128xf32>
    %393 = arith.addf %390, %392 : vector<8x128xf32>
    %394 = math.tanh %393 : vector<8x128xf32>
    %cst_95 = arith.constant 1.000000e+00 : f32
    %395 = vector.broadcast %cst_95 : f32 to vector<8x128xf32>
    %396 = arith.subf %395, %389 : vector<8x128xf32>
    %397 = arith.mulf %396, %394 : vector<8x128xf32>
    %398 = arith.mulf %389, %337 : vector<8x128xf32>
    %399 = arith.addf %397, %398 : vector<8x128xf32>
    %400 = arith.index_cast %c5_i32 : i32 to index
    %c0_96 = arith.constant 0 : index
    %c0_97 = arith.constant 0 : index
    %401 = vector.load %arg5[%400, %c0_96, %c0_97] : memref<6x8x128xf32, #tpu.memory_space<vmem>>, vector<1x8x128xf32>
    %402 = vector.shape_cast %401 : vector<1x8x128xf32> to vector<8x128xf32>
    %403 = vector.shape_cast %399 : vector<8x128xf32> to vector<1x8x128xf32>
    tpu.vector_store %arg5[%400, %c0_96, %c0_97], %403 {strides = array<i32>} : memref<6x8x128xf32, #tpu.memory_space<vmem>>, vector<1x8x128xf32>,
    %c6_i32 = arith.constant 6 : i32
    return
  }
}

module attributes {stable_mosaic.version = 11 : i64} {
  func.func @_epilogue_kernel(%arg0: i32, %arg1: i32, %arg2: memref<16x128xf32, #tpu.memory_space<vmem>>, %arg3: memref<128x128xf32, #tpu.memory_space<vmem>>, %arg4: memref<1x128xf32, #tpu.memory_space<vmem>>, %arg5: memref<128x128xf32, #tpu.memory_space<vmem>>, %arg6: memref<1x128xf32, #tpu.memory_space<vmem>>, %arg7: memref<128x128xf32, #tpu.memory_space<vmem>>, %arg8: memref<1x128xf32, #tpu.memory_space<vmem>>, %arg9: memref<16x128xf32, #tpu.memory_space<vmem>>, %arg10: memref<16x128xf32, #tpu.memory_space<vmem>>, %arg11: memref<16x128xf32, #tpu.memory_space<vmem>>) attributes {dimension_semantics = [#tpu.dimension_semantics<parallel>, #tpu.dimension_semantics<arbitrary>], iteration_bounds = array<i64: 3, 3>, scalar_prefetch = 0 : i64, scratch_operands = 1 : i64, tpu.core_type = #tpu.core_type<tc>, window_params = [{transform_indices = @transform_0, window_bounds = array<i64: 16, 128>}, {pipeline_mode = #tpu.pipeline_mode<synchronous>, transform_indices = @transform_1, window_bounds = array<i64: 128, 128>}, {pipeline_mode = #tpu.pipeline_mode<synchronous>, transform_indices = @transform_2, window_bounds = array<i64: 1, 128>}, {pipeline_mode = #tpu.pipeline_mode<synchronous>, transform_indices = @transform_3, window_bounds = array<i64: 128, 128>}, {pipeline_mode = #tpu.pipeline_mode<synchronous>, transform_indices = @transform_4, window_bounds = array<i64: 1, 128>}, {transform_indices = @transform_5, window_bounds = array<i64: 128, 128>}, {transform_indices = @transform_6, window_bounds = array<i64: 1, 128>}, {transform_indices = @transform_7, window_bounds = array<i64: 16, 128>}, {transform_indices = @transform_8, window_bounds = array<i64: 16, 128>}]} {
    %c0_i32 = arith.constant 0 : i32
    %0 = arith.cmpi eq, %arg1, %c0_i32 : i32
    %1 = arith.extui %0 : i1 to i32
    %c0_i32_0 = arith.constant 0 : i32
    %2 = arith.cmpi ne, %1, %c0_i32_0 : i32
    scf.if %2 {
      %c0_8 = arith.constant 0 : index
      %c0_9 = arith.constant 0 : index
      %10 = vector.load %arg2[%c0_8, %c0_9] : memref<16x128xf32, #tpu.memory_space<vmem>>, vector<16x128xf32>
      %c0_10 = arith.constant 0 : index
      %c0_11 = arith.constant 0 : index
      %11 = vector.load %arg3[%c0_10, %c0_11] : memref<128x128xf32, #tpu.memory_space<vmem>>, vector<128x128xf32>
      %cst_12 = arith.constant dense<0.000000e+00> : vector<16x128xf32>
      %12 = tpu.matmul %10, %11, %cst_12 {dimension_numbers = #tpu.dot_dimension_numbers<[1], [0], [0], [1], [0, 0, 1, 1], [], []>} : vector<16x128xf32>, vector<128x128xf32>, vector<16x128xf32> -> vector<16x128xf32>
      %c0_13 = arith.constant 0 : index
      %c0_14 = arith.constant 0 : index
      %13 = vector.load %arg4[%c0_13, %c0_14] : memref<1x128xf32, #tpu.memory_space<vmem>>, vector<1x128xf32>
      %14 = vector.broadcast %13 : vector<1x128xf32> to vector<16x128xf32>
      %15 = arith.addf %12, %14 : vector<16x128xf32>
      %16 = math.tanh %15 : vector<16x128xf32>
      %c0_15 = arith.constant 0 : index
      %c0_16 = arith.constant 0 : index
      %17 = vector.load %arg11[%c0_15, %c0_16] : memref<16x128xf32, #tpu.memory_space<vmem>>, vector<16x128xf32>
      tpu.vector_store %arg11[%c0_15, %c0_16], %16 {strides = array<i32>} : memref<16x128xf32, #tpu.memory_space<vmem>>, vector<16x128xf32>,
      %c0_17 = arith.constant 0 : index
      %c0_18 = arith.constant 0 : index
      %18 = vector.load %arg5[%c0_17, %c0_18] : memref<128x128xf32, #tpu.memory_space<vmem>>, vector<128x128xf32>
      %cst_19 = arith.constant dense<0.000000e+00> : vector<16x128xf32>
      %19 = tpu.matmul %16, %18, %cst_19 {dimension_numbers = #tpu.dot_dimension_numbers<[1], [0], [0], [1], [0, 0, 1, 1], [], []>} : vector<16x128xf32>, vector<128x128xf32>, vector<16x128xf32> -> vector<16x128xf32>
      %c0_20 = arith.constant 0 : index
      %c0_21 = arith.constant 0 : index
      %20 = vector.load %arg6[%c0_20, %c0_21] : memref<1x128xf32, #tpu.memory_space<vmem>>, vector<1x128xf32>
      %21 = vector.broadcast %20 : vector<1x128xf32> to vector<16x128xf32>
      %22 = arith.addf %19, %21 : vector<16x128xf32>
      %c0_22 = arith.constant 0 : index
      %c0_23 = arith.constant 0 : index
      %23 = vector.load %arg10[%c0_22, %c0_23] : memref<16x128xf32, #tpu.memory_space<vmem>>, vector<16x128xf32>
      tpu.vector_store %arg10[%c0_22, %c0_23], %22 {strides = array<i32>} : memref<16x128xf32, #tpu.memory_space<vmem>>, vector<16x128xf32>,
    } else {
    }
    %c0 = arith.constant 0 : index
    %c0_1 = arith.constant 0 : index
    %3 = vector.load %arg11[%c0, %c0_1] : memref<16x128xf32, #tpu.memory_space<vmem>>, vector<16x128xf32>
    %c0_2 = arith.constant 0 : index
    %c0_3 = arith.constant 0 : index
    %4 = vector.load %arg7[%c0_2, %c0_3] : memref<128x128xf32, #tpu.memory_space<vmem>>, vector<128x128xf32>
    %cst = arith.constant dense<0.000000e+00> : vector<16x128xf32>
    %5 = tpu.matmul %3, %4, %cst {dimension_numbers = #tpu.dot_dimension_numbers<[1], [0], [0], [1], [0, 0, 1, 1], [], []>} : vector<16x128xf32>, vector<128x128xf32>, vector<16x128xf32> -> vector<16x128xf32>
    %c0_4 = arith.constant 0 : index
    %c0_5 = arith.constant 0 : index
    %6 = vector.load %arg8[%c0_4, %c0_5] : memref<1x128xf32, #tpu.memory_space<vmem>>, vector<1x128xf32>
    %7 = vector.broadcast %6 : vector<1x128xf32> to vector<16x128xf32>
    %8 = arith.addf %5, %7 : vector<16x128xf32>
    %c0_6 = arith.constant 0 : index
    %c0_7 = arith.constant 0 : index
    %9 = vector.load %arg9[%c0_6, %c0_7] : memref<16x128xf32, #tpu.memory_space<vmem>>, vector<16x128xf32>
    tpu.vector_store %arg9[%c0_6, %c0_7], %8 {strides = array<i32>} : memref<16x128xf32, #tpu.memory_space<vmem>>, vector<16x128xf32>,
    return
  }
  func.func @transform_0(%arg0: i32, %arg1: i32) -> (i32, i32) {
    %c0_i32 = arith.constant 0 : i32
    %c0_i32_0 = arith.constant 0 : i32
    return %arg0, %c0_i32 : i32, i32
  }
  func.func @transform_1(%arg0: i32, %arg1: i32) -> (i32, i32) {
    %c0_i32 = arith.constant 0 : i32
    %c0_i32_0 = arith.constant 0 : i32
    %c0_i32_1 = arith.constant 0 : i32
    return %c0_i32, %c0_i32_0 : i32, i32
  }
  func.func @transform_2(%arg0: i32, %arg1: i32) -> (i32, i32) {
    %c0_i32 = arith.constant 0 : i32
    %c0_i32_0 = arith.constant 0 : i32
    %c0_i32_1 = arith.constant 0 : i32
    return %c0_i32, %c0_i32_0 : i32, i32
  }
  func.func @transform_3(%arg0: i32, %arg1: i32) -> (i32, i32) {
    %c0_i32 = arith.constant 0 : i32
    %c0_i32_0 = arith.constant 0 : i32
    %c0_i32_1 = arith.constant 0 : i32
    return %c0_i32, %c0_i32_0 : i32, i32
  }
  func.func @transform_4(%arg0: i32, %arg1: i32) -> (i32, i32) {
    %c0_i32 = arith.constant 0 : i32
    %c0_i32_0 = arith.constant 0 : i32
    %c0_i32_1 = arith.constant 0 : i32
    return %c0_i32, %c0_i32_0 : i32, i32
  }
  func.func @transform_5(%arg0: i32, %arg1: i32) -> (i32, i32) {
    %c0_i32 = arith.constant 0 : i32
    %c0_i32_0 = arith.constant 0 : i32
    return %c0_i32, %arg1 : i32, i32
  }
  func.func @transform_6(%arg0: i32, %arg1: i32) -> (i32, i32) {
    %c0_i32 = arith.constant 0 : i32
    %c0_i32_0 = arith.constant 0 : i32
    return %c0_i32, %arg1 : i32, i32
  }
  func.func @transform_7(%arg0: i32, %arg1: i32) -> (i32, i32) {
    %c0_i32 = arith.constant 0 : i32
    return %arg0, %arg1 : i32, i32
  }
  func.func @transform_8(%arg0: i32, %arg1: i32) -> (i32, i32) {
    %c0_i32 = arith.constant 0 : i32
    %c0_i32_0 = arith.constant 0 : i32
    return %arg0, %c0_i32 : i32, i32
  }
}

</mosaic_0001>

<bundles_post_ra>
// kernel: decoder_forward.3
= control target key start
LH: loop header
LB: loop body
LE: loop exit
PB: predicated region body
PF: predicated region fallthrough
CT: control target
= control target key end

     0   :  { %s2007_s0 = inlined_call_operand.vmem [shape: f32[48,128], index: 0, kind: input, shape index: {}]   ;;  %s2008_s1 = inlined_call_operand.vmem [shape: f32[128,128], index: 1, kind: input, shape index: {}]   ;;  %s2009_s2 = inlined_call_operand.vmem [shape: f32[1,128], index: 2, kind: input, shape index: {}]   ;;  %s2010_s3 = inlined_call_operand.vmem [shape: f32[128,128], index: 3, kind: input, shape index: {}]   ;;  %s2011_s4 = inlined_call_operand.vmem [shape: f32[1,128], index: 4, kind: input, shape index: {}]   ;;  %s2012_s5 = inlined_call_operand.vmem [shape: f32[128,384], index: 5, kind: input, shape index: {}]   ;;  %s2013_s6 = inlined_call_operand.vmem [shape: f32[1,384], index: 6, kind: input, shape index: {}]   ;;  %s2014_s7 = inlined_call_operand.hbm [shape: f32[48,384], index: 7, kind: output, shape index: {0}]   ;;  %s2015_s8 = inlined_call_operand.hbm [shape: f32[48,128], index: 8, kind: output, shape index: {1}]  }
   0x1   :  { %2027 = sst [smem:[#allocation20_spill]] %s2007_s0 }
   0x2   :  { %2028 = sst [smem:[#allocation21_spill]] %s2008_s1 }
   0x3   :  { %2029 = sst [smem:[#allocation22_spill]] %s2009_s2 }
   0x4   :  { %2030 = sst [smem:[#allocation23_spill]] %s2011_s4 }
   0x5   :  { %2031 = sst [smem:[#allocation24_spill]] %s2012_s5 }
   0x6   :  { %2032 = sst [smem:[#allocation25_spill]] %s2014_s7 }
   0x7   :  { %2033 = sst [smem:[#allocation26_spill]] %s2015_s8 }
   0x8   :  { %14 = vsyncpa [#allocation5], 0 }
   0x9   :  { %16 = vsyncpa [#allocation5 + $0x1], 0 }
   0xa   :  { %17 = vsyncpa [#allocation7], 0 }
   0xb   :  { %19 = vsyncpa [#allocation7 + $0x1], 0  ;;  %s1565_s27 = smov 0   ;;  %s1567_s28 = smov 0  }
   0xc   :  { %s1569_s29 = smov 0   ;;  %s1571_s30 = smov 0  }
   0xd   :  { %s1573_s9 = smov 0   ;;  %s1575_s10 = smov 0  }
   0xe   :  { %s1577_s11 = smov 0   ;;  %s1579_s12 = smov 0  }
   0xf   :  { %s1581_s13 = smov 0   ;;  %s1583_s14 = smov 0  }
  0x10   :  { %s1585_s15 = smov 0   ;;  %s1587_s16 = smov 0  }
  0x11   :  { %s1589_s17 = smov 0  }
  0x12 LB: > { %2034 = sst [smem:[#allocation10_spill]] %s1473_s29  ;;  %s942_s18 = sadd.s32 4294967295, %s1513_s17   ;;  %s1513_s17 = sphi %s1589_s17, %s25_s17   ;;  %s1509_s16 = sphi %s1587_s16, %s2069_s16   ;;  %s1505_s15 = sphi %s1585_s15, %s2068_s15   ;;  %s1501_s14 = sphi %s1583_s14, %s2067_s14   ;;  %s1497_s13 = sphi %s1581_s13, %s2066_s13   ;;  %s1493_s12 = sphi %s1579_s12, %s2065_s12   ;;  %s1489_s11 = sphi %s1577_s11, %s2064_s11   ;;  %s1485_s10 = sphi %s1575_s10, %s2063_s10   ;;  %s1481_s9 = sphi %s1573_s9, %s2073_s9   ;;  %s1477_s30 = sphi %s1571_s30, %s2072_s30   ;;  %s1473_s29 = sphi %s1569_s29, %s2061_s29   ;;  %s1469_s28 = sphi %s1567_s28, %s2071_s28   ;;  %s1465_s27 = sphi %s1565_s27, %s2070_s27  }
  0x13   : > { %2035 = sst [smem:[#allocation11_spill]] %s1485_s10  ;;  %s943_s19 = sadd.s32 4294967294, %s1513_s17  }
  0x14   : > { %2036 = sst [smem:[#allocation12_spill]] %s1493_s12  ;;  %s34_s20 = sadd.s32 1, %s1505_s15 }
  0x15   : > { %2037 = sst [smem:[#allocation13_spill]] %s1505_s15  ;;  %s37_s21 = sadd.s32 1, %s1509_s16 }
  0x16   : > { %2038 = sst [smem:[#allocation14_spill]] %s1509_s16  ;;  %p35_p0 = scmp.ge.s32.totalorder %s34_s20, 3 }
  0x17   : > { %s154_s22 = sadd.s32 1, %s1493_s12  ;;  %p161_p1 = scmp.ne.s32.totalorder %s1493_s12, %s1489_s11 }
  0x18   : > { %p162_p2 = scmp.eq.s32.totalorder %s1513_s17, 0  ;;  %s2075_s20 = smov (%p35_p0, %s34_s20), 0 }
  0x19   : > { %2039 = sst [smem:[#allocation15_spill]] %s2075_s20  ;;  %s2077_s21 = smov (!%p35_p0, %s37_s21), %s1509_s16 }
  0x1a   : > { %s151_s23 = ssub.s32 %s1505_s15, %s2075_s20  ;;  %p1643_p3 = por %p162_p2, %p161_p1 }
  0x1b   : > { %p39_p4 = scmp.ge.s32.totalorder %s2077_s21, 3  ;;  %p152_p5 = scmp.eq.s32.totalorder %s151_s23, 0 }
  0x1c   : > { %s208_s25 = sadd.s32 1, %s1485_s10  ;;  %p218_p6 = scmp.ne.s32.totalorder %s1485_s10, %s1481_s9 }
  0x1d   : > { %s2079_s21 = smov (%p39_p4, %s2077_s21), 0  ;;  %p1657_p7 = scmp.eq.s32.totalorder %s942_s18, 8 }
  0x1e   : > { %2041 = sst [smem:[#allocation16_spill]] %s2079_s21  ;;  %s203_s20 = ssub.s32 %s1509_s16, %s2079_s21 }
  0x1f   : > { %s1653_s26 = scalar_select %p152_p5, %s1493_s12, %s154_s22  }
  0x20   : > { %s205_s8 = sor.u32 %s203_s20, %s151_s23  ;;  %p224_p8 = scmp.ne.s32.totalorder %s1481_s9, %s1477_s30 }
  0x21   : > { %2042 = sst [smem:[#allocation17_spill]] %s1653_s26  ;;  %p206_p9 = scmp.eq.s32.totalorder %s205_s8, 0 }
  0x22   : > { %p1665_p10 = por %p1657_p7, %p218_p6  ;;  %p225_p11 = scmp.eq.s32.totalorder %s943_s19, 8 }
  0x23   : > { %p232_p12 = scmp.eq.s32.totalorder %s203_s20, 0  ;;  %s234_s18 = sadd.s32 1, %s1473_s29 }
  0x24   : > { %s1670_s2 = scalar_select %p206_p9, %s1485_s10, %s208_s25  }
  0x25   : > { %p1672_p13 = por %p225_p11, %p224_p8  ;;  %p244_p0 = scmp.ne.s32.totalorder %s1473_s29, %s1469_s28 }
  0x26   : > { %2045 = sst [smem:[#allocation18_spill]] %s1670_s2  ;;  %p250_p1 = scmp.ne.s32.totalorder %s1469_s28, %s1465_s27 }
  0x27   : > { %s1678_s21 = scalar_select %p232_p12, %s1473_s29, %s234_s18  }
  0x28   : > { %p1686_p2 = por %p244_p0, %p1657_p7  ;;  %p1690_p4 = por %p250_p1, %p225_p11 }
  0x29   : > { %2047 = sst [smem:[#allocation19_spill]] %s1678_s21  ;;  %p945_p5 = scmp.ge.s32.totalorder %s1513_s17, 9 }
  0x2b   : > { %279 = sbr.rel (%p945_p5) target bundleno = 68 (0x44), region = 32 }
  0x32   : > { %291 = sbr.rel (!%p1643_p3) target bundleno = 68 (0x44), region = 40  ;;  %s293_s19 = sand.u32 (%p1643_p3), 1, %s1493_s12  }
  0x33   : > { %s947_s20 = sshll.u32 (%p1643_p3), %s1505_s15, 3  ;;  %s946_s25 = sshll.u32 (%p1643_p3), %s293_s19, 7 }
  0x34   : > { %s2050_s5 = sld [smem:[#allocation24_spill]] (%p1643_p3)  ;;  %s295_s24 = scalar_lea.vmem (%p1643_p3), [#allocation3], %s946_s25 }
  0x3a   : > { %s1702_s16 = scalar_lea.vmem %s2050_s5, %s947_s20 }
  0x3b   : > { %v355_v0 = vld [vmem:[%s1702_s16] sm:$0xff]  ;;  %v357_v1 = vld [vmem:[%s1702_s16 + $0x18] sm:$0xff]  ;;  %v359_v2 = vld [vmem:[%s1702_s16 + $0x30] sm:$0xff] }
  0x3c   : > { %356 = vst [vmem:[%s295_s24] sm:$0xff] %v355_v0  ;;  %358 = vst [vmem:[%s295_s24 + $0x8] sm:$0xff] %v357_v1  ;;  %v361_v3 = vld [vmem:[%s1702_s16 + $0x48] sm:$0xff]  ;;  %v363_v4 = vld [vmem:[%s1702_s16 + $0x60] sm:$0xff] }
  0x3d   : > { %360 = vst [vmem:[%s295_s24 + $0x10] sm:$0xff] %v359_v2  ;;  %v365_v5 = vld [vmem:[%s1702_s16 + $0x78] sm:$0xff]  ;;  %362 = vst [vmem:[%s295_s24 + $0x18] sm:$0xff] %v361_v3  ;;  %v367_v6 = vld [vmem:[%s1702_s16 + $0x90] sm:$0xff] }
  0x3e   : > { %364 = vst [vmem:[%s295_s24 + $0x20] sm:$0xff] %v363_v4  ;;  %366 = vst [vmem:[%s295_s24 + $0x28] sm:$0xff] %v365_v5  ;;  %v369_v7 = vld [vmem:[%s1702_s16 + $0xa8] sm:$0xff]  ;;  %v371_v8 = vld [vmem:[%s1702_s16 + $0xc0] sm:$0xff] }
  0x3f   : > { %368 = vst [vmem:[%s295_s24 + $0x30] sm:$0xff] %v367_v6  ;;  %370 = vst [vmem:[%s295_s24 + $0x38] sm:$0xff] %v369_v7  ;;  %v373_v9 = vld [vmem:[%s1702_s16 + $0xd8] sm:$0xff]  ;;  %v375_v10 = vld [vmem:[%s1702_s16 + $0xf0] sm:$0xff] }
  0x40   : > { %372 = vst [vmem:[%s295_s24 + $0x40] sm:$0xff] %v371_v8  ;;  %v377_v11 = vld [vmem:[%s1702_s16 + $0x108] sm:$0xff]  ;;  %374 = vst [vmem:[%s295_s24 + $0x48] sm:$0xff] %v373_v9  ;;  %v379_v12 = vld [vmem:[%s1702_s16 + $0x120] sm:$0xff] }
  0x41   : > { %376 = vst [vmem:[%s295_s24 + $0x50] sm:$0xff] %v375_v10  ;;  %378 = vst [vmem:[%s295_s24 + $0x58] sm:$0xff] %v377_v11  ;;  %v381_v13 = vld [vmem:[%s1702_s16 + $0x138] sm:$0xff]  ;;  %v383_v14 = vld [vmem:[%s1702_s16 + $0x150] sm:$0xff] }
  0x42   : > { %380 = vst [vmem:[%s295_s24 + $0x60] sm:$0xff] %v379_v12  ;;  %382 = vst [vmem:[%s295_s24 + $0x68] sm:$0xff] %v381_v13  ;;  %v385_v15 = vld [vmem:[%s1702_s16 + $0x168] sm:$0xff] }
  0x43   : > { %384 = vst [vmem:[%s295_s24 + $0x70] sm:$0xff] %v383_v14  ;;  %386 = vst [vmem:[%s295_s24 + $0x78] sm:$0xff] %v385_v15 }
  0x44 PF: > { %p948_p3 = scmp.ge.s32.totalorder %s1513_s17, 1  ;;  %p397_p6 = scmp.lt.s32.totalorder %s1513_s17, 10 }
  0x46   : > { %p398_p7 = pnand %p948_p3, %p397_p6 }
  0x47   : > { %s404_s19 = sand.u32 (!%p398_p7), 1, %s1489_s11   ;;  %s2023_s20 = sand.u32 (!%p398_p7), 1, %s1481_s9  }
  0x48   : > { %401 = sbr.rel (%p398_p7) target bundleno = 828 (0x33c), region = 82  ;;  %s949_s16 = sshll.u32 (!%p398_p7), %s404_s19, 7 }
  0x49   : > { %s950_s25 = sshll.u32 (!%p398_p7), %s2023_s20, 4  ;;  %s2025_s7 = sand.u32 (!%p398_p7), 1, %s1469_s28  }
  0x4a   : > { %s952_s18 = sshll.u32 (!%p398_p7), %s1501_s14, 1  ;;  %s951_s24 = sshll.u32 (!%p398_p7), %s2025_s7, 4 }
  0x4b   : > { %p451_p8 = scmp.lt.s32.totalorder (!%p398_p7), %s952_s18, 5  ;;  %p456_p9 = scmp.lt.s32.totalorder (!%p398_p7), %s1497_s13, 2 }
  0x4c   : > { %s2051_s0 = sld [smem:[#allocation20_spill]] (!%p398_p7)  ;;  %s1743_s10 = scalar_lea.vmem (!%p398_p7), [#allocation3], %s949_s16 }
  0x4d   : > { %s1745_s21 = scalar_lea.vmem (!%p398_p7), [#allocation4], %s950_s25  ;;  %s1747_s7 = scalar_lea.vmem (!%p398_p7), [#allocation6], %s951_s24 }
  0x4e   : > { %p954_p11 = scmp.ne.s32.totalorder (!%p398_p7), %s1497_s13, 0 }
  0x4f   : > { %s2081_s18 = smov (!%p451_p8, %s952_s18), 5  ;;  %s2052_s1 = sld [smem:[#allocation21_spill]] (!%p954_p11)  ;;  %v569_v28 = vld [vmem:[%s2010_s3] sm:$0xff] (!%p954_p11)  ;;  %v570_v29 = vld [vmem:[%s2010_s3 + $0x8] sm:$0xff] (!%p954_p11)  ;;  %v571_v30 = vld [vmem:[%s2010_s3 + $0x10] sm:$0xff] (!%p954_p11) }
  0x50   : > { %s1732_s5 = scalar_select %p456_p9, %s1497_s13, 2 }
  0x51   : > { %s953_s15 = sshll.u32 %s2081_s18, 3  ;;  %464 = sbr.rel (%p954_p11) target bundleno = 563 (0x233), region = 90  ;;  %v1159_v31 = vpack.c.bf16 (!%p954_p11), %v570_v29, %v569_v28  ;;  %v572_v32 = vld [vmem:[%s2010_s3 + $0x18] sm:$0xff] (!%p954_p11)  ;;  %v573_v34 = vld [vmem:[%s2010_s3 + $0x20] sm:$0xff] (!%p954_p11)  ;;  %v574_v35 = vld [vmem:[%s2010_s3 + $0x28] sm:$0xff] (!%p954_p11) }
  0x52   : > { %s1737_s2 = scalar_lea.vmem %s2051_s0, %s953_s15  ;;  %s458_s20 = scalar_lea.vmem %s2013_s6, %s1732_s5  ;;  %v1163_v33 = vpack.c.bf16 (!%p954_p11), %v572_v32, %v571_v30  ;;  %v1167_v39 = vpack.c.bf16 (!%p954_p11), %v574_v35, %v573_v34  ;;  %v575_v40 = vld [vmem:[%s2010_s3 + $0x30] sm:$0xff] (!%p954_p11)  ;;  %v576_v41 = vld [vmem:[%s2010_s3 + $0x38] sm:$0xff] (!%p954_p11)  ;;  %v577_v54 = vld [vmem:[%s2010_s3 + $0x40] sm:$0xff] (!%p954_p11) }
  0x53   : > { %v465_v27 = vld [vmem:[%s1737_s2] sm:$0xff] (!%p954_p11)  ;;  %1160 = vmatprep.subr.bf16.mxu1 (!%p954_p11), %v1159_v31  ;;  %v1171_v45 = vpack.c.bf16 (!%p954_p11), %v576_v41, %v575_v40  ;;  %v466_v53 = vld [vmem:[%s1737_s2 + $0x8] sm:$0xff] (!%p954_p11)  ;;  %v579_v57 = vld [vmem:[%s2010_s3 + $0x50] sm:$0xff] (!%p954_p11)  ;;  %s2053_s11 = sld [smem:[#allocation22_spill]] (!%p954_p11)  ;;  %s2054_s25 = sld [smem:[#allocation23_spill]] (!%p954_p11) }
  0x54   : > { %1054 = vmatprep.mubr.f32.mxu0 (!%p954_p11), %v465_v27  ;;  %1162 = vmatpush3.bf16.msra.mxu1 (!%p954_p11), %v1159_v31  ;;  %v578_v55 = vld [vmem:[%s2010_s3 + $0x48] sm:$0xff] (!%p954_p11)  ;;  %v580_v58 = vld [vmem:[%s2010_s3 + $0x58] sm:$0xff] (!%p954_p11)  ;;  %v581_v60 = vld [vmem:[%s2010_s3 + $0x60] sm:$0xff] (!%p954_p11) }
  0x55   : > { %v467_v16 = vld [vmem:[%s2052_s1] sm:$0xff] (!%p954_p11)  ;;  %v468_v17 = vld [vmem:[%s2052_s1 + $0x8] sm:$0xff] (!%p954_p11)  ;;  %v469_v18 = vld [vmem:[%s2052_s1 + $0x10] sm:$0xff] (!%p954_p11)  ;;  %1164 = vmatprep.subr.bf16.mxu1 (!%p954_p11), %v1163_v33  ;;  %v1175_v56 = vpack.c.bf16 (!%p954_p11), %v578_v55, %v577_v54  ;;  %v1179_v59 = vpack.c.bf16 (!%p954_p11), %v580_v58, %v579_v57 }
  0x56   : > { %v1127_v19 = vpack.c.bf16 (!%p954_p11), %v468_v17, %v467_v16  ;;  %v470_v20 = vld [vmem:[%s2052_s1 + $0x18] sm:$0xff] (!%p954_p11)  ;;  %v471_v22 = vld [vmem:[%s2052_s1 + $0x20] sm:$0xff] (!%p954_p11)  ;;  %v472_v23 = vld [vmem:[%s2052_s1 + $0x28] sm:$0xff] (!%p954_p11) }
  0x57   : > { %v1131_v21 = vpack.c.bf16 (!%p954_p11), %v470_v20, %v469_v18  ;;  %v1135_v24 = vpack.c.bf16 (!%p954_p11), %v472_v23, %v471_v22  ;;  %v473_v25 = vld [vmem:[%s2052_s1 + $0x30] sm:$0xff] (!%p954_p11)  ;;  %v474_v26 = vld [vmem:[%s2052_s1 + $0x38] sm:$0xff] (!%p954_p11)  ;;  %v475_v37 = vld [vmem:[%s2052_s1 + $0x40] sm:$0xff] (!%p954_p11) }
  0x58   : > { %1128 = vmatprep.subr.bf16.mxu0 %v1127_v19  ;;  %v1139_v36 = vpack.c.bf16 %v474_v26, %v473_v25  ;;  %v476_v38 = vld [vmem:[%s2052_s1 + $0x48] sm:$0xff]  ;;  %v477_v43 = vld [vmem:[%s2052_s1 + $0x50] sm:$0xff]  ;;  %v478_v44 = vld [vmem:[%s2052_s1 + $0x58] sm:$0xff]  ;;  %1166 = vmatpush3.bf16.msra.mxu1 %v1163_v33 }
  0x59   : > { %1130 = vmatpush3.bf16.msra.mxu0 %v1127_v19  ;;  %v1143_v42 = vpack.c.bf16 %v476_v38, %v475_v37  ;;  %1168 = vmatprep.subr.bf16.mxu1 %v1167_v39  ;;  %v1147_v46 = vpack.c.bf16 %v478_v44, %v477_v43  ;;  %v479_v47 = vld [vmem:[%s2052_s1 + $0x60] sm:$0xff]  ;;  %v480_v48 = vld [vmem:[%s2052_s1 + $0x68] sm:$0xff]  ;;  %v481_v50 = vld [vmem:[%s2052_s1 + $0x70] sm:$0xff] }
  0x5a   : > { %1132 = vmatprep.subr.bf16.mxu0 %v1131_v21  ;;  %v1151_v49 = vpack.c.bf16 %v480_v48, %v479_v47  ;;  %v482_v51 = vld [vmem:[%s2052_s1 + $0x78] sm:$0xff]  ;;  %v582_v61 = vld [vmem:[%s2010_s3 + $0x68] sm:$0xff]  ;;  %v583_v63 = vld [vmem:[%s2010_s3 + $0x70] sm:$0xff] }
  0x5b   : > { %v1155_v52 = vpack.c.bf16 %v482_v51, %v481_v50  ;;  %v1183_v62 = vpack.c.bf16 %v582_v61, %v581_v60  ;;  %v584_v0 = vld [vmem:[%s2010_s3 + $0x78] sm:$0xff]  ;;  %v955_v2 = vld [vmem:[%s2053_s11] ss:$0 sm:$0xff] }
  0x5c   : > { %1170 = vmatpush3.bf16.msra.mxu1 %v1167_v39  ;;  %v1187_v1 = vpack.c.bf16 %v584_v0, %v583_v63  ;;  %v956_v9 = vld [vmem:[%s2054_s25] ss:$0 sm:$0xff] }
  0x5d   : > { %1134 = vmatpush3.bf16.msra.mxu0 %v1131_v21  ;;  %1172 = vmatprep.subr.bf16.mxu1 %v1171_v45 }
  0x5e   : > { %1136 = vmatprep.subr.bf16.mxu0 %v1135_v24 }
  0x60   : > { %1174 = vmatpush3.bf16.msra.mxu1 %v1171_v45 }
  0x61   : > { %1138 = vmatpush3.bf16.msra.mxu0 %v1135_v24  ;;  %1176 = vmatprep.subr.bf16.mxu1 %v1175_v56 }
  0x62   : > { %1140 = vmatprep.subr.bf16.mxu0 %v1139_v36 }
  0x64   : > { %1178 = vmatpush3.bf16.msra.mxu1 %v1175_v56 }
  0x65   : > { %1142 = vmatpush3.bf16.msra.mxu0 %v1139_v36  ;;  %1180 = vmatprep.subr.bf16.mxu1 %v1179_v59 }
  0x66   : > { %1144 = vmatprep.subr.bf16.mxu0 %v1143_v42 }
  0x68   : > { %1182 = vmatpush3.bf16.msra.mxu1 %v1179_v59 }
  0x69   : > { %1146 = vmatpush3.bf16.msra.mxu0 %v1143_v42  ;;  %1184 = vmatprep.subr.bf16.mxu1 %v1183_v62 }
  0x6a   : > { %1148 = vmatprep.subr.bf16.mxu0 %v1147_v46 }
  0x6c   : > { %1186 = vmatpush3.bf16.msra.mxu1 %v1183_v62 }
  0x6d   : > { %1150 = vmatpush3.bf16.msra.mxu0 %v1147_v46  ;;  %1188 = vmatprep.subr.bf16.mxu1 %v1187_v1 }
  0x6e   : > { %1152 = vmatprep.subr.bf16.mxu0 %v1151_v49 }
  0x70   : > { %1190 = vmatpush3.bf16.msra.mxu1 %v1187_v1 }
  0x71   : > { %1154 = vmatpush3.bf16.msra.mxu0 %v1151_v49 }
  0x72   : > { %1156 = vmatprep.subr.bf16.mxu0 %v1155_v52 }
  0x75   : > { %1158 = vmatpush3.bf16.msra.mxu0 %v1155_v52 }
  0x78   : > { %1055 = vmatmul.mubr.f32.vlgmr.msra.gmra.mrb[0].mxu0 %v466_v53 }
 0x14b   : > { %v1056_v3 = vpop.f32.mrb[0].mxu0 }
 0x14c   : > { %v562_v4 = vadd.f32 %v1056_v3, %v955_v2  ;;  %v556_v5 = vpop.f32.mrb[1].mxu0 }
 0x14d   : > { %v557_v6 = vadd.f32 %v955_v2, %v556_v5 }
 0x14e   : > { %1343 = vtanh.f32 %v562_v4 }
 0x14f   : > { %1345 = vtanh.f32 %v557_v6 }
 0x158   : > { %v1344_v7 = vpop.eup %1343 }
 0x159   : > { %v1346_v8 = vpop.eup %1345  ;;  %568 = vst [vmem:[#allocation2 + $0x8] sm:$0xff] %v1344_v7 }
 0x15a   : > { %567 = vst [vmem:[#allocation2] sm:$0xff] %v1346_v8  ;;  %1089 = vmatprep.mubr.f32.mxu1 %v1346_v8 }
 0x15b   : > { %1090 = vmatmul.mubr.f32.vlgmr.msra.gmra.mrb[0].mxu1 %v1344_v7 }
 0x22e   : > { %v1091_v10 = vpop.f32.mrb[0].mxu1 }
 0x22f   : > { %v664_v11 = vadd.f32 %v1091_v10, %v956_v9  ;;  %v658_v12 = vpop.f32.mrb[1].mxu1 }
 0x230   : > { %v659_v13 = vadd.f32 %v956_v9, %v658_v12 }
 0x231   : > { %668 = vst [vmem:[%s1747_s7 + $0x8] sm:$0xff] %v664_v11 }
 0x232   : > { %667 = vst [vmem:[%s1747_s7] sm:$0xff] %v659_v13 }
 0x233 PF: > { %v671_v14 = vld [vmem:[%s1743_s10] sm:$0xff]  ;;  %v672_v15 = vld [vmem:[%s1743_s10 + $0x8] sm:$0xff]  ;;  %v673_v16 = vld [vmem:[%s1743_s10 + $0x10] sm:$0xff]  ;;  %s967_s24 = sshll.u32 %s1501_s14, 8  ;;  %s2055_s18 = sld [smem:[#allocation26_spill]] }
 0x234   : > { %v1191_v17 = vpack.c.bf16 %v672_v15, %v671_v14  ;;  %v674_v18 = vld [vmem:[%s1743_s10 + $0x18] sm:$0xff]  ;;  %v675_v20 = vld [vmem:[%s1743_s10 + $0x20] sm:$0xff]  ;;  %v676_v21 = vld [vmem:[%s1743_s10 + $0x28] sm:$0xff]  ;;  %s808_s15 = sshll.u32 %s1747_s7, 4  ;;  %s2056_s26 = sand.u32 1, %s1469_s28   ;;  %s1879_s15 = int_to_ptr.vmem [resolvable:$true] %s808_s15 }
 0x235   : > { %v1195_v19 = vpack.c.bf16 %v674_v18, %v673_v16  ;;  %v1199_v22 = vpack.c.bf16 %v676_v21, %v675_v20  ;;  %v669_v23 = vld [vmem:[#allocation2] sm:$0xff]  ;;  %v678_v25 = vld [vmem:[%s1743_s10 + $0x38] sm:$0xff]  ;;  %v679_v27 = vld [vmem:[%s1743_s10 + $0x40] sm:$0xff]  ;;  %s1347_s11 = scalar_lea.vmem %s1879_s15, 256  ;;  %s1515_s2 = smov [#allocation6]  }
 0x236   : > { %1192 = vmatprep.subr.bf16.mxu0 %v1191_v17  ;;  %v677_v24 = vld [vmem:[%s1743_s10 + $0x30] sm:$0xff]  ;;  %1124 = vmatprep.mubr.f32.mxu0 %v669_v23  ;;  %v680_v28 = vld [vmem:[%s1743_s10 + $0x48] sm:$0xff]  ;;  %v682_v31 = vld [vmem:[%s1743_s10 + $0x58] sm:$0xff]  ;;  %p1348_p12 = scmp.ne.s32.totalorder %s1879_s15, %s1347_s11  ;;  %s1351_s16 = sshll.u32 %s1515_s2, 4  ;;  %s1352_s16 = int_to_ptr.vmem [resolvable:$false] %s1351_s16 }
 0x237   : > { %1194 = vmatpush3.bf16.msra.mxu0 %v1191_v17  ;;  %v1203_v26 = vpack.c.bf16 %v678_v25, %v677_v24  ;;  %v1207_v29 = vpack.c.bf16 %v680_v28, %v679_v27  ;;  %v681_v30 = vld [vmem:[%s1743_s10 + $0x50] sm:$0xff]  ;;  %v683_v33 = vld [vmem:[%s1743_s10 + $0x60] sm:$0xff]  ;;  %v684_v34 = vld [vmem:[%s1743_s10 + $0x68] sm:$0xff]  ;;  %s1353_s25 = scalar_lea.vmem %s1352_s16, 512  ;;  %p1354_p5 = scmp.lt.s32.totalorder %s1879_s15, %s1352_s16 }
 0x238   : > { %1196 = vmatprep.subr.bf16.mxu0 %v1195_v19  ;;  %v1211_v32 = vpack.c.bf16 %v682_v31, %v681_v30  ;;  %v1215_v35 = vpack.c.bf16 %v684_v34, %v683_v33  ;;  %v685_v36 = vld [vmem:[%s1743_s10 + $0x70] sm:$0xff]  ;;  %v686_v37 = vld [vmem:[%s1743_s10 + $0x78] sm:$0xff]  ;;  %s1883_s10 = scalar_lea.sflag [#allocation7], %s2056_s26  ;;  %p1349_p0 = pnand %p1348_p12, %p1686_p2 }
 0x239   : > { %v1219_v38 = vpack.c.bf16 %v686_v37, %v685_v36  ;;  %v670_v39 = vld [vmem:[#allocation2 + $0x8] sm:$0xff]  ;;  %s1876_s12 = scalar_lea.hbm %s2055_s18, %s967_s24  ;;  %p1355_p3 = scmp.lt.s32.totalorder %s1353_s25, %s1347_s11 }
 0x23a   : > { %p1350_p1 = pneg %p1349_p0 }
 0x23b   : > { %1198 = vmatpush3.bf16.msra.mxu0 %v1195_v19  ;;  %p1356_p6 = por %p1355_p3, %p1354_p5 }
 0x23c   : > { %1200 = vmatprep.subr.bf16.mxu0 %v1199_v22 }
 0x23d   : > { %p1357_p7 = pnand %p1356_p6, %p1350_p1 }
 0x23f   : > { %1202 = vmatpush3.bf16.msra.mxu0 %v1199_v22 }
 0x240   : > { %1204 = vmatprep.subr.bf16.mxu0 %v1203_v26 }
 0x243   : > { %1206 = vmatpush3.bf16.msra.mxu0 %v1203_v26 }
 0x244   : > { %1208 = vmatprep.subr.bf16.mxu0 %v1207_v29 }
 0x247   : > { %1210 = vmatpush3.bf16.msra.mxu0 %v1207_v29 }
 0x248   : > { %1212 = vmatprep.subr.bf16.mxu0 %v1211_v32 }
 0x24b   : > { %1214 = vmatpush3.bf16.msra.mxu0 %v1211_v32 }
 0x24c   : > { %1216 = vmatprep.subr.bf16.mxu0 %v1215_v35 }
 0x24f   : > { %1218 = vmatpush3.bf16.msra.mxu0 %v1215_v35 }
 0x250   : > { %1220 = vmatprep.subr.bf16.mxu0 %v1219_v38 }
 0x253   : > { %1222 = vmatpush3.bf16.msra.mxu0 %v1219_v38 }
 0x256   : > { %1125 = vmatmul.mubr.f32.vlgmr.msra.gmra.mrb[0].mxu0 %v670_v39 }
 0x257   : > { %1360 = shalt.err (!%p1357_p7)
}
 0x258   : > { %s1361_s7 = scalar_lea.hbm %s1876_s12, 256  ;;  %s1365_s29 = scalar_lea.hbm %s2055_s18, 768 }
 0x259   : > { %p1362_p8 = scmp.ne.s32.totalorder %s1876_s12, %s1361_s7  ;;  %p1366_p12 = scmp.lt.u32.totalorder %s1876_s12, %s2055_s18 }
 0x25a   : > { %p1367_p0 = scmp.lt.u32.totalorder %s1365_s29, %s1361_s7  ;;  %p1369_p5 = scmp.lt.u32.totalorder %s1361_s7, %s1876_s12 }
 0x25b   : > { %p1363_p9 = pnand %p1362_p8, %p1686_p2 }
 0x25c   : > { %p1368_p1 = por %p1367_p0, %p1366_p12 }
 0x25d   : > { %p1364_p11 = pneg %p1363_p9 }
 0x25e   : > { %p1370_p3 = por %p1369_p5, %p1368_p1 }
 0x260   : > { %p1371_p6 = pnand %p1370_p3, %p1364_p11 }
 0x262   : > { %1374 = shalt.err (!%p1371_p6)
}
 0x263   : > { %s1516_s11 = smov 128   ;;  %s1517_s16 = smov 8   ;;  %v957_v40 = vld [vmem:[%s458_s20] ss:$0 sm:$0xff] }
 0x264   : > { %1225 = dma.vmem_to_hbm [thread:$0]  (%p1686_p2), %s1879_s15, 256, %s1876_s12, %s1883_s10, %s1516_s11, %s1516_s11, %s1517_s16  }
 0x265   : > { %s1223_s25 = smul.u32 6, %s1501_s14  ;;  %s792_s26 = sshll.u32 %s1745_s21, 4  ;;  %s1923_s26 = int_to_ptr.vmem [resolvable:$true] %s792_s26 }
 0x266   : > { %s2057_s8 = sld [smem:[#allocation25_spill]]  ;;  %s2058_s5 = sand.u32 1, %s1481_s9  }
 0x267   : > { %s789_s7 = sadd.s32 %s1497_s13, %s1223_s25  ;;  %s1929_s13 = scalar_lea.sflag [#allocation5], %s2058_s5 }
 0x268   : > { %s962_s29 = sshll.u32 %s789_s7, 7  ;;  %s1375_s14 = scalar_lea.vmem %s1923_s26, 256 }
 0x269   : > { %p1376_p2 = scmp.ne.s32.totalorder %s1923_s26, %s1375_s14  ;;  %s1518_s20 = smov [#allocation4]  }
 0x26a   : > { %s1379_s0 = sshll.u32 %s1518_s20, 4  ;;  %s1380_s0 = int_to_ptr.vmem [resolvable:$false] %s1379_s0 }
 0x26b   : > { %p1377_p7 = pnand %p1376_p2, %p1665_p10  ;;  %s1381_s12 = scalar_lea.vmem %s1380_s0, 512 }
 0x26c   : > { %s1921_s1 = scalar_lea.hbm %s2057_s8, %s962_s29  ;;  %p1382_p9 = scmp.lt.s32.totalorder %s1923_s26, %s1380_s0 }
 0x26d   : > { %p1378_p8 = pneg %p1377_p7  ;;  %p1383_p11 = scmp.lt.s32.totalorder %s1381_s12, %s1375_s14 }
 0x26f   : > { %p1384_p12 = por %p1383_p11, %p1382_p9 }
 0x271   : > { %p1385_p0 = pnand %p1384_p12, %p1378_p8 }
 0x329   : > { %v1126_v41 = vpop.f32.mrb[0].mxu0 }
 0x32a   : > { %v766_v42 = vadd.f32 %v1126_v41, %v957_v40  ;;  %v760_v43 = vpop.f32.mrb[1].mxu0 }
 0x32b   : > { %v761_v44 = vadd.f32 %v957_v40, %v760_v43 }
 0x32c   : > { %770 = vst [vmem:[%s1745_s21 + $0x8] sm:$0xff] %v766_v42 }
 0x32d   : > { %769 = vst [vmem:[%s1745_s21] sm:$0xff] %v761_v44 }
 0x32e   : > { %1388 = shalt.err (!%p1385_p0)
}
 0x32f   : > { %s1389_s21 = scalar_lea.hbm %s1921_s1, 256  ;;  %s1393_s25 = scalar_lea.hbm %s2057_s8, 2304 }
 0x330   : > { %p1390_p1 = scmp.ne.s32.totalorder %s1921_s1, %s1389_s21  ;;  %p1394_p6 = scmp.lt.u32.totalorder %s1921_s1, %s2057_s8 }
 0x331   : > { %p1395_p2 = scmp.lt.u32.totalorder %s1393_s25, %s1389_s21  ;;  %p1397_p8 = scmp.lt.u32.totalorder %s1389_s21, %s1921_s1 }
 0x332   : > { %p1391_p5 = pnand %p1390_p1, %p1665_p10 }
 0x333   : > { %p1396_p7 = por %p1395_p2, %p1394_p6 }
 0x334   : > { %p1392_p3 = pneg %p1391_p5 }
 0x335   : > { %p1398_p9 = por %p1397_p8, %p1396_p7 }
 0x337   : > { %p1399_p11 = pnand %p1398_p9, %p1392_p3 }
 0x339   : > { %1402 = shalt.err (!%p1399_p11)
}
 0x33a   : > { %s1519_s19 = smov 384  }
 0x33b   : > { %1224 = dma.vmem_to_hbm [thread:$0]  (%p1665_p10), %s1923_s26, 256, %s1921_s1, %s1929_s13, %s1516_s11, %s1519_s19, %s1517_s16  }
 0x33c PF: > { %p1235_p12 = scmp.ge.s32.totalorder %s1513_s17, 2  ;;  %s823_s29 = sand.u32 1, %s1477_s30  }
 0x33d   : > { %s824_s2 = scalar_lea.sflag [#allocation5], %s823_s29 }
 0x33e   : > { %p1229_p0 = pnand %p1235_p12, %p1672_p13 }
 0x340   : > { %1456 = dma.done.wait (!%p1229_p0), %s824_s2, 256  }
 0x341   : > { %1458 = vsyncadd (!%p1229_p0), %s824_s2, 4294967040  ;;  %s832_s4 = sand.u32 1, %s1465_s27   ;;  %p1232_p1 = pnand %p1235_p12, %p1690_p4 }
 0x342   : > { %s833_s5 = scalar_lea.sflag [#allocation7], %s832_s4 }
 0x343   : > { %1460 = dma.done.wait (!%p1232_p1), %s833_s5, 256  }
 0x344   : > { %1462 = vsyncadd (!%p1232_p1), %s833_s5, 4294967040  ;;  %s25_s17 = sadd.s32 1, %s1513_s17   ;;  %s2060_s30 = sld [smem:[#allocation10_spill]] }
 0x345   : > { %p1963_p10 = scmp.ge.s32.totalorder %s25_s17, 11   ;;  %s2061_s29 = sld [smem:[#allocation19_spill]] }
 0x346   : > { %s2062_s22 = sld [smem:[#allocation11_spill]]  ;;  %s2063_s10 = sld [smem:[#allocation18_spill]] }
 0x347   : > { %s2064_s11 = sld [smem:[#allocation12_spill]]  ;;  %s2065_s12 = sld [smem:[#allocation17_spill]] }
 0x348   : > { %s2066_s13 = sld [smem:[#allocation13_spill]]  ;;  %s2067_s14 = sld [smem:[#allocation14_spill]] }
 0x349   : > { %s2068_s15 = sld [smem:[#allocation15_spill]]  ;;  %s2069_s16 = sld [smem:[#allocation16_spill]] }
 0x34a   : > { %s2070_s27 = smov %s1469_s28  ;;  %s2071_s28 = smov %s2060_s30 }
 0x34b   : > { %s2072_s30 = smov %s1481_s9  ;;  %24 = sbr.rel (!%p1963_p10) target bundleno = 18 (0x12), region = 153 }
 0x34c   : > { %s2073_s9 = smov %s2062_s22 }
 0x352   :  { %838 = vsyncpa [#allocation5], 1 }
 0x353   :  { %840 = vsyncpa [#allocation5 + $0x1], 1 }
 0x354   :  { %841 = vsyncpa [#allocation7], 1 }
 0x355   :  { %843 = vsyncpa [#allocation7 + $0x1], 1 }

// kernel: decoder_forward.2
= control target key start
LH: loop header
LB: loop body
LE: loop exit
PB: predicated region body
PF: predicated region fallthrough
CT: control target
= control target key end

     0   :  { %10 = vsyncpa [#allocation3], 0  ;;  %s6621_s0 = inlined_call_operand.vmem [shape: f32[2,8,128], index: 0, kind: input, shape index: {}]   ;;  %s6622_s1 = inlined_call_operand.hbm [shape: f32[2,128,384], index: 1, kind: input, shape index: {}]   ;;  %s6623_s2 = inlined_call_operand.hbm [shape: f32[2,128,384], index: 2, kind: input, shape index: {}]   ;;  %s6624_s3 = inlined_call_operand.vmem [shape: f32[2,1,384], index: 3, kind: input, shape index: {}]   ;;  %s6625_s4 = inlined_call_operand.vmem [shape: f32[2,1,384], index: 4, kind: input, shape index: {}]   ;;  %s6626_s5 = inlined_call_operand.vmem [shape: f32[6,8,128], index: 5, kind: output, shape index: {}]  }
   0x1   :  { %11 = vsyncpa [#allocation5], 0  ;;  %s5562_s18 = smov [#allocation2]   ;;  %s5514_s22 = scalar_lea.hbm %s6622_s1, 12288 }
   0x2   :  { %s19_s19 = sshll.u32 %s5562_s18, 4  ;;  %p5515_p0 = scmp.ne.s32.totalorder %s6622_s1, %s5514_s22  ;;  %s20_s19 = int_to_ptr.vmem [resolvable:$true] %s19_s19 }
   0x3   :  { %p5518_p1 = scmp.lt.u32.totalorder %s5514_s22, %s6622_s1 }
   0x5   :  { %p5520_p2 = pnand %p5518_p1, %p5515_p0 }
   0x7   :  { %5523 = shalt.err (!%p5520_p2)
}
   0x8   :  { %s5524_s27 = scalar_lea.vmem %s20_s19, 12288  ;;  %p5529_p4 = scmp.lt.s32.totalorder %s20_s19, %s20_s19 }
   0x9   :  { %p5525_p3 = scmp.ne.s32.totalorder %s20_s19, %s5524_s27  ;;  %p5530_p5 = scmp.lt.s32.totalorder %s5524_s27, %s5524_s27 }
   0xb   :  { %p5531_p6 = por %p5530_p5, %p5529_p4 }
   0xd   :  { %p5532_p7 = pnand %p5531_p6, %p5525_p3 }
   0xf   :  { %5535 = shalt.err (!%p5532_p7)
}
  0x10   :  { %s5563_s28 = smov 384   ;;  %s5564_s29 = smov 24  }
  0x11   :  { %25 = dma.hbm_to_vmem [thread:$0]  %s6622_s1, 12288, %s20_s19, [#allocation3], %s5563_s28, %s5563_s28, %s5564_s29  }
  0x12   :  { %s5565_s7 = smov [#allocation4]   ;;  %s5536_s11 = scalar_lea.hbm %s6623_s2, 12288 }
  0x13   :  { %s31_s8 = sshll.u32 %s5565_s7, 4  ;;  %p5537_p8 = scmp.ne.s32.totalorder %s6623_s2, %s5536_s11  ;;  %s32_s8 = int_to_ptr.vmem [resolvable:$true] %s31_s8 }
  0x14   :  { %p5540_p9 = scmp.lt.u32.totalorder %s5536_s11, %s6623_s2 }
  0x16   :  { %p5542_p10 = pnand %p5540_p9, %p5537_p8 }
  0x18   :  { %5545 = shalt.err (!%p5542_p10)
}
  0x19   :  { %s5546_s16 = scalar_lea.vmem %s32_s8, 12288  ;;  %p5551_p12 = scmp.lt.s32.totalorder %s32_s8, %s32_s8 }
  0x1a   :  { %p5547_p11 = scmp.ne.s32.totalorder %s32_s8, %s5546_s16  ;;  %p5552_p13 = scmp.lt.s32.totalorder %s5546_s16, %s5546_s16 }
  0x1c   :  { %p5553_p0 = por %p5552_p13, %p5551_p12 }
  0x1e   :  { %p5554_p1 = pnand %p5553_p0, %p5547_p11 }
  0x20   :  { %5557 = shalt.err (!%p5554_p1)
}
  0x21   :  { %37 = dma.hbm_to_vmem [thread:$0]  %s6623_s2, 12288, %s32_s8, [#allocation5], %s5563_s28, %s5563_s28, %s5564_s29  }
  0x22   :  { %5558 = dma.done.wait [#allocation3], 12288  }
  0x23   :  { %5559 = vsyncadd [#allocation3], 4294955008 }
  0x24   :  { %5560 = dma.done.wait [#allocation5], 12288  }
  0x25   :  { %5561 = vsyncadd [#allocation5], 4294955008  ;;  %v6629_v0 = vmov 0.0|0.0   ;;  %v6627_v1 = vmov 0.0   ;;  %vm5568_vm0 = vmmov 0   ;;  %v52_v2 = vld [vmem:[#allocation2 + $0x8] sm:$0xff] }
  0x26   :  { %4318 = vmatprep.subr.bf16.mxu1 %v6629_v0  ;;  %379 = vmatprep.mubr.f32.mxu0 %v6627_v1  ;;  %v55_v3 = vld [vmem:[#allocation2 + $0x20] sm:$0xff]  ;;  %v54_v6 = vld [vmem:[#allocation2 + $0x18] sm:$0xff]  ;;  %v61_v8 = vld [vmem:[#allocation2 + $0x50] sm:$0xff] }
  0x27   :  { %3653 = vmatprep.mubr.msk.f32.mxu1 %vm5568_vm0, %v6627_v1  ;;  %v51_v4 = vld [vmem:[#allocation2] sm:$0xff]  ;;  %v4286_v5 = vpack.c.bf16 %v55_v3, %v52_v2  ;;  %v58_v7 = vld [vmem:[#allocation2 + $0x38] sm:$0xff]  ;;  %v57_v11 = vld [vmem:[#allocation2 + $0x30] sm:$0xff] }
  0x28   :  { %v4288_v9 = vpack.c.bf16 %v54_v6, %v51_v4  ;;  %v4290_v10 = vpack.c.bf16 %v61_v8, %v58_v7  ;;  %v60_v12 = vld [vmem:[#allocation2 + $0x48] sm:$0xff]  ;;  %v67_v14 = vld [vmem:[#allocation2 + $0x80] sm:$0xff]  ;;  %v66_v18 = vld [vmem:[#allocation2 + $0x78] sm:$0xff] }
  0x29   :  { %v64_v13 = vld [vmem:[#allocation2 + $0x68] sm:$0xff]  ;;  %4287 = vmatprep.subr.bf16.mxu0 %v4286_v5  ;;  %v4292_v15 = vpack.c.bf16 %v60_v12, %v57_v11  ;;  %v63_v17 = vld [vmem:[#allocation2 + $0x60] sm:$0xff]  ;;  %v70_v19 = vld [vmem:[#allocation2 + $0x98] sm:$0xff] }
  0x2a   :  { %4289 = vmatpush1.bf16.msra.mxu0 %v4288_v9  ;;  %v4294_v16 = vpack.c.bf16 %v67_v14, %v64_v13  ;;  %v73_v20 = vld [vmem:[#allocation2 + $0xb0] sm:$0xff]  ;;  %v4296_v21 = vpack.c.bf16 %v66_v18, %v63_v17  ;;  %v72_v24 = vld [vmem:[#allocation2 + $0xa8] sm:$0xff]  ;;  %v79_v26 = vld [vmem:[#allocation2 + $0xe0] sm:$0xff] }
  0x2b   :  { %4291 = vmatprep.subr.bf16.mxu0 %v4290_v10  ;;  %v4298_v22 = vpack.c.bf16 %v73_v20, %v70_v19  ;;  %v69_v23 = vld [vmem:[#allocation2 + $0x90] sm:$0xff]  ;;  %v76_v25 = vld [vmem:[#allocation2 + $0xc8] sm:$0xff]  ;;  %v59_v31 = vld [vmem:[#allocation2 + $0x40] sm:$0xff] }
  0x2c   :  { %v53_v27 = vld [vmem:[#allocation2 + $0x10] sm:$0xff]  ;;  %v56_v28 = vld [vmem:[#allocation2 + $0x28] sm:$0xff]  ;;  %v4300_v30 = vpack.c.bf16 %v72_v24, %v69_v23  ;;  %v62_v32 = vld [vmem:[#allocation2 + $0x58] sm:$0xff]  ;;  %v4302_v33 = vpack.c.bf16 %v79_v26, %v76_v25 }
  0x2d   :  { %v4319_v29 = vpack.c.bf16 %v56_v28, %v53_v27  ;;  %v75_v34 = vld [vmem:[#allocation2 + $0xc0] sm:$0xff]  ;;  %v78_v35 = vld [vmem:[#allocation2 + $0xd8] sm:$0xff]  ;;  %v4322_v37 = vpack.c.bf16 %v62_v32, %v59_v31  ;;  %v85_v38 = vld [vmem:[#allocation2 + $0x110] sm:$0xff] }
  0x2e   :  { %4293 = vmatpush1.bf16.msra.mxu0 %v4292_v15  ;;  %v82_v36 = vld [vmem:[#allocation2 + $0xf8] sm:$0xff]  ;;  %v65_v39 = vld [vmem:[#allocation2 + $0x70] sm:$0xff]  ;;  %v68_v40 = vld [vmem:[#allocation2 + $0x88] sm:$0xff]  ;;  %v4304_v41 = vpack.c.bf16 %v78_v35, %v75_v34 }
  0x2f   :  { %4295 = vmatprep.subr.bf16.mxu0 %v4294_v16  ;;  %4320 = vmatpush3.bf16.msra.mxu1 %v4319_v29  ;;  %v4306_v42 = vpack.c.bf16 %v85_v38, %v82_v36  ;;  %v81_v43 = vld [vmem:[#allocation2 + $0xf0] sm:$0xff]  ;;  %v84_v44 = vld [vmem:[#allocation2 + $0x108] sm:$0xff]  ;;  %v4325_v46 = vpack.c.bf16 %v68_v40, %v65_v39  ;;  %v91_v47 = vld [vmem:[#allocation2 + $0x140] sm:$0xff] }
  0x30   :  { %4321 = vmatprep.subr.bf16.mxu1 %v6629_v0  ;;  %v88_v45 = vld [vmem:[#allocation2 + $0x128] sm:$0xff]  ;;  %v71_v48 = vld [vmem:[#allocation2 + $0xa0] sm:$0xff]  ;;  %v74_v49 = vld [vmem:[#allocation2 + $0xb8] sm:$0xff]  ;;  %v4308_v50 = vpack.c.bf16 %v84_v44, %v81_v43 }
  0x31   :  { %v4310_v51 = vpack.c.bf16 %v91_v47, %v88_v45  ;;  %v87_v52 = vld [vmem:[#allocation2 + $0x120] sm:$0xff]  ;;  %v90_v53 = vld [vmem:[#allocation2 + $0x138] sm:$0xff]  ;;  %v4328_v55 = vpack.c.bf16 %v74_v49, %v71_v48  ;;  %v97_v56 = vld [vmem:[#allocation2 + $0x170] sm:$0xff] }
  0x32   :  { %4297 = vmatpush1.bf16.msra.mxu0 %v4296_v21  ;;  %v94_v54 = vld [vmem:[#allocation2 + $0x158] sm:$0xff]  ;;  %v77_v57 = vld [vmem:[#allocation2 + $0xd0] sm:$0xff]  ;;  %v80_v58 = vld [vmem:[#allocation2 + $0xe8] sm:$0xff]  ;;  %v4312_v59 = vpack.c.bf16 %v90_v53, %v87_v52 }
  0x33   :  { %4299 = vmatprep.subr.bf16.mxu0 %v4298_v22  ;;  %4323 = vmatpush3.bf16.msra.mxu1 %v4322_v37  ;;  %v4314_v60 = vpack.c.bf16 %v97_v56, %v94_v54  ;;  %v93_v61 = vld [vmem:[#allocation2 + $0x150] sm:$0xff]  ;;  %v96_v62 = vld [vmem:[#allocation2 + $0x168] sm:$0xff]  ;;  %v4331_v2 = vpack.c.bf16 %v80_v58, %v77_v57  ;;  %v152_v3 = vld [vmem:[#allocation4 + $0x20] sm:$0xff] }
  0x34   :  { %4324 = vmatprep.subr.bf16.mxu1 %v6629_v0  ;;  %v149_v63 = vld [vmem:[#allocation4 + $0x8] sm:$0xff]  ;;  %v83_v4 = vld [vmem:[#allocation2 + $0x100] sm:$0xff]  ;;  %v86_v5 = vld [vmem:[#allocation2 + $0x118] sm:$0xff]  ;;  %v4316_v6 = vpack.c.bf16 %v96_v62, %v93_v61 }
  0x35   :  { %v5634_v7 = vld [vmem:[%s6621_s0] sm:$0xff]  ;;  %v5639_v8 = vld [vmem:[%s6621_s0 + $0x8] sm:$0xff]  ;;  %v5641_v9 = vpack.c.bf16 %v152_v3, %v149_v63  ;;  %v151_v11 = vld [vmem:[#allocation4 + $0x18] sm:$0xff]  ;;  %v4334_v13 = vpack.c.bf16 %v86_v5, %v83_v4 }
  0x36   :  { %4301 = vmatpush1.bf16.msra.mxu0 %v4300_v30  ;;  %v148_v10 = vld [vmem:[#allocation4] sm:$0xff]  ;;  %v155_v12 = vld [vmem:[#allocation4 + $0x38] sm:$0xff]  ;;  %v158_v14 = vld [vmem:[#allocation4 + $0x50] sm:$0xff]  ;;  %v50_v17 = vadd.f32 %v5639_v8, %v5634_v7 }
  0x37   :  { %4303 = vmatprep.subr.bf16.mxu0 %v4302_v33  ;;  %4326 = vmatpush3.bf16.msra.mxu1 %v4325_v46  ;;  %v89_v15 = vld [vmem:[#allocation2 + $0x130] sm:$0xff]  ;;  %v92_v16 = vld [vmem:[#allocation2 + $0x148] sm:$0xff]  ;;  %v5646_v18 = vpack.c.bf16 %v151_v11, %v148_v10  ;;  %v5649_v19 = vpack.c.bf16 %v158_v14, %v155_v12  ;;  %v164_v24 = vld [vmem:[#allocation4 + $0x80] sm:$0xff] }
  0x38   :  { %4327 = vmatprep.subr.bf16.mxu1 %v6629_v0  ;;  %v154_v20 = vld [vmem:[#allocation4 + $0x30] sm:$0xff]  ;;  %v157_v21 = vld [vmem:[#allocation4 + $0x48] sm:$0xff]  ;;  %v4337_v23 = vpack.c.bf16 %v92_v16, %v89_v15  ;;  %v95_v25 = vld [vmem:[#allocation2 + $0x160] sm:$0xff] }
  0x39   :  { %v161_v22 = vld [vmem:[#allocation4 + $0x68] sm:$0xff]  ;;  %v98_v26 = vld [vmem:[#allocation2 + $0x178] sm:$0xff]  ;;  %v5653_v27 = vpack.c.bf16 %v157_v21, %v154_v20  ;;  %v160_v29 = vld [vmem:[#allocation4 + $0x60] sm:$0xff] }
  0x3a   :  { %4305 = vmatpush1.bf16.msra.mxu0 %v4304_v41  ;;  %v5657_v28 = vpack.c.bf16 %v164_v24, %v161_v22  ;;  %v163_v30 = vld [vmem:[#allocation4 + $0x78] sm:$0xff]  ;;  %v4340_v32 = vpack.c.bf16 %v98_v26, %v95_v25  ;;  %v170_v33 = vld [vmem:[#allocation4 + $0xb0] sm:$0xff]  ;;  %v153_v35 = vld [vmem:[#allocation4 + $0x28] sm:$0xff] }
  0x3b   :  { %4307 = vmatprep.subr.bf16.mxu0 %v4306_v42  ;;  %4329 = vmatpush3.bf16.msra.mxu1 %v4328_v55  ;;  %v167_v31 = vld [vmem:[#allocation4 + $0x98] sm:$0xff]  ;;  %v150_v34 = vld [vmem:[#allocation4 + $0x10] sm:$0xff]  ;;  %v5661_v36 = vpack.c.bf16 %v163_v30, %v160_v29  ;;  %v169_v39 = vld [vmem:[#allocation4 + $0xa8] sm:$0xff] }
  0x3c   :  { %4330 = vmatprep.subr.bf16.mxu1 %v6629_v0  ;;  %v5664_v37 = vpack.c.bf16 %v170_v33, %v167_v31  ;;  %v166_v38 = vld [vmem:[#allocation4 + $0x90] sm:$0xff]  ;;  %v173_v40 = vld [vmem:[#allocation4 + $0xc8] sm:$0xff]  ;;  %v5666_v41 = vpack.c.bf16 %v153_v35, %v150_v34  ;;  %v176_v42 = vld [vmem:[#allocation4 + $0xe0] sm:$0xff] }
  0x3d   :  { %v156_v43 = vld [vmem:[#allocation4 + $0x40] sm:$0xff]  ;;  %v159_v44 = vld [vmem:[#allocation4 + $0x58] sm:$0xff]  ;;  %v5670_v45 = vpack.c.bf16 %v169_v39, %v166_v38  ;;  %v5673_v46 = vpack.c.bf16 %v176_v42, %v173_v40  ;;  %v162_v52 = vld [vmem:[#allocation4 + $0x70] sm:$0xff] }
  0x3e   :  { %4309 = vmatpush1.bf16.msra.mxu0 %v4308_v50  ;;  %v172_v47 = vld [vmem:[#allocation4 + $0xc0] sm:$0xff]  ;;  %v175_v48 = vld [vmem:[#allocation4 + $0xd8] sm:$0xff]  ;;  %v5676_v50 = vpack.c.bf16 %v159_v44, %v156_v43  ;;  %v165_v53 = vld [vmem:[#allocation4 + $0x88] sm:$0xff] }
  0x3f   :  { %4311 = vmatprep.subr.bf16.mxu0 %v4310_v51  ;;  %4332 = vmatpush3.bf16.msra.mxu1 %v4331_v2  ;;  %6755 = vst [vmem:[#allocation8_spill] sm:$0xff] %v5670_v45  ;;  %6756 = vst [vmem:[#allocation9_spill] sm:$0xff] %v5673_v46  ;;  %v179_v49 = vld [vmem:[#allocation4 + $0xf8] sm:$0xff]  ;;  %v182_v51 = vld [vmem:[#allocation4 + $0x110] sm:$0xff]  ;;  %v5682_v54 = vpack.c.bf16 %v175_v48, %v172_v47 }
  0x40   :  { %4333 = vmatprep.subr.bf16.mxu1 %v6629_v0  ;;  %v5685_v55 = vpack.c.bf16 %v182_v51, %v179_v49  ;;  %v178_v56 = vld [vmem:[#allocation4 + $0xf0] sm:$0xff]  ;;  %v181_v57 = vld [vmem:[#allocation4 + $0x108] sm:$0xff]  ;;  %v168_v61 = vld [vmem:[#allocation4 + $0xa0] sm:$0xff] }
  0x41   :  { %6757 = vst [vmem:[#allocation10_spill] sm:$0xff] %v5682_v54  ;;  %v185_v58 = vld [vmem:[#allocation4 + $0x128] sm:$0xff]  ;;  %v171_v62 = vld [vmem:[#allocation4 + $0xb8] sm:$0xff]  ;;  %v5692_v63 = vpack.c.bf16 %v181_v57, %v178_v56  ;;  %v184_v3 = vld [vmem:[#allocation4 + $0x120] sm:$0xff] }
  0x42   :  { %4313 = vmatpush1.bf16.msra.mxu0 %v4312_v59  ;;  %6758 = vst [vmem:[#allocation11_spill] sm:$0xff] %v5685_v55  ;;  %v5688_v59 = vpack.c.bf16 %v165_v53, %v162_v52  ;;  %v187_v4 = vld [vmem:[#allocation4 + $0x138] sm:$0xff]  ;;  %v194_v10 = vld [vmem:[#allocation4 + $0x170] sm:$0xff]  ;;  %v177_v12 = vld [vmem:[#allocation4 + $0xe8] sm:$0xff] }
  0x43   :  { %4315 = vmatprep.subr.bf16.mxu0 %v4314_v60  ;;  %4335 = vmatpush3.bf16.msra.mxu1 %v4334_v13  ;;  %v188_v60 = vld [vmem:[#allocation4 + $0x140] sm:$0xff]  ;;  %6759 = vst [vmem:[#allocation12_spill] sm:$0xff] %v5692_v63  ;;  %v191_v5 = vld [vmem:[#allocation4 + $0x158] sm:$0xff]  ;;  %v174_v11 = vld [vmem:[#allocation4 + $0xd0] sm:$0xff]  ;;  %v5702_v13 = vpack.c.bf16 %v187_v4, %v184_v3 }
  0x44   :  { %4336 = vmatprep.subr.bf16.mxu1 %v6629_v0  ;;  %v5695_v2 = vpack.c.bf16 %v188_v60, %v185_v58  ;;  %v5705_v14 = vpack.c.bf16 %v194_v10, %v191_v5  ;;  %v190_v15 = vld [vmem:[#allocation4 + $0x150] sm:$0xff]  ;;  %v193_v16 = vld [vmem:[#allocation4 + $0x168] sm:$0xff]  ;;  %v180_v20 = vld [vmem:[#allocation4 + $0x100] sm:$0xff] }
  0x45   :  { %6762 = vst [vmem:[#allocation15_spill] sm:$0xff] %v5702_v13  ;;  %v183_v21 = vld [vmem:[#allocation4 + $0x118] sm:$0xff]  ;;  %v5712_v22 = vpack.c.bf16 %v193_v16, %v190_v15  ;;  %v186_v24 = vld [vmem:[#allocation4 + $0x130] sm:$0xff]  ;;  %v189_v25 = vld [vmem:[#allocation4 + $0x148] sm:$0xff] }
  0x46   :  { %4317 = vmatpush1.bf16.msra.mxu0 %v4316_v6  ;;  %6760 = vst [vmem:[#allocation13_spill] sm:$0xff] %v5695_v2  ;;  %v5698_v6 = vpack.c.bf16 %v171_v62, %v168_v61  ;;  %6763 = vst [vmem:[#allocation16_spill] sm:$0xff] %v5705_v14  ;;  %v5721_v26 = vpack.c.bf16 %v189_v25, %v186_v24  ;;  %v192_v29 = vld [vmem:[#allocation4 + $0x160] sm:$0xff]  ;;  %v195_v30 = vld [vmem:[#allocation4 + $0x178] sm:$0xff] }
  0x47   :  { %4343 = vmatprep.subr.bf16.mxu0 %v5641_v9  ;;  %4338 = vmatpush3.bf16.msra.mxu1 %v4337_v23  ;;  %6765 = vst [vmem:[#allocation18_spill] sm:$0xff] %v5712_v22  ;;  %v5716_v23 = vpack.c.bf16 %v183_v21, %v180_v20  ;;  %v5727_v31 = vpack.c.bf16 %v195_v30, %v192_v29  ;;  %v104_v33 = vld [vmem:[#allocation2 + $0x1a0] sm:$0xff]  ;;  %v103_v38 = vld [vmem:[#allocation2 + $0x198] sm:$0xff]  ;;  %v102_v39 = vld [vmem:[#allocation2 + $0x190] sm:$0xff] }
  0x48   :  { %4339 = vmatprep.subr.bf16.mxu1 %v6629_v0  ;;  %6761 = vst [vmem:[#allocation14_spill] sm:$0xff] %v5698_v6  ;;  %6767 = vst [vmem:[#allocation20_spill] sm:$0xff] %v5721_v26  ;;  %v100_v35 = vld [vmem:[#allocation2 + $0x180] sm:$0xff]  ;;  %v105_v42 = vld [vmem:[#allocation2 + $0x1a8] sm:$0xff] }
  0x49   :  { %380 = vmatmul.mubr.f32.vlgmr.msra.gmra.mrb[0].mxu0 %v50_v17  ;;  %6766 = vst [vmem:[#allocation19_spill] sm:$0xff] %v5716_v23  ;;  %6768 = vst [vmem:[#allocation21_spill] sm:$0xff] %v5727_v31  ;;  %v5737_v40 = vpack.c.bf16 %v103_v38, %v100_v35  ;;  %v5740_v43 = vpack.c.bf16 %v105_v42, %v102_v39  ;;  %v107_v44 = vld [vmem:[#allocation2 + $0x1b8] sm:$0xff]  ;;  %v110_v47 = vld [vmem:[#allocation2 + $0x1d0] sm:$0xff] }
  0x4a   :  { %4345 = vmatpush1.bf16.msra.mxu0 %v5646_v18  ;;  %523 = vmatprep.mubr.f32.mxu0 %v6627_v1  ;;  %v5744_v48 = vpack.c.bf16 %v110_v47, %v107_v44  ;;  %v106_v49 = vld [vmem:[#allocation2 + $0x1b0] sm:$0xff]  ;;  %v109_v51 = vld [vmem:[#allocation2 + $0x1c8] sm:$0xff]  ;;  %v108_v52 = vld [vmem:[#allocation2 + $0x1c0] sm:$0xff] }
  0x4b   :  { %4347 = vmatprep.subr.bf16.mxu0 %v5649_v19  ;;  %4341 = vmatpush3.bf16.msra.mxu1 %v4340_v32  ;;  %v101_v32 = vld [vmem:[#allocation2 + $0x188] sm:$0xff]  ;;  %6770 = vst [vmem:[#allocation23_spill] sm:$0xff] %v5737_v40  ;;  %6771 = vst [vmem:[#allocation24_spill] sm:$0xff] %v5740_v43  ;;  %v5747_v53 = vpack.c.bf16 %v109_v51, %v106_v49  ;;  %v111_v56 = vld [vmem:[#allocation2 + $0x1d8] sm:$0xff] }
  0x4c   :  { %4374 = vmatprep.subr.bf16.mxu1 %v6629_v0  ;;  %v5735_v34 = vpack.c.bf16 %v104_v33, %v101_v32  ;;  %6772 = vst [vmem:[#allocation25_spill] sm:$0xff] %v5744_v48  ;;  %v5750_v57 = vpack.c.bf16 %v111_v56, %v108_v52  ;;  %v113_v58 = vld [vmem:[#allocation2 + $0x1e8] sm:$0xff]  ;;  %v116_v60 = vld [vmem:[#allocation2 + $0x200] sm:$0xff]  ;;  %v115_v3 = vld [vmem:[#allocation2 + $0x1f8] sm:$0xff] }
  0x4d   :  { %6773 = vst [vmem:[#allocation26_spill] sm:$0xff] %v5747_v53  ;;  %v112_v61 = vld [vmem:[#allocation2 + $0x1e0] sm:$0xff]  ;;  %v5753_v62 = vpack.c.bf16 %v116_v60, %v113_v58  ;;  %v114_v4 = vld [vmem:[#allocation2 + $0x1f0] sm:$0xff]  ;;  %v117_v5 = vld [vmem:[#allocation2 + $0x208] sm:$0xff] }
  0x4e   :  { %4349 = vmatpush1.bf16.msra.mxu0 %v5653_v27  ;;  %3654 = vmatmul.mubr.f32.vlgmr.msra.gmra.mrb[0].mxu1 %v50_v17  ;;  %v5708_v17 = vpack.c.bf16 %v177_v12, %v174_v11  ;;  %6769 = vst [vmem:[#allocation22_spill] sm:$0xff] %v5735_v34  ;;  %6774 = vst [vmem:[#allocation27_spill] sm:$0xff] %v5750_v57  ;;  %v5756_v10 = vpack.c.bf16 %v115_v3, %v112_v61  ;;  %v119_v12 = vld [vmem:[#allocation2 + $0x218] sm:$0xff]  ;;  %v122_v15 = vld [vmem:[#allocation2 + $0x230] sm:$0xff] }
  0x4f   :  { %4351 = vmatprep.subr.bf16.mxu0 %v5657_v28  ;;  %4376 = vmatpush3.bf16.msra.mxu1 %v5666_v41  ;;  %6775 = vst [vmem:[#allocation28_spill] sm:$0xff] %v5753_v62  ;;  %v5758_v11 = vpack.c.bf16 %v117_v5, %v114_v4  ;;  %v5764_v16 = vpack.c.bf16 %v122_v15, %v119_v12  ;;  %v118_v20 = vld [vmem:[#allocation2 + $0x210] sm:$0xff]  ;;  %v121_v21 = vld [vmem:[#allocation2 + $0x228] sm:$0xff]  ;;  %v120_v24 = vld [vmem:[#allocation2 + $0x220] sm:$0xff] }
  0x50   :  { %4377 = vmatprep.subr.bf16.mxu1 %v6629_v0  ;;  %3688 = vmatprep.mubr.msk.f32.mxu1 %vm5568_vm0, %v6627_v1  ;;  %6764 = vst [vmem:[#allocation17_spill] sm:$0xff] %v5708_v17  ;;  %6776 = vst [vmem:[#allocation29_spill] sm:$0xff] %v5756_v10  ;;  %v5767_v25 = vpack.c.bf16 %v121_v21, %v118_v20  ;;  %v123_v29 = vld [vmem:[#allocation2 + $0x238] sm:$0xff]  ;;  %v125_v32 = vld [vmem:[#allocation2 + $0x248] sm:$0xff] }
  0x51   :  { %6777 = vst [vmem:[#allocation30_spill] sm:$0xff] %v5758_v11  ;;  %6778 = vst [vmem:[#allocation31_spill] sm:$0xff] %v5764_v16  ;;  %v5770_v30 = vpack.c.bf16 %v123_v29, %v120_v24  ;;  %v128_v33 = vld [vmem:[#allocation2 + $0x260] sm:$0xff]  ;;  %v127_v39 = vld [vmem:[#allocation2 + $0x258] sm:$0xff] }
  0x52   :  { %4353 = vmatpush1.bf16.msra.mxu0 %v5661_v36  ;;  %6779 = vst [vmem:[#allocation32_spill] sm:$0xff] %v5767_v25  ;;  %v5774_v35 = vpack.c.bf16 %v128_v33, %v125_v32  ;;  %v124_v38 = vld [vmem:[#allocation2 + $0x240] sm:$0xff]  ;;  %v126_v42 = vld [vmem:[#allocation2 + $0x250] sm:$0xff]  ;;  %v129_v47 = vld [vmem:[#allocation2 + $0x268] sm:$0xff] }
  0x53   :  { %4355 = vmatprep.subr.bf16.mxu0 %v5664_v37  ;;  %4379 = vmatpush3.bf16.msra.mxu1 %v5676_v50  ;;  %6780 = vst [vmem:[#allocation33_spill] sm:$0xff] %v5770_v30  ;;  %v5777_v44 = vpack.c.bf16 %v127_v39, %v124_v38  ;;  %v5780_v49 = vpack.c.bf16 %v129_v47, %v126_v42  ;;  %v131_v51 = vld [vmem:[#allocation2 + $0x278] sm:$0xff]  ;;  %v134_v52 = vld [vmem:[#allocation2 + $0x290] sm:$0xff]  ;;  %v133_v60 = vld [vmem:[#allocation2 + $0x288] sm:$0xff] }
  0x54   :  { %4380 = vmatprep.subr.bf16.mxu1 %v6629_v0  ;;  %6781 = vst [vmem:[#allocation34_spill] sm:$0xff] %v5774_v35  ;;  %v5784_v56 = vpack.c.bf16 %v134_v52, %v131_v51  ;;  %v130_v58 = vld [vmem:[#allocation2 + $0x270] sm:$0xff]  ;;  %v132_v61 = vld [vmem:[#allocation2 + $0x280] sm:$0xff]  ;;  %v135_v4 = vld [vmem:[#allocation2 + $0x298] sm:$0xff] }
  0x55   :  { %6782 = vst [vmem:[#allocation35_spill] sm:$0xff] %v5777_v44  ;;  %6783 = vst [vmem:[#allocation36_spill] sm:$0xff] %v5780_v49  ;;  %v5787_v3 = vpack.c.bf16 %v133_v60, %v130_v58  ;;  %v137_v5 = vld [vmem:[#allocation2 + $0x2a8] sm:$0xff]  ;;  %v140_v12 = vld [vmem:[#allocation2 + $0x2c0] sm:$0xff]  ;;  %v5790_v15 = vpack.c.bf16 %v135_v4, %v132_v61 }
  0x56   :  { %4357 = vmatpush1.bf16.msra.mxu0 %v5670_v45  ;;  %6784 = vst [vmem:[#allocation37_spill] sm:$0xff] %v5784_v56  ;;  %v5792_v20 = vpack.c.bf16 %v140_v12, %v137_v5  ;;  %v136_v21 = vld [vmem:[#allocation2 + $0x2a0] sm:$0xff]  ;;  %v139_v24 = vld [vmem:[#allocation2 + $0x2b8] sm:$0xff]  ;;  %v138_v29 = vld [vmem:[#allocation2 + $0x2b0] sm:$0xff] }
  0x57   :  { %4359 = vmatprep.subr.bf16.mxu0 %v5673_v46  ;;  %4382 = vmatpush3.bf16.msra.mxu1 %v5688_v59  ;;  %6785 = vst [vmem:[#allocation38_spill] sm:$0xff] %v5787_v3  ;;  %6786 = vst [vmem:[#allocation39_spill] sm:$0xff] %v5790_v15  ;;  %v5795_v32 = vpack.c.bf16 %v139_v24, %v136_v21  ;;  %v141_v33 = vld [vmem:[#allocation2 + $0x2c8] sm:$0xff]  ;;  %v143_v38 = vld [vmem:[#allocation2 + $0x2d8] sm:$0xff] }
  0x58   :  { %4383 = vmatprep.subr.bf16.mxu1 %v6629_v0  ;;  %6787 = vst [vmem:[#allocation40_spill] sm:$0xff] %v5792_v20  ;;  %v146_v39 = vld [vmem:[#allocation2 + $0x2f0] sm:$0xff]  ;;  %v5799_v42 = vpack.c.bf16 %v141_v33, %v138_v29  ;;  %v145_v52 = vld [vmem:[#allocation2 + $0x2e8] sm:$0xff]  ;;  %v144_v58 = vld [vmem:[#allocation2 + $0x2e0] sm:$0xff] }
  0x59   :  { %6788 = vst [vmem:[#allocation41_spill] sm:$0xff] %v5795_v32  ;;  %v5801_v47 = vpack.c.bf16 %v146_v39, %v143_v38  ;;  %v142_v51 = vld [vmem:[#allocation2 + $0x2d0] sm:$0xff]  ;;  %v147_v60 = vld [vmem:[#allocation2 + $0x2f8] sm:$0xff]  ;;  %v198_v61 = vld [vmem:[#allocation4 + $0x188] sm:$0xff]  ;;  %v247_v39 = vlaneseq }
  0x5a   :  { %4361 = vmatpush1.bf16.msra.mxu0 %v5682_v54  ;;  %6789 = vst [vmem:[#allocation42_spill] sm:$0xff] %v5799_v42  ;;  %v201_v4 = vld [vmem:[#allocation4 + $0x1a0] sm:$0xff]  ;;  %v5805_v5 = vpack.c.bf16 %v145_v52, %v142_v51  ;;  %v5809_v12 = vpack.c.bf16 %v147_v60, %v144_v58 }
  0x5b   :  { %4363 = vmatprep.subr.bf16.mxu0 %v5685_v55  ;;  %4385 = vmatpush3.bf16.msra.mxu1 %v5698_v6  ;;  %6790 = vst [vmem:[#allocation43_spill] sm:$0xff] %v5801_v47  ;;  %v5811_v21 = vpack.c.bf16 %v201_v4, %v198_v61  ;;  %v248_v51 = vshrl.u32 %v247_v39, 7  ;;  %v245_v58 = vld [vmem:[%s6624_s3] sm:$0x7] }
  0x5c   :  { %4386 = vmatprep.subr.bf16.mxu1 %v6629_v0  ;;  %6791 = vst [vmem:[#allocation44_spill] sm:$0xff] %v5805_v5  ;;  %6792 = vst [vmem:[#allocation45_spill] sm:$0xff] %v5809_v12  ;;  %v280_v60 = vld [vmem:[%s6625_s4] sm:$0x7] }
  0x5d   :  { %6793 = vst [vmem:[#allocation46_spill] sm:$0xff] %v5811_v21  ;;  %v5818_v52 = vsub.s32 0, %v248_v51  ;;  %v5826_v61 = vsub.s32 1, %v248_v51 }
  0x5e   :  { %4365 = vmatpush1.bf16.msra.mxu0 %v5692_v63 }
  0x5f   :  { %4367 = vmatprep.subr.bf16.mxu0 %v5695_v2  ;;  %4388 = vmatpush3.bf16.msra.mxu1 %v5708_v17  ;;  %6794 = vst [vmem:[#allocation47_spill] sm:$0xff] %v5818_v52  ;;  %6795 = vst [vmem:[#allocation48_spill] sm:$0xff] %v5826_v61  ;;  %v250_v4 = vrot.slane %v245_v58, %v5818_v52  ;;  %v254_v39 = vrot.slane %v245_v58, %v5826_v61 }
  0x60   :  { %4389 = vmatprep.subr.bf16.mxu1 %v6629_v0 }
  0x62   :  { %4369 = vmatpush1.bf16.msra.mxu0 %v5702_v13 }
  0x63   :  { %4371 = vmatprep.subr.bf16.mxu0 %v5705_v14  ;;  %4391 = vmatpush3.bf16.msra.mxu1 %v5716_v23 }
  0x64   :  { %4392 = vmatprep.subr.bf16.mxu1 %v6629_v0 }
  0x66   :  { %4373 = vmatpush1.bf16.msra.mxu0 %v5712_v22 }
  0x67   :  { %4394 = vmatpush3.bf16.msra.mxu1 %v5721_v26  ;;  %4399 = vmatprep.subr.bf16.mxu0 %v5735_v34 }
  0x68   :  { %4395 = vmatprep.subr.bf16.mxu1 %v6629_v0 }
  0x69   :  { %524 = vmatmul.mubr.f32.vlgmr.msra.gmra.mrb[2].mxu0 %v5634_v7 }
  0x6a   :  { %685 = vmatprep.mubr.f32.mxu0 %v6627_v1  ;;  %4401 = vmatpush1.bf16.msra.mxu0 %v5737_v40 }
  0x6b   :  { %4397 = vmatpush3.bf16.msra.mxu1 %v5727_v31  ;;  %4403 = vmatprep.subr.bf16.mxu0 %v5744_v48 }
  0x6c   :  { %4430 = vmatprep.subr.bf16.mxu1 %v6629_v0 }
  0x6e   :  { %3689 = vmatmul.mubr.f32.vlgmr.msra.gmra.mrb[2].mxu1 %v5634_v7  ;;  %4405 = vmatpush1.bf16.msra.mxu0 %v5747_v53 }
  0x6f   :  { %3723 = vmatprep.mubr.msk.f32.mxu1 %vm5568_vm0, %v6627_v1  ;;  %4432 = vmatpush3.bf16.msra.mxu1 %v5740_v43  ;;  %v5830_v1 = vrot.slane %v280_v60, %v5818_v52 }
  0x70   :  { %4433 = vmatprep.subr.bf16.mxu1 %v6629_v0  ;;  %4407 = vmatprep.subr.bf16.mxu0 %v5753_v62 }
  0x72   :  { %4409 = vmatpush1.bf16.msra.mxu0 %v5756_v10 }
  0x73   :  { %4435 = vmatpush3.bf16.msra.mxu1 %v5750_v57  ;;  %4411 = vmatprep.subr.bf16.mxu0 %v5764_v16 }
  0x74   :  { %4436 = vmatprep.subr.bf16.mxu1 %v6629_v0 }
  0x76   :  { %4413 = vmatpush1.bf16.msra.mxu0 %v5767_v25 }
  0x77   :  { %4438 = vmatpush3.bf16.msra.mxu1 %v5758_v11  ;;  %4415 = vmatprep.subr.bf16.mxu0 %v5774_v35 }
  0x78   :  { %4439 = vmatprep.subr.bf16.mxu1 %v6629_v0 }
  0x7a   :  { %4417 = vmatpush1.bf16.msra.mxu0 %v5777_v44 }
  0x7b   :  { %4441 = vmatpush3.bf16.msra.mxu1 %v5770_v30  ;;  %4419 = vmatprep.subr.bf16.mxu0 %v5784_v56 }
  0x7c   :  { %4442 = vmatprep.subr.bf16.mxu1 %v6629_v0 }
  0x7e   :  { %4421 = vmatpush1.bf16.msra.mxu0 %v5787_v3 }
  0x7f   :  { %4444 = vmatpush3.bf16.msra.mxu1 %v5780_v49  ;;  %4423 = vmatprep.subr.bf16.mxu0 %v5792_v20 }
  0x80   :  { %4445 = vmatprep.subr.bf16.mxu1 %v6629_v0 }
  0x82   :  { %4425 = vmatpush1.bf16.msra.mxu0 %v5795_v32 }
  0x83   :  { %4447 = vmatpush3.bf16.msra.mxu1 %v5790_v15  ;;  %4427 = vmatprep.subr.bf16.mxu0 %v5801_v47 }
  0x84   :  { %4448 = vmatprep.subr.bf16.mxu1 %v6629_v0 }
  0x86   :  { %4429 = vmatpush1.bf16.msra.mxu0 %v5805_v5 }
  0x87   :  { %4450 = vmatpush3.bf16.msra.mxu1 %v5799_v42  ;;  %4455 = vmatprep.subr.bf16.mxu0 %v5811_v21 }
  0x88   :  { %4451 = vmatprep.subr.bf16.mxu1 %v6629_v0 }
  0x8b   :  { %4453 = vmatpush3.bf16.msra.mxu1 %v5809_v12 }
  0x8c   :  { %4486 = vmatprep.subr.bf16.mxu1 %v6629_v0 }
 0x11c   :  { %v381_v24 = vpop.f32.mrb[0].mxu0 }
 0x11d   :  { %v383_v29 = vpop.f32.mrb[1].mxu0  ;;  %v5836_v21 = vadd.f32 %v381_v24, %v250_v4  ;;  %v5844_v4 = vsub.s32 2, %v248_v51  ;;  %v197_v51 = vld [vmem:[#allocation4 + $0x180] sm:$0xff] }
 0x11e   :  { %v5841_v32 = vadd.f32 %v383_v29, %v254_v39  ;;  %v200_v39 = vld [vmem:[#allocation4 + $0x198] sm:$0xff] }
 0x11f   :  { %6797 = vst [vmem:[#allocation50_spill] sm:$0xff] %v5836_v21 }
 0x120   :  { %6798 = vst [vmem:[#allocation51_spill] sm:$0xff] %v5841_v32 }
 0x121   :  { %v452_v33 = vpop.f32.mrb[0].mxu1 }
 0x122   :  { %v3655_v38 = vpop.f32.mrb[1].mxu1 }
 0x123   :  { %v5833_v38 = vrot.slane %v280_v60, %v5826_v61 }
 0x125   :  { %6796 = vst [vmem:[#allocation49_spill] sm:$0xff] %v5833_v38 }
 0x13c   :  { %v525_v0 = vpop.f32.mrb[2].mxu0 }
 0x13d   :  { %v526_v12 = vadd.f32 %v525_v0, %v5830_v1  ;;  %v527_v5 = vpop.f32.mrb[3].mxu0  ;;  %v5847_v0 = vrot.slane %v280_v60, %v5844_v4  ;;  %v199_v60 = vld [vmem:[#allocation4 + $0x190] sm:$0xff] }
 0x13e   :  { %v528_v47 = vadd.f32 %v527_v5, %v5833_v38  ;;  %v213_v38 = vld [vmem:[#allocation4 + $0x200] sm:$0xff] }
 0x13f   :  { %v600_v42 = vadd.f32 %v526_v12, %v5836_v21  ;;  %6799 = vst [vmem:[#allocation52_spill] sm:$0xff] %v5847_v0  ;;  %v258_v12 = vrot.slane %v245_v58, %v5844_v4  ;;  %v204_v21 = vld [vmem:[#allocation4 + $0x1b8] sm:$0xff]  ;;  %v207_v58 = vld [vmem:[#allocation4 + $0x1d0] sm:$0xff] }
 0x140   :  { %v607_v52 = vadd.f32 %v528_v47, %v5841_v32 }
 0x141   :  { %v3269_v20 = vmul.f32 -1.442695, %v600_v42  ;;  %v596_v15 = vpop.f32.mrb[2].mxu1 }
 0x142   :  { %v3270_v3 = vmul.f32 -1.442695, %v607_v52  ;;  %v3690_v56 = vpop.f32.mrb[3].mxu1  ;;  %v597_v42 = vadd.f32 %v596_v15, %v5847_v0  ;;  %v5855_v0 = vpack.c.bf16 %v200_v39, %v197_v51  ;;  %v211_v39 = vld [vmem:[#allocation4 + $0x1f0] sm:$0xff] }
 0x143   :  { %5393 = vpow2.f32 %v3269_v20  ;;  %v5851_v20 = vadd.f32 %v452_v33, %v258_v12  ;;  %v203_v12 = vld [vmem:[#allocation4 + $0x1b0] sm:$0xff] }
 0x144   :  { %5395 = vpow2.f32 %v3270_v3 }
 0x145   :  { %6800 = vst [vmem:[#allocation53_spill] sm:$0xff] %v5851_v20 }
 0x14d   :  { %v5394_v61 = vpop.eup %5393 }
 0x14e   :  { %v604_v24 = vadd.f32 1.0, %v5394_v61  ;;  %v5396_v5 = vpop.eup %5395 }
 0x14f   :  { %v611_v29 = vadd.f32 1.0, %v5396_v5 }
 0x150   :  { %5397 = vrcp.f32 %v604_v24  ;;  %v202_v24 = vld [vmem:[#allocation4 + $0x1a8] sm:$0xff] }
 0x151   :  { %5399 = vrcp.f32 %v611_v29  ;;  %v5857_v33 = vpack.c.bf16 %v202_v24, %v199_v60  ;;  %v214_v60 = vld [vmem:[#allocation4 + $0x208] sm:$0xff]  ;;  %v216_v24 = vld [vmem:[#allocation4 + $0x218] sm:$0xff] }
 0x153   :  { %6801 = vst [vmem:[#allocation54_spill] sm:$0xff] %v5857_v33 }
 0x15a   :  { %v5398_v47 = vpop.eup %5397 }
 0x15b   :  { %v614_v56 = vmul.f32 %v5398_v47, %v597_v42  ;;  %v5400_v52 = vpop.eup %5399  ;;  %v5861_v42 = vpack.c.bf16 %v207_v58, %v204_v21  ;;  %v206_v47 = vld [vmem:[#allocation4 + $0x1c8] sm:$0xff]  ;;  %v6805_v21 = vmov 0.0|0.0   ;;  %v219_v58 = vld [vmem:[#allocation4 + $0x230] sm:$0xff] }
 0x15c   :  { %v617_v61 = vsub.f32 1.0, %v5400_v52  ;;  %v619_v15 = vmul.f32 %v5400_v52, %v5634_v7  ;;  %v5867_v7 = vpack.c.bf16 %v206_v47, %v203_v12  ;;  %v209_v52 = vld [vmem:[#allocation4 + $0x1e0] sm:$0xff]  ;;  %v5882_v12 = vpack.c.bf16 %v214_v60, %v211_v39  ;;  %v218_v47 = vld [vmem:[#allocation4 + $0x228] sm:$0xff] }
 0x15d   :  { %v615_v3 = vadd.f32 %v614_v56, %v5851_v20  ;;  %6802 = vst [vmem:[#allocation55_spill] sm:$0xff] %v5861_v42  ;;  %v205_v56 = vld [vmem:[#allocation4 + $0x1c0] sm:$0xff]  ;;  %v210_v20 = vld [vmem:[#allocation4 + $0x1e8] sm:$0xff] }
 0x15e   :  { %6803 = vst [vmem:[#allocation56_spill] sm:$0xff] %v5867_v7  ;;  %v5873_v51 = vpack.c.bf16 %v213_v38, %v210_v20  ;;  %6809 = vst [vmem:[#allocation60_spill] sm:$0xff] %v5882_v12  ;;  %v215_v38 = vld [vmem:[#allocation4 + $0x210] sm:$0xff]  ;;  %v5886_v20 = vpack.c.bf16 %v219_v58, %v216_v24  ;;  %v221_v39 = vld [vmem:[#allocation4 + $0x240] sm:$0xff] }
 0x15f   :  { %5401 = vtanh.f32 %v615_v3  ;;  %v208_v3 = vld [vmem:[#allocation4 + $0x1d8] sm:$0xff]  ;;  %v223_v58 = vld [vmem:[#allocation4 + $0x250] sm:$0xff] }
 0x160   :  { %6806 = vst [vmem:[#allocation58_spill] sm:$0xff] %v5873_v51  ;;  %6810 = vst [vmem:[#allocation61_spill] sm:$0xff] %v5886_v20  ;;  %v224_v24 = vld [vmem:[#allocation4 + $0x258] sm:$0xff] }
 0x169   :  { %v5402_v32 = vpop.eup %5401 }
 0x16a   :  { %v618_v5 = vmul.f32 %v5402_v32, %v617_v61  ;;  %v5869_v32 = vpack.c.bf16 %v208_v3, %v205_v56  ;;  %v212_v61 = vld [vmem:[#allocation4 + $0x1f8] sm:$0xff]  ;;  %v217_v56 = vld [vmem:[#allocation4 + $0x220] sm:$0xff] }
 0x16b   :  { %v220_v3 = vld [vmem:[#allocation4 + $0x238] sm:$0xff] }
 0x16c   :  { %v5859_v29 = vadd.f32 %v619_v15, %v618_v5  ;;  %6804 = vst [vmem:[#allocation57_spill] sm:$0xff] %v5869_v32  ;;  %v6807_v5 = vmov 0.0   ;;  %v5880_v15 = vpack.c.bf16 %v212_v61, %v209_v52  ;;  %v5890_v52 = vpack.c.bf16 %v218_v47, %v215_v38 }
 0x16d   :  { %v5892_v61 = vpack.c.bf16 %v220_v3, %v217_v56  ;;  %v5900_v38 = vpack.c.bf16 %v224_v24, %v221_v39  ;;  %v227_v56 = vld [vmem:[#allocation4 + $0x270] sm:$0xff]  ;;  %v229_v3 = vld [vmem:[#allocation4 + $0x280] sm:$0xff] }
 0x16e   :  { %686 = vmatmul.mubr.f32.vlgmr.msra.gmra.mrb[4].mxu0 %v5859_v29  ;;  %3724 = vmatmul.mubr.f32.vlgmr.msra.gmra.mrb[4].mxu1 %v5859_v29  ;;  %6808 = vst [vmem:[#allocation59_spill] sm:$0xff] %v5880_v15  ;;  %6811 = vst [vmem:[#allocation62_spill] sm:$0xff] %v5890_v52  ;;  %v233_v24 = vld [vmem:[#allocation4 + $0x2a0] sm:$0xff] }
 0x16f   :  { %4457 = vmatpush1.bf16.msra.mxu0 %v5855_v0  ;;  %4488 = vmatpush3.bf16.msra.mxu1 %v5857_v33  ;;  %v225_v33 = vld [vmem:[#allocation4 + $0x260] sm:$0xff]  ;;  %6812 = vst [vmem:[#allocation63_spill] sm:$0xff] %v5892_v61 }
 0x170   :  { %4459 = vmatprep.subr.bf16.mxu0 %v5861_v42  ;;  %4489 = vmatprep.subr.bf16.mxu1 %v6805_v21  ;;  %v222_v42 = vld [vmem:[#allocation4 + $0x248] sm:$0xff] }
 0x171   :  { %826 = vmatprep.mubr.f32.mxu0 %v6807_v5  ;;  %3758 = vmatprep.mubr.msk.f32.mxu1 %vm5568_vm0, %v6807_v5  ;;  %v5896_v60 = vpack.c.bf16 %v225_v33, %v222_v42  ;;  %v230_v42 = vld [vmem:[#allocation4 + $0x288] sm:$0xff] }
 0x172   :  { %v5910_v39 = vpack.c.bf16 %v230_v42, %v227_v56  ;;  %v239_v42 = vld [vmem:[#allocation4 + $0x2d0] sm:$0xff] }
 0x173   :  { %4461 = vmatpush1.bf16.msra.mxu0 %v5867_v7  ;;  %4491 = vmatpush3.bf16.msra.mxu1 %v5869_v32  ;;  %6813 = vst [vmem:[#allocation64_spill] sm:$0xff] %v5896_v60  ;;  %v228_v32 = vld [vmem:[#allocation4 + $0x278] sm:$0xff]  ;;  %v231_v7 = vld [vmem:[#allocation4 + $0x290] sm:$0xff] }
 0x174   :  { %4463 = vmatprep.subr.bf16.mxu0 %v5873_v51  ;;  %4492 = vmatprep.subr.bf16.mxu1 %v6805_v21  ;;  %v226_v51 = vld [vmem:[#allocation4 + $0x268] sm:$0xff]  ;;  %v5906_v33 = vpack.c.bf16 %v231_v7, %v228_v32  ;;  %6815 = vst [vmem:[#allocation66_spill] sm:$0xff] %v5910_v39  ;;  %v236_v32 = vld [vmem:[#allocation4 + $0x2b8] sm:$0xff] }
 0x175   :  { %v5902_v47 = vpack.c.bf16 %v226_v51, %v223_v58  ;;  %v235_v58 = vld [vmem:[#allocation4 + $0x2b0] sm:$0xff]  ;;  %v5920_v56 = vpack.c.bf16 %v236_v32, %v233_v24 }
 0x176   :  { %6814 = vst [vmem:[#allocation65_spill] sm:$0xff] %v5906_v33  ;;  %v6821_v32 = vld [vmem:[#allocation42_spill] sm:$0xff] }
 0x177   :  { %4465 = vmatpush1.bf16.msra.mxu0 %v5880_v15  ;;  %4494 = vmatpush3.bf16.msra.mxu1 %v5882_v12  ;;  %v234_v12 = vld [vmem:[#allocation4 + $0x2a8] sm:$0xff]  ;;  %v237_v15 = vld [vmem:[#allocation4 + $0x2c0] sm:$0xff] }
 0x178   :  { %4467 = vmatprep.subr.bf16.mxu0 %v5886_v20  ;;  %4495 = vmatprep.subr.bf16.mxu1 %v6805_v21  ;;  %v232_v20 = vld [vmem:[#allocation4 + $0x298] sm:$0xff]  ;;  %v5916_v7 = vpack.c.bf16 %v237_v15, %v234_v12  ;;  %v242_v12 = vld [vmem:[#allocation4 + $0x2e8] sm:$0xff] }
 0x179   :  { %v5912_v51 = vpack.c.bf16 %v232_v20, %v229_v3  ;;  %v241_v3 = vld [vmem:[#allocation4 + $0x2e0] sm:$0xff] }
 0x17b   :  { %4469 = vmatpush1.bf16.msra.mxu0 %v5890_v52  ;;  %4497 = vmatpush3.bf16.msra.mxu1 %v5892_v61  ;;  %v240_v61 = vld [vmem:[#allocation4 + $0x2d8] sm:$0xff]  ;;  %v243_v52 = vld [vmem:[#allocation4 + $0x2f0] sm:$0xff] }
 0x17c   :  { %4471 = vmatprep.subr.bf16.mxu0 %v5896_v60  ;;  %4498 = vmatprep.subr.bf16.mxu1 %v6805_v21  ;;  %v238_v60 = vld [vmem:[#allocation4 + $0x2c8] sm:$0xff]  ;;  %v5926_v15 = vpack.c.bf16 %v243_v52, %v240_v61  ;;  %v6817_v52 = vld [vmem:[#allocation38_spill] sm:$0xff]  ;;  %v6818_v61 = vld [vmem:[#allocation39_spill] sm:$0xff] }
 0x17d   :  { %v5922_v20 = vpack.c.bf16 %v238_v60, %v235_v58  ;;  %v6819_v60 = vld [vmem:[#allocation40_spill] sm:$0xff]  ;;  %v6822_v58 = vld [vmem:[#allocation43_spill] sm:$0xff] }
 0x17f   :  { %4473 = vmatpush1.bf16.msra.mxu0 %v5900_v38  ;;  %4500 = vmatpush3.bf16.msra.mxu1 %v5902_v47 }
 0x180   :  { %4475 = vmatprep.subr.bf16.mxu0 %v5906_v33  ;;  %4501 = vmatprep.subr.bf16.mxu1 %v6805_v21  ;;  %v244_v33 = vld [vmem:[#allocation4 + $0x2f8] sm:$0xff] }
 0x181   :  { %v5932_v24 = vpack.c.bf16 %v244_v33, %v241_v3  ;;  %v6820_v33 = vld [vmem:[#allocation41_spill] sm:$0xff]  ;;  %v6825_v3 = vld [vmem:[#allocation46_spill] sm:$0xff] }
 0x183   :  { %4477 = vmatpush1.bf16.msra.mxu0 %v5910_v39  ;;  %4503 = vmatpush3.bf16.msra.mxu1 %v5912_v51  ;;  %v5930_v39 = vpack.c.bf16 %v242_v12, %v239_v42  ;;  %v6823_v42 = vld [vmem:[#allocation44_spill] sm:$0xff]  ;;  %v6824_v12 = vld [vmem:[#allocation45_spill] sm:$0xff] }
 0x184   :  { %4479 = vmatprep.subr.bf16.mxu0 %v5916_v7  ;;  %4504 = vmatprep.subr.bf16.mxu1 %v6805_v21 }
 0x187   :  { %4481 = vmatpush1.bf16.msra.mxu0 %v5920_v56  ;;  %4506 = vmatpush3.bf16.msra.mxu1 %v5922_v20 }
 0x188   :  { %4483 = vmatprep.subr.bf16.mxu0 %v5926_v15  ;;  %4507 = vmatprep.subr.bf16.mxu1 %v6805_v21 }
 0x18b   :  { %4485 = vmatpush1.bf16.msra.mxu0 %v5930_v39  ;;  %4509 = vmatpush3.bf16.msra.mxu1 %v5932_v24 }
 0x18c   :  { %4511 = vmatprep.subr.bf16.mxu0 %v5641_v9  ;;  %4542 = vmatprep.subr.bf16.mxu1 %v6805_v21 }
 0x18e   :  { %827 = vmatmul.mubr.f32.vlgmr.msra.gmra.mrb[4].mxu0 %v5639_v8  ;;  %3759 = vmatmul.mubr.f32.vlgmr.msra.gmra.mrb[6].mxu1 %v5639_v8  ;;  %v6816_v8 = vld [vmem:[#allocation37_spill] sm:$0xff] }
 0x18f   :  { %4513 = vmatpush1.bf16.msra.mxu0 %v5646_v18  ;;  %4544 = vmatpush3.bf16.msra.mxu1 %v5666_v41 }
 0x190   :  { %4515 = vmatprep.subr.bf16.mxu0 %v5649_v19  ;;  %4545 = vmatprep.subr.bf16.mxu1 %v6805_v21 }
 0x191   :  { %989 = vmatprep.mubr.f32.mxu0 %v6807_v5  ;;  %3793 = vmatprep.mubr.msk.f32.mxu1 %vm5568_vm0, %v6807_v5 }
 0x193   :  { %4517 = vmatpush1.bf16.msra.mxu0 %v5653_v27  ;;  %4547 = vmatpush3.bf16.msra.mxu1 %v5676_v50 }
 0x194   :  { %4519 = vmatprep.subr.bf16.mxu0 %v5657_v28  ;;  %4548 = vmatprep.subr.bf16.mxu1 %v6805_v21 }
 0x197   :  { %4521 = vmatpush1.bf16.msra.mxu0 %v5661_v36  ;;  %4550 = vmatpush3.bf16.msra.mxu1 %v5688_v59 }
 0x198   :  { %4523 = vmatprep.subr.bf16.mxu0 %v5664_v37  ;;  %4551 = vmatprep.subr.bf16.mxu1 %v6805_v21 }
 0x19b   :  { %4525 = vmatpush1.bf16.msra.mxu0 %v5670_v45  ;;  %4553 = vmatpush3.bf16.msra.mxu1 %v5698_v6 }
 0x19c   :  { %4527 = vmatprep.subr.bf16.mxu0 %v5673_v46  ;;  %4554 = vmatprep.subr.bf16.mxu1 %v6805_v21 }
 0x19f   :  { %4529 = vmatpush1.bf16.msra.mxu0 %v5682_v54  ;;  %4556 = vmatpush3.bf16.msra.mxu1 %v5708_v17 }
 0x1a0   :  { %4531 = vmatprep.subr.bf16.mxu0 %v5685_v55  ;;  %4557 = vmatprep.subr.bf16.mxu1 %v6805_v21 }
 0x1a3   :  { %4533 = vmatpush1.bf16.msra.mxu0 %v5692_v63  ;;  %4559 = vmatpush3.bf16.msra.mxu1 %v5716_v23 }
 0x1a4   :  { %4535 = vmatprep.subr.bf16.mxu0 %v5695_v2  ;;  %4560 = vmatprep.subr.bf16.mxu1 %v6805_v21 }
 0x1a7   :  { %4537 = vmatpush1.bf16.msra.mxu0 %v5702_v13  ;;  %4562 = vmatpush3.bf16.msra.mxu1 %v5721_v26 }
 0x1a8   :  { %4539 = vmatprep.subr.bf16.mxu0 %v5705_v14  ;;  %4563 = vmatprep.subr.bf16.mxu1 %v6805_v21 }
 0x1ab   :  { %4541 = vmatpush1.bf16.msra.mxu0 %v5712_v22  ;;  %4565 = vmatpush3.bf16.msra.mxu1 %v5727_v31 }
 0x1ac   :  { %4567 = vmatprep.subr.bf16.mxu0 %v5735_v34  ;;  %4598 = vmatprep.subr.bf16.mxu1 %v6805_v21 }
 0x1ae   :  { %990 = vmatmul.mubr.f32.vlgmr.msra.gmra.mrb[6].mxu0 %v5859_v29  ;;  %3794 = vmatmul.mubr.f32.vlgmr.msra.gmra.mrb[8].mxu1 %v5859_v29 }
 0x1af   :  { %4569 = vmatpush1.bf16.msra.mxu0 %v5737_v40  ;;  %4600 = vmatpush3.bf16.msra.mxu1 %v5740_v43 }
 0x1b0   :  { %4571 = vmatprep.subr.bf16.mxu0 %v5744_v48  ;;  %4601 = vmatprep.subr.bf16.mxu1 %v6805_v21 }
 0x1b1   :  { %1151 = vmatprep.mubr.f32.mxu0 %v6807_v5  ;;  %3828 = vmatprep.mubr.msk.f32.mxu1 %vm5568_vm0, %v6807_v5 }
 0x1b3   :  { %4573 = vmatpush1.bf16.msra.mxu0 %v5747_v53  ;;  %4603 = vmatpush3.bf16.msra.mxu1 %v5750_v57 }
 0x1b4   :  { %4575 = vmatprep.subr.bf16.mxu0 %v5753_v62  ;;  %4604 = vmatprep.subr.bf16.mxu1 %v6805_v21 }
 0x1b7   :  { %4577 = vmatpush1.bf16.msra.mxu0 %v5756_v10  ;;  %4606 = vmatpush3.bf16.msra.mxu1 %v5758_v11 }
 0x1b8   :  { %4579 = vmatprep.subr.bf16.mxu0 %v5764_v16  ;;  %4607 = vmatprep.subr.bf16.mxu1 %v6805_v21 }
 0x1bb   :  { %4581 = vmatpush1.bf16.msra.mxu0 %v5767_v25  ;;  %4609 = vmatpush3.bf16.msra.mxu1 %v5770_v30 }
 0x1bc   :  { %4583 = vmatprep.subr.bf16.mxu0 %v5774_v35  ;;  %4610 = vmatprep.subr.bf16.mxu1 %v6805_v21 }
 0x1bf   :  { %4585 = vmatpush1.bf16.msra.mxu0 %v5777_v44  ;;  %4612 = vmatpush3.bf16.msra.mxu1 %v5780_v49 }
 0x1c0   :  { %4587 = vmatprep.subr.bf16.mxu0 %v6816_v8  ;;  %4613 = vmatprep.subr.bf16.mxu1 %v6805_v21  ;;  %v6827_v8 = vld [vmem:[#allocation48_spill] sm:$0xff] }
 0x1c3   :  { %4589 = vmatpush1.bf16.msra.mxu0 %v6817_v52  ;;  %4615 = vmatpush3.bf16.msra.mxu1 %v6818_v61 }
 0x1c4   :  { %4591 = vmatprep.subr.bf16.mxu0 %v6819_v60  ;;  %4616 = vmatprep.subr.bf16.mxu1 %v6805_v21 }
 0x1c7   :  { %4593 = vmatpush1.bf16.msra.mxu0 %v6820_v33  ;;  %4618 = vmatpush3.bf16.msra.mxu1 %v6821_v32  ;;  %v3267_v33 = vld [vmem:[%s6625_s4 + $0x3] sm:$0x7]  ;;  %v6826_v32 = vld [vmem:[#allocation47_spill] sm:$0xff] }
 0x1c8   :  { %4595 = vmatprep.subr.bf16.mxu0 %v6822_v58  ;;  %4619 = vmatprep.subr.bf16.mxu1 %v6805_v21  ;;  %v3266_v58 = vld [vmem:[%s6624_s3 + $0x3] sm:$0x7] }
 0x1c9   :  { %v268_v52 = vrot.slane %v3266_v58, %v6826_v32 }
 0x1cb   :  { %4597 = vmatpush1.bf16.msra.mxu0 %v6823_v42  ;;  %4621 = vmatpush3.bf16.msra.mxu1 %v6824_v12  ;;  %v303_v42 = vrot.slane %v3267_v33, %v6826_v32  ;;  %v272_v12 = vrot.slane %v3266_v58, %v6827_v8 }
 0x1cc   :  { %4623 = vmatprep.subr.bf16.mxu0 %v6825_v3  ;;  %4654 = vmatprep.subr.bf16.mxu1 %v6805_v21  ;;  %v307_v3 = vrot.slane %v3267_v33, %v6827_v8  ;;  %v6031_v8 = vrot.slane %v3267_v33, %v5844_v4 }
 0x1cd   :  { %v6024_v49 = vadd.f32 %v303_v42, %v268_v52  ;;  %v6034_v42 = vrot.slane %v3266_v58, %v5844_v4  ;;  %v6832_v4 = vld [vmem:[#allocation50_spill] sm:$0xff] }
 0x1ce   :  { %6830 = vst [vmem:[#allocation67_spill] sm:$0xff] %v6031_v8 }
 0x1cf   :  { %6828 = vst [vmem:[#allocation47_spill] sm:$0xff] %v6024_v49 }
 0x241   :  { %v758_v61 = vpop.f32.mrb[4].mxu1 }
 0x242   :  { %v3725_v60 = vpop.f32.mrb[5].mxu1 }
 0x243   :  { %v6026_v60 = vadd.f32 %v307_v3, %v272_v12 }
 0x245   :  { %6829 = vst [vmem:[#allocation48_spill] sm:$0xff] %v6026_v60 }
 0x261   :  { %v828_v44 = vpop.f32.mrb[4].mxu0  ;;  %v899_v35 = vpop.f32.mrb[6].mxu1 }
 0x262   :  { %v5351_v30 = vadd.f32 %v6024_v49, %v828_v44  ;;  %v830_v25 = vpop.f32.mrb[5].mxu0  ;;  %v3760_v16 = vpop.f32.mrb[7].mxu1  ;;  %v900_v44 = vadd.f32 %v899_v35, %v6031_v8  ;;  %v6833_v49 = vld [vmem:[#allocation51_spill] sm:$0xff] }
 0x263   :  { %v5353_v10 = vadd.f32 %v6026_v60, %v830_v25 }
 0x264   :  { %v3271_v11 = vmul.f32 -1.442695, %v5351_v30  ;;  %v759_v30 = vadd.f32 %v758_v61, %v6034_v42 }
 0x265   :  { %v3272_v62 = vmul.f32 -1.442695, %v5353_v10 }
 0x266   :  { %5403 = vpow2.f32 %v3271_v11 }
 0x267   :  { %5405 = vpow2.f32 %v3272_v62 }
 0x270   :  { %v5404_v32 = vpop.eup %5403 }
 0x271   :  { %v907_v57 = vadd.f32 1.0, %v5404_v32  ;;  %v5406_v52 = vpop.eup %5405  ;;  %v6831_v32 = vld [vmem:[#allocation49_spill] sm:$0xff] }
 0x272   :  { %v914_v12 = vadd.f32 1.0, %v5406_v52 }
 0x273   :  { %5407 = vrcp.f32 %v907_v57 }
 0x274   :  { %5409 = vrcp.f32 %v914_v12 }
 0x27d   :  { %v5408_v16 = vpop.eup %5407 }
 0x27e   :  { %v917_v11 = vmul.f32 %v5408_v16, %v900_v44  ;;  %v5410_v8 = vpop.eup %5409 }
 0x27f   :  { %v920_v12 = vsub.f32 1.0, %v5410_v8 }
 0x280   :  { %v918_v10 = vadd.f32 %v917_v11, %v759_v30  ;;  %v5513_v30 = vld [vmem:[%s6621_s0 + $0x8] sm:$0xff] }
 0x281   :  { %v991_v62 = vpop.f32.mrb[6].mxu0  ;;  %v1062_v25 = vpop.f32.mrb[8].mxu1  ;;  %v922_v11 = vmul.f32 %v5513_v30, %v5410_v8 }
 0x282   :  { %5411 = vtanh.f32 %v918_v10  ;;  %v992_v57 = vadd.f32 %v991_v62, %v5830_v1  ;;  %v993_v33 = vpop.f32.mrb[7].mxu0  ;;  %v3795_v3 = vpop.f32.mrb[9].mxu1 }
 0x283   :  { %v994_v60 = vadd.f32 %v993_v33, %v6831_v32  ;;  %v6834_v3 = vld [vmem:[#allocation52_spill] sm:$0xff] }
 0x284   :  { %v1066_v58 = vadd.f32 %v992_v57, %v6832_v4 }
 0x285   :  { %v1073_v35 = vadd.f32 %v994_v60, %v6833_v49 }
 0x286   :  { %v3273_v52 = vmul.f32 -1.442695, %v1066_v58  ;;  %v1063_v58 = vadd.f32 %v1062_v25, %v6834_v3  ;;  %v6836_v25 = vld [vmem:[#allocation54_spill] sm:$0xff] }
 0x287   :  { %v3274_v61 = vmul.f32 -1.442695, %v1073_v35 }
 0x288   :  { %5413 = vpow2.f32 %v3273_v52 }
 0x289   :  { %5415 = vpow2.f32 %v3274_v61 }
 0x28c   :  { %v5412_v44 = vpop.eup %5411 }
 0x28d   :  { %v921_v16 = vmul.f32 %v5412_v44, %v920_v12  ;;  %v6835_v12 = vld [vmem:[#allocation53_spill] sm:$0xff] }
 0x28f   :  { %v6045_v10 = vadd.f32 %v922_v11, %v921_v16 }
 0x291   :  { %924 = vst [vmem:[%s6626_s5] sm:$0xff] %v6045_v10 }
 0x292   :  { %v5414_v60 = vpop.eup %5413 }
 0x293   :  { %v1070_v62 = vadd.f32 1.0, %v5414_v60  ;;  %v5416_v57 = vpop.eup %5415  ;;  %v6837_v60 = vld [vmem:[#allocation55_spill] sm:$0xff] }
 0x294   :  { %v1077_v33 = vadd.f32 1.0, %v5416_v57  ;;  %v6840_v57 = vld [vmem:[#allocation58_spill] sm:$0xff] }
 0x295   :  { %5417 = vrcp.f32 %v1070_v62  ;;  %v6839_v62 = vld [vmem:[#allocation57_spill] sm:$0xff] }
 0x296   :  { %5419 = vrcp.f32 %v1077_v33  ;;  %v6841_v33 = vld [vmem:[#allocation59_spill] sm:$0xff] }
 0x29f   :  { %v5418_v52 = vpop.eup %5417 }
 0x2a0   :  { %v1080_v35 = vmul.f32 %v5418_v52, %v1063_v58  ;;  %v5420_v61 = vpop.eup %5419  ;;  %v6842_v58 = vld [vmem:[#allocation60_spill] sm:$0xff]  ;;  %v6843_v52 = vld [vmem:[#allocation61_spill] sm:$0xff] }
 0x2a1   :  { %v1083_v44 = vsub.f32 1.0, %v5420_v61  ;;  %v1085_v11 = vmul.f32 %v5420_v61, %v5859_v29  ;;  %v6838_v29 = vld [vmem:[#allocation56_spill] sm:$0xff] }
 0x2a2   :  { %v1081_v8 = vadd.f32 %v1080_v35, %v6835_v12  ;;  %v6844_v35 = vld [vmem:[#allocation62_spill] sm:$0xff]  ;;  %v6846_v61 = vld [vmem:[#allocation64_spill] sm:$0xff] }
 0x2a4   :  { %5421 = vtanh.f32 %v1081_v8  ;;  %v6845_v8 = vld [vmem:[#allocation63_spill] sm:$0xff] }
 0x2ae   :  { %v5422_v16 = vpop.eup %5421 }
 0x2af   :  { %v1084_v30 = vmul.f32 %v5422_v16, %v1083_v44  ;;  %v6847_v44 = vld [vmem:[#allocation65_spill] sm:$0xff]  ;;  %v6848_v16 = vld [vmem:[#allocation66_spill] sm:$0xff] }
 0x2b1   :  { %v6054_v49 = vadd.f32 %v1085_v11, %v1084_v30  ;;  %v6849_v30 = vld [vmem:[#allocation27_spill] sm:$0xff]  ;;  %v6850_v11 = vld [vmem:[#allocation28_spill] sm:$0xff] }
 0x2b3   :  { %1152 = vmatmul.mubr.f32.vlgmr.msra.gmra.mrb[8].mxu0 %v6054_v49  ;;  %3829 = vmatmul.mubr.f32.vlgmr.msra.gmra.mrb[10].mxu1 %v6054_v49 }
 0x2b4   :  { %4625 = vmatpush1.bf16.msra.mxu0 %v5855_v0  ;;  %4656 = vmatpush3.bf16.msra.mxu1 %v6836_v25 }
 0x2b5   :  { %4627 = vmatprep.subr.bf16.mxu0 %v6837_v60  ;;  %4657 = vmatprep.subr.bf16.mxu1 %v6805_v21 }
 0x2b6   :  { %1292 = vmatprep.mubr.f32.mxu0 %v6807_v5  ;;  %3863 = vmatprep.mubr.msk.f32.mxu1 %vm5568_vm0, %v6807_v5 }
 0x2b8   :  { %4629 = vmatpush1.bf16.msra.mxu0 %v6838_v29  ;;  %4659 = vmatpush3.bf16.msra.mxu1 %v6839_v62 }
 0x2b9   :  { %4631 = vmatprep.subr.bf16.mxu0 %v6840_v57  ;;  %4660 = vmatprep.subr.bf16.mxu1 %v6805_v21 }
 0x2bc   :  { %4633 = vmatpush1.bf16.msra.mxu0 %v6841_v33  ;;  %4662 = vmatpush3.bf16.msra.mxu1 %v6842_v58 }
 0x2bd   :  { %4635 = vmatprep.subr.bf16.mxu0 %v6843_v52  ;;  %4663 = vmatprep.subr.bf16.mxu1 %v6805_v21 }
 0x2c0   :  { %4637 = vmatpush1.bf16.msra.mxu0 %v6844_v35  ;;  %4665 = vmatpush3.bf16.msra.mxu1 %v6845_v8 }
 0x2c1   :  { %4639 = vmatprep.subr.bf16.mxu0 %v6846_v61  ;;  %4666 = vmatprep.subr.bf16.mxu1 %v6805_v21 }
 0x2c4   :  { %4641 = vmatpush1.bf16.msra.mxu0 %v5900_v38  ;;  %4668 = vmatpush3.bf16.msra.mxu1 %v5902_v47 }
 0x2c5   :  { %4643 = vmatprep.subr.bf16.mxu0 %v6847_v44  ;;  %4669 = vmatprep.subr.bf16.mxu1 %v6805_v21 }
 0x2c8   :  { %4645 = vmatpush1.bf16.msra.mxu0 %v6848_v16  ;;  %4671 = vmatpush3.bf16.msra.mxu1 %v5912_v51 }
 0x2c9   :  { %4647 = vmatprep.subr.bf16.mxu0 %v5916_v7  ;;  %4672 = vmatprep.subr.bf16.mxu1 %v6805_v21 }
 0x2cc   :  { %4649 = vmatpush1.bf16.msra.mxu0 %v5920_v56  ;;  %4674 = vmatpush3.bf16.msra.mxu1 %v5922_v20 }
 0x2cd   :  { %4651 = vmatprep.subr.bf16.mxu0 %v5926_v15  ;;  %4675 = vmatprep.subr.bf16.mxu1 %v6805_v21 }
 0x2d0   :  { %4653 = vmatpush1.bf16.msra.mxu0 %v5930_v39  ;;  %4677 = vmatpush3.bf16.msra.mxu1 %v5932_v24 }
 0x2d1   :  { %4679 = vmatprep.subr.bf16.mxu0 %v5641_v9  ;;  %4710 = vmatprep.subr.bf16.mxu1 %v6805_v21 }
 0x2d3   :  { %1293 = vmatmul.mubr.f32.vlgmr.msra.gmra.mrb[8].mxu0 %v6045_v10  ;;  %3864 = vmatmul.mubr.f32.vlgmr.msra.gmra.mrb[12].mxu1 %v6045_v10 }
 0x2d4   :  { %4681 = vmatpush1.bf16.msra.mxu0 %v5646_v18  ;;  %4712 = vmatpush3.bf16.msra.mxu1 %v5666_v41 }
 0x2d5   :  { %4683 = vmatprep.subr.bf16.mxu0 %v5649_v19  ;;  %4713 = vmatprep.subr.bf16.mxu1 %v6805_v21 }
 0x2d6   :  { %1456 = vmatprep.mubr.f32.mxu0 %v6807_v5  ;;  %3898 = vmatprep.mubr.msk.f32.mxu1 %vm5568_vm0, %v6807_v5 }
 0x2d8   :  { %4685 = vmatpush1.bf16.msra.mxu0 %v5653_v27  ;;  %4715 = vmatpush3.bf16.msra.mxu1 %v5676_v50 }
 0x2d9   :  { %4687 = vmatprep.subr.bf16.mxu0 %v5657_v28  ;;  %4716 = vmatprep.subr.bf16.mxu1 %v6805_v21 }
 0x2dc   :  { %4689 = vmatpush1.bf16.msra.mxu0 %v5661_v36  ;;  %4718 = vmatpush3.bf16.msra.mxu1 %v5688_v59 }
 0x2dd   :  { %4691 = vmatprep.subr.bf16.mxu0 %v5664_v37  ;;  %4719 = vmatprep.subr.bf16.mxu1 %v6805_v21 }
 0x2e0   :  { %4693 = vmatpush1.bf16.msra.mxu0 %v5670_v45  ;;  %4721 = vmatpush3.bf16.msra.mxu1 %v5698_v6 }
 0x2e1   :  { %4695 = vmatprep.subr.bf16.mxu0 %v5673_v46  ;;  %4722 = vmatprep.subr.bf16.mxu1 %v6805_v21 }
 0x2e4   :  { %4697 = vmatpush1.bf16.msra.mxu0 %v5682_v54  ;;  %4724 = vmatpush3.bf16.msra.mxu1 %v5708_v17  ;;  %v6871_v17 = vld [vmem:[#allocation67_spill] sm:$0xff] }
 0x2e5   :  { %4699 = vmatprep.subr.bf16.mxu0 %v5685_v55  ;;  %4725 = vmatprep.subr.bf16.mxu1 %v6805_v21 }
 0x2e8   :  { %4701 = vmatpush1.bf16.msra.mxu0 %v5692_v63  ;;  %4727 = vmatpush3.bf16.msra.mxu1 %v5716_v23 }
 0x2e9   :  { %4703 = vmatprep.subr.bf16.mxu0 %v5695_v2  ;;  %4728 = vmatprep.subr.bf16.mxu1 %v6805_v21 }
 0x2ec   :  { %4705 = vmatpush1.bf16.msra.mxu0 %v5702_v13  ;;  %4730 = vmatpush3.bf16.msra.mxu1 %v5721_v26  ;;  %v6869_v26 = vld [vmem:[#allocation47_spill] sm:$0xff] }
 0x2ed   :  { %4707 = vmatprep.subr.bf16.mxu0 %v5705_v14  ;;  %4731 = vmatprep.subr.bf16.mxu1 %v6805_v21 }
 0x2f0   :  { %4709 = vmatpush1.bf16.msra.mxu0 %v5712_v22  ;;  %4733 = vmatpush3.bf16.msra.mxu1 %v5727_v31  ;;  %v6855_v31 = vld [vmem:[#allocation33_spill] sm:$0xff]  ;;  %v6856_v22 = vld [vmem:[#allocation34_spill] sm:$0xff] }
 0x2f1   :  { %4735 = vmatprep.subr.bf16.mxu0 %v5735_v34  ;;  %4766 = vmatprep.subr.bf16.mxu1 %v6805_v21  ;;  %v6854_v34 = vld [vmem:[#allocation32_spill] sm:$0xff] }
 0x2f3   :  { %1457 = vmatmul.mubr.f32.vlgmr.msra.gmra.mrb[10].mxu0 %v6054_v49  ;;  %3899 = vmatmul.mubr.f32.vlgmr.msra.gmra.mrb[14].mxu1 %v6054_v49 }
 0x2f4   :  { %4737 = vmatpush1.bf16.msra.mxu0 %v5737_v40  ;;  %4768 = vmatpush3.bf16.msra.mxu1 %v5740_v43  ;;  %v6851_v40 = vld [vmem:[#allocation29_spill] sm:$0xff]  ;;  %v6852_v43 = vld [vmem:[#allocation30_spill] sm:$0xff] }
 0x2f5   :  { %4739 = vmatprep.subr.bf16.mxu0 %v5744_v48  ;;  %4769 = vmatprep.subr.bf16.mxu1 %v6805_v21  ;;  %v6853_v48 = vld [vmem:[#allocation31_spill] sm:$0xff] }
 0x2f6   :  { %1618 = vmatprep.mubr.f32.mxu0 %v6807_v5  ;;  %3933 = vmatprep.mubr.msk.f32.mxu1 %vm5568_vm0, %v6807_v5 }
 0x2f8   :  { %4741 = vmatpush1.bf16.msra.mxu0 %v5747_v53  ;;  %4771 = vmatpush3.bf16.msra.mxu1 %v6849_v30  ;;  %v6857_v30 = vld [vmem:[#allocation35_spill] sm:$0xff]  ;;  %v6859_v53 = vld [vmem:[#allocation37_spill] sm:$0xff] }
 0x2f9   :  { %4743 = vmatprep.subr.bf16.mxu0 %v6850_v11  ;;  %4772 = vmatprep.subr.bf16.mxu1 %v6805_v21  ;;  %v6858_v11 = vld [vmem:[#allocation36_spill] sm:$0xff] }
 0x2fc   :  { %4745 = vmatpush1.bf16.msra.mxu0 %v6851_v40  ;;  %4774 = vmatpush3.bf16.msra.mxu1 %v6852_v43  ;;  %v6860_v43 = vld [vmem:[#allocation38_spill] sm:$0xff]  ;;  %v6862_v40 = vld [vmem:[#allocation40_spill] sm:$0xff] }
 0x2fd   :  { %4747 = vmatprep.subr.bf16.mxu0 %v6853_v48  ;;  %4775 = vmatprep.subr.bf16.mxu1 %v6805_v21  ;;  %v6861_v48 = vld [vmem:[#allocation39_spill] sm:$0xff] }
 0x300   :  { %4749 = vmatpush1.bf16.msra.mxu0 %v6854_v34  ;;  %4777 = vmatpush3.bf16.msra.mxu1 %v6855_v31  ;;  %v6863_v31 = vld [vmem:[#allocation41_spill] sm:$0xff]  ;;  %v6865_v34 = vld [vmem:[#allocation43_spill] sm:$0xff] }
 0x301   :  { %4751 = vmatprep.subr.bf16.mxu0 %v6856_v22  ;;  %4778 = vmatprep.subr.bf16.mxu1 %v6805_v21  ;;  %v6864_v22 = vld [vmem:[#allocation42_spill] sm:$0xff] }
 0x304   :  { %4753 = vmatpush1.bf16.msra.mxu0 %v6857_v30  ;;  %4780 = vmatpush3.bf16.msra.mxu1 %v6858_v11  ;;  %v6866_v11 = vld [vmem:[#allocation44_spill] sm:$0xff]  ;;  %v6868_v30 = vld [vmem:[#allocation46_spill] sm:$0xff] }
 0x305   :  { %4755 = vmatprep.subr.bf16.mxu0 %v6859_v53  ;;  %4781 = vmatprep.subr.bf16.mxu1 %v6805_v21  ;;  %v6867_v53 = vld [vmem:[#allocation45_spill] sm:$0xff] }
 0x308   :  { %4757 = vmatpush1.bf16.msra.mxu0 %v6860_v43  ;;  %4783 = vmatpush3.bf16.msra.mxu1 %v6861_v48 }
 0x309   :  { %4759 = vmatprep.subr.bf16.mxu0 %v6862_v40  ;;  %4784 = vmatprep.subr.bf16.mxu1 %v6805_v21 }
 0x30c   :  { %4761 = vmatpush1.bf16.msra.mxu0 %v6863_v31  ;;  %4786 = vmatpush3.bf16.msra.mxu1 %v6864_v22 }
 0x30d   :  { %4763 = vmatprep.subr.bf16.mxu0 %v6865_v34  ;;  %4787 = vmatprep.subr.bf16.mxu1 %v6805_v21  ;;  %v6870_v34 = vld [vmem:[#allocation48_spill] sm:$0xff] }
 0x310   :  { %4765 = vmatpush1.bf16.msra.mxu0 %v6866_v11  ;;  %4789 = vmatpush3.bf16.msra.mxu1 %v6867_v53 }
 0x311   :  { %4791 = vmatprep.subr.bf16.mxu0 %v6868_v30  ;;  %4822 = vmatprep.subr.bf16.mxu1 %v6805_v21 }
 0x386   :  { %v1224_v48 = vpop.f32.mrb[10].mxu1 }
 0x387   :  { %v3830_v40 = vpop.f32.mrb[11].mxu1  ;;  %v1225_v46 = vadd.f32 %v1224_v48, %v6034_v42 }
 0x3a6   :  { %v1294_v43 = vpop.f32.mrb[8].mxu0  ;;  %v1365_v14 = vpop.f32.mrb[12].mxu1 }
 0x3a7   :  { %v5355_v31 = vadd.f32 %v6869_v26, %v1294_v43  ;;  %v1296_v13 = vpop.f32.mrb[9].mxu0  ;;  %v3865_v22 = vpop.f32.mrb[13].mxu1  ;;  %v1366_v54 = vadd.f32 %v1365_v14, %v6871_v17 }
 0x3a8   :  { %v5357_v23 = vadd.f32 %v6870_v34, %v1296_v13 }
 0x3a9   :  { %v3275_v2 = vmul.f32 -1.442695, %v5355_v31 }
 0x3aa   :  { %v3276_v63 = vmul.f32 -1.442695, %v5357_v23 }
 0x3ab   :  { %5423 = vpow2.f32 %v3275_v2 }
 0x3ac   :  { %5425 = vpow2.f32 %v3276_v63 }
 0x3b5   :  { %v5424_v11 = vpop.eup %5423 }
 0x3b6   :  { %v1373_v53 = vadd.f32 1.0, %v5424_v11  ;;  %v5426_v30 = vpop.eup %5425  ;;  %v6872_v11 = vld [vmem:[#allocation51_spill] sm:$0xff] }
 0x3b7   :  { %v1380_v55 = vadd.f32 1.0, %v5426_v30 }
 0x3b8   :  { %5427 = vrcp.f32 %v1373_v53 }
 0x3b9   :  { %5429 = vrcp.f32 %v1380_v55 }
 0x3c2   :  { %v5428_v40 = vpop.eup %5427 }
 0x3c3   :  { %v1383_v6 = vmul.f32 %v5428_v40, %v1366_v54  ;;  %v5430_v17 = vpop.eup %5429 }
 0x3c4   :  { %v1386_v54 = vsub.f32 1.0, %v5430_v17 }
 0x3c5   :  { %v1384_v43 = vadd.f32 %v1383_v6, %v1225_v46  ;;  %v1388_v6 = vmul.f32 %v5430_v17, %v6045_v10 }
 0x3c6   :  { %v1458_v22 = vpop.f32.mrb[10].mxu0  ;;  %v1529_v31 = vpop.f32.mrb[14].mxu1 }
 0x3c7   :  { %5431 = vtanh.f32 %v1384_v43  ;;  %v1459_v2 = vadd.f32 %v1458_v22, %v5830_v1  ;;  %v1460_v13 = vpop.f32.mrb[11].mxu0  ;;  %v3900_v63 = vpop.f32.mrb[15].mxu1 }
 0x3c8   :  { %v1461_v23 = vadd.f32 %v1460_v13, %v6831_v32  ;;  %v1530_v63 = vadd.f32 %v1529_v31, %v6834_v3  ;;  %v6874_v31 = vld [vmem:[#allocation9_spill] sm:$0xff] }
 0x3c9   :  { %v1533_v53 = vadd.f32 %v1459_v2, %v6832_v4 }
 0x3ca   :  { %v1540_v14 = vadd.f32 %v1461_v23, %v6872_v11 }
 0x3cb   :  { %v3278_v30 = vmul.f32 -1.442695, %v1533_v53 }
 0x3cc   :  { %v3279_v48 = vmul.f32 -1.442695, %v1540_v14 }
 0x3cd   :  { %5433 = vpow2.f32 %v3278_v30 }
 0x3ce   :  { %5435 = vpow2.f32 %v3279_v48 }
 0x3d1   :  { %v5432_v55 = vpop.eup %5431 }
 0x3d2   :  { %v1387_v46 = vmul.f32 %v5432_v55, %v1386_v54 }
 0x3d4   :  { %v6176_v40 = vadd.f32 %v1388_v6, %v1387_v46  ;;  %v6875_v46 = vld [vmem:[#allocation10_spill] sm:$0xff]  ;;  %v6876_v6 = vld [vmem:[#allocation17_spill] sm:$0xff] }
 0x3d6   :  { %3277 = vst [vmem:[%s6626_s5 + $0x8] sm:$0xff] %v6176_v40 }
 0x3d7   :  { %v5434_v43 = vpop.eup %5433 }
 0x3d8   :  { %v1537_v22 = vadd.f32 1.0, %v5434_v43  ;;  %v5436_v2 = vpop.eup %5435  ;;  %v6877_v43 = vld [vmem:[#allocation11_spill] sm:$0xff] }
 0x3d9   :  { %v1544_v13 = vadd.f32 1.0, %v5436_v2  ;;  %v6879_v2 = vld [vmem:[#allocation19_spill] sm:$0xff] }
 0x3da   :  { %5437 = vrcp.f32 %v1537_v22  ;;  %v6878_v22 = vld [vmem:[#allocation12_spill] sm:$0xff] }
 0x3db   :  { %5439 = vrcp.f32 %v1544_v13  ;;  %v6880_v13 = vld [vmem:[#allocation13_spill] sm:$0xff] }
 0x3e4   :  { %v5438_v23 = vpop.eup %5437 }
 0x3e5   :  { %v1547_v53 = vmul.f32 %v5438_v23, %v1530_v63  ;;  %v5440_v10 = vpop.eup %5439  ;;  %v6881_v63 = vld [vmem:[#allocation15_spill] sm:$0xff]  ;;  %v6882_v23 = vld [vmem:[#allocation20_spill] sm:$0xff] }
 0x3e6   :  { %v1550_v30 = vsub.f32 1.0, %v5440_v10  ;;  %v1552_v54 = vmul.f32 %v5440_v10, %v6054_v49  ;;  %v6873_v49 = vld [vmem:[#allocation14_spill] sm:$0xff]  ;;  %v6885_v10 = vld [vmem:[#allocation21_spill] sm:$0xff] }
 0x3e7   :  { %v1548_v17 = vadd.f32 %v1547_v53, %v6835_v12  ;;  %v6883_v53 = vld [vmem:[#allocation16_spill] sm:$0xff] }
 0x3e9   :  { %5441 = vtanh.f32 %v1548_v17  ;;  %v6884_v17 = vld [vmem:[#allocation18_spill] sm:$0xff] }
 0x3f3   :  { %v5442_v14 = vpop.eup %5441 }
 0x3f4   :  { %v1551_v48 = vmul.f32 %v5442_v14, %v1550_v30  ;;  %v6886_v30 = vld [vmem:[#allocation22_spill] sm:$0xff]  ;;  %v6887_v14 = vld [vmem:[#allocation23_spill] sm:$0xff] }
 0x3f6   :  { %v6185_v55 = vadd.f32 %v1552_v54, %v1551_v48  ;;  %v6888_v48 = vld [vmem:[#allocation24_spill] sm:$0xff]  ;;  %v6889_v54 = vld [vmem:[#allocation25_spill] sm:$0xff] }
 0x3f8   :  { %1619 = vmatmul.mubr.f32.vlgmr.msra.gmra.mrb[12].mxu0 %v6185_v55  ;;  %3934 = vmatmul.mubr.f32.vlgmr.msra.gmra.mrb[16].mxu1 %v6185_v55 }
 0x3f9   :  { %4793 = vmatpush1.bf16.msra.mxu0 %v5855_v0  ;;  %4824 = vmatpush3.bf16.msra.mxu1 %v6836_v25 }
 0x3fa   :  { %4795 = vmatprep.subr.bf16.mxu0 %v6837_v60  ;;  %4825 = vmatprep.subr.bf16.mxu1 %v6805_v21 }
 0x3fb   :  { %1759 = vmatprep.mubr.f32.mxu0 %v6807_v5  ;;  %3968 = vmatprep.mubr.msk.f32.mxu1 %vm5568_vm0, %v6807_v5 }
 0x3fd   :  { %4797 = vmatpush1.bf16.msra.mxu0 %v6838_v29  ;;  %4827 = vmatpush3.bf16.msra.mxu1 %v6839_v62 }
 0x3fe   :  { %4799 = vmatprep.subr.bf16.mxu0 %v6840_v57  ;;  %4828 = vmatprep.subr.bf16.mxu1 %v6805_v21 }
 0x401   :  { %4801 = vmatpush1.bf16.msra.mxu0 %v6841_v33  ;;  %4830 = vmatpush3.bf16.msra.mxu1 %v6842_v58 }
 0x402   :  { %4803 = vmatprep.subr.bf16.mxu0 %v6843_v52  ;;  %4831 = vmatprep.subr.bf16.mxu1 %v6805_v21 }
 0x405   :  { %4805 = vmatpush1.bf16.msra.mxu0 %v6844_v35  ;;  %4833 = vmatpush3.bf16.msra.mxu1 %v6845_v8 }
 0x406   :  { %4807 = vmatprep.subr.bf16.mxu0 %v6846_v61  ;;  %4834 = vmatprep.subr.bf16.mxu1 %v6805_v21 }
 0x409   :  { %4809 = vmatpush1.bf16.msra.mxu0 %v5900_v38  ;;  %4836 = vmatpush3.bf16.msra.mxu1 %v5902_v47 }
 0x40a   :  { %4811 = vmatprep.subr.bf16.mxu0 %v6847_v44  ;;  %4837 = vmatprep.subr.bf16.mxu1 %v6805_v21 }
 0x40d   :  { %4813 = vmatpush1.bf16.msra.mxu0 %v6848_v16  ;;  %4839 = vmatpush3.bf16.msra.mxu1 %v5912_v51 }
 0x40e   :  { %4815 = vmatprep.subr.bf16.mxu0 %v5916_v7  ;;  %4840 = vmatprep.subr.bf16.mxu1 %v6805_v21 }
 0x411   :  { %4817 = vmatpush1.bf16.msra.mxu0 %v5920_v56  ;;  %4842 = vmatpush3.bf16.msra.mxu1 %v5922_v20 }
 0x412   :  { %4819 = vmatprep.subr.bf16.mxu0 %v5926_v15  ;;  %4843 = vmatprep.subr.bf16.mxu1 %v6805_v21 }
 0x415   :  { %4821 = vmatpush1.bf16.msra.mxu0 %v5930_v39  ;;  %4845 = vmatpush3.bf16.msra.mxu1 %v5932_v24 }
 0x416   :  { %4847 = vmatprep.subr.bf16.mxu0 %v5641_v9  ;;  %4878 = vmatprep.subr.bf16.mxu1 %v6805_v21 }
 0x418   :  { %1760 = vmatmul.mubr.f32.vlgmr.msra.gmra.mrb[12].mxu0 %v6176_v40  ;;  %3969 = vmatmul.mubr.f32.vlgmr.msra.gmra.mrb[18].mxu1 %v6176_v40 }
 0x419   :  { %4849 = vmatpush1.bf16.msra.mxu0 %v5646_v18  ;;  %4880 = vmatpush3.bf16.msra.mxu1 %v5666_v41 }
 0x41a   :  { %4851 = vmatprep.subr.bf16.mxu0 %v5649_v19  ;;  %4881 = vmatprep.subr.bf16.mxu1 %v6805_v21 }
 0x41b   :  { %1923 = vmatprep.mubr.f32.mxu0 %v6807_v5  ;;  %4003 = vmatprep.mubr.msk.f32.mxu1 %vm5568_vm0, %v6807_v5 }
 0x41d   :  { %4853 = vmatpush1.bf16.msra.mxu0 %v5653_v27  ;;  %4883 = vmatpush3.bf16.msra.mxu1 %v5676_v50 }
 0x41e   :  { %4855 = vmatprep.subr.bf16.mxu0 %v5657_v28  ;;  %4884 = vmatprep.subr.bf16.mxu1 %v6805_v21 }
 0x421   :  { %4857 = vmatpush1.bf16.msra.mxu0 %v5661_v36  ;;  %4886 = vmatpush3.bf16.msra.mxu1 %v5688_v59 }
 0x422   :  { %4859 = vmatprep.subr.bf16.mxu0 %v5664_v37  ;;  %4887 = vmatprep.subr.bf16.mxu1 %v6805_v21 }
 0x425   :  { %4861 = vmatpush1.bf16.msra.mxu0 %v5670_v45  ;;  %4889 = vmatpush3.bf16.msra.mxu1 %v6873_v49 }
 0x426   :  { %4863 = vmatprep.subr.bf16.mxu0 %v6874_v31  ;;  %4890 = vmatprep.subr.bf16.mxu1 %v6805_v21 }
 0x429   :  { %4865 = vmatpush1.bf16.msra.mxu0 %v6875_v46  ;;  %4892 = vmatpush3.bf16.msra.mxu1 %v6876_v6  ;;  %v6911_v46 = vld [vmem:[#allocation67_spill] sm:$0xff] }
 0x42a   :  { %4867 = vmatprep.subr.bf16.mxu0 %v6877_v43  ;;  %4893 = vmatprep.subr.bf16.mxu1 %v6805_v21 }
 0x42d   :  { %4869 = vmatpush1.bf16.msra.mxu0 %v6878_v22  ;;  %4895 = vmatpush3.bf16.msra.mxu1 %v6879_v2 }
 0x42e   :  { %4871 = vmatprep.subr.bf16.mxu0 %v6880_v13  ;;  %4896 = vmatprep.subr.bf16.mxu1 %v6805_v21 }
 0x431   :  { %4873 = vmatpush1.bf16.msra.mxu0 %v6881_v63  ;;  %4898 = vmatpush3.bf16.msra.mxu1 %v6882_v23  ;;  %v6897_v23 = vld [vmem:[#allocation33_spill] sm:$0xff]  ;;  %v6898_v63 = vld [vmem:[#allocation34_spill] sm:$0xff] }
 0x432   :  { %4875 = vmatprep.subr.bf16.mxu0 %v6883_v53  ;;  %4899 = vmatprep.subr.bf16.mxu1 %v6805_v21  ;;  %v6896_v53 = vld [vmem:[#allocation32_spill] sm:$0xff] }
 0x435   :  { %4877 = vmatpush1.bf16.msra.mxu0 %v6884_v17  ;;  %4901 = vmatpush3.bf16.msra.mxu1 %v6885_v10  ;;  %v6891_v10 = vld [vmem:[#allocation27_spill] sm:$0xff]  ;;  %v6892_v17 = vld [vmem:[#allocation28_spill] sm:$0xff] }
 0x436   :  { %4903 = vmatprep.subr.bf16.mxu0 %v6886_v30  ;;  %4934 = vmatprep.subr.bf16.mxu1 %v6805_v21  ;;  %v6890_v30 = vld [vmem:[#allocation26_spill] sm:$0xff] }
 0x438   :  { %1924 = vmatmul.mubr.f32.vlgmr.msra.gmra.mrb[14].mxu0 %v6185_v55  ;;  %4004 = vmatmul.mubr.f32.vlgmr.msra.gmra.mrb[20].mxu1 %v6185_v55 }
 0x439   :  { %4905 = vmatpush1.bf16.msra.mxu0 %v6887_v14  ;;  %4936 = vmatpush3.bf16.msra.mxu1 %v6888_v48  ;;  %v6893_v14 = vld [vmem:[#allocation29_spill] sm:$0xff]  ;;  %v6894_v48 = vld [vmem:[#allocation30_spill] sm:$0xff] }
 0x43a   :  { %4907 = vmatprep.subr.bf16.mxu0 %v6889_v54  ;;  %4937 = vmatprep.subr.bf16.mxu1 %v6805_v21  ;;  %v6895_v54 = vld [vmem:[#allocation31_spill] sm:$0xff] }
 0x43b   :  { %2085 = vmatprep.mubr.f32.mxu0 %v6807_v5  ;;  %4038 = vmatprep.mubr.msk.f32.mxu1 %vm5568_vm0, %v6807_v5 }
 0x43d   :  { %4909 = vmatpush1.bf16.msra.mxu0 %v6890_v30  ;;  %4939 = vmatpush3.bf16.msra.mxu1 %v6891_v10  ;;  %v6899_v10 = vld [vmem:[#allocation35_spill] sm:$0xff]  ;;  %v6901_v30 = vld [vmem:[#allocation37_spill] sm:$0xff] }
 0x43e   :  { %4911 = vmatprep.subr.bf16.mxu0 %v6892_v17  ;;  %4940 = vmatprep.subr.bf16.mxu1 %v6805_v21  ;;  %v6900_v17 = vld [vmem:[#allocation36_spill] sm:$0xff] }
 0x441   :  { %4913 = vmatpush1.bf16.msra.mxu0 %v6893_v14  ;;  %4942 = vmatpush3.bf16.msra.mxu1 %v6894_v48  ;;  %v6902_v48 = vld [vmem:[#allocation38_spill] sm:$0xff]  ;;  %v6904_v14 = vld [vmem:[#allocation40_spill] sm:$0xff] }
 0x442   :  { %4915 = vmatprep.subr.bf16.mxu0 %v6895_v54  ;;  %4943 = vmatprep.subr.bf16.mxu1 %v6805_v21  ;;  %v6903_v54 = vld [vmem:[#allocation39_spill] sm:$0xff] }
 0x445   :  { %4917 = vmatpush1.bf16.msra.mxu0 %v6896_v53  ;;  %4945 = vmatpush3.bf16.msra.mxu1 %v6897_v23  ;;  %v6905_v23 = vld [vmem:[#allocation41_spill] sm:$0xff]  ;;  %v6907_v53 = vld [vmem:[#allocation43_spill] sm:$0xff] }
 0x446   :  { %4919 = vmatprep.subr.bf16.mxu0 %v6898_v63  ;;  %4946 = vmatprep.subr.bf16.mxu1 %v6805_v21  ;;  %v6906_v63 = vld [vmem:[#allocation42_spill] sm:$0xff] }
 0x449   :  { %4921 = vmatpush1.bf16.msra.mxu0 %v6899_v10  ;;  %4948 = vmatpush3.bf16.msra.mxu1 %v6900_v17  ;;  %v6908_v17 = vld [vmem:[#allocation44_spill] sm:$0xff]  ;;  %v6910_v10 = vld [vmem:[#allocation46_spill] sm:$0xff] }
 0x44a   :  { %4923 = vmatprep.subr.bf16.mxu0 %v6901_v30  ;;  %4949 = vmatprep.subr.bf16.mxu1 %v6805_v21  ;;  %v6909_v30 = vld [vmem:[#allocation45_spill] sm:$0xff] }
 0x44d   :  { %4925 = vmatpush1.bf16.msra.mxu0 %v6902_v48  ;;  %4951 = vmatpush3.bf16.msra.mxu1 %v6903_v54 }
 0x44e   :  { %4927 = vmatprep.subr.bf16.mxu0 %v6904_v14  ;;  %4952 = vmatprep.subr.bf16.mxu1 %v6805_v21 }
 0x451   :  { %4929 = vmatpush1.bf16.msra.mxu0 %v6905_v23  ;;  %4954 = vmatpush3.bf16.msra.mxu1 %v6906_v63 }
 0x452   :  { %4931 = vmatprep.subr.bf16.mxu0 %v6907_v53  ;;  %4955 = vmatprep.subr.bf16.mxu1 %v6805_v21 }
 0x455   :  { %4933 = vmatpush1.bf16.msra.mxu0 %v6908_v17  ;;  %4957 = vmatpush3.bf16.msra.mxu1 %v6909_v30 }
 0x456   :  { %4959 = vmatprep.subr.bf16.mxu0 %v6910_v10  ;;  %4990 = vmatprep.subr.bf16.mxu1 %v6805_v21 }
 0x4cb   :  { %v1691_v54 = vpop.f32.mrb[16].mxu1 }
 0x4cc   :  { %v3935_v14 = vpop.f32.mrb[17].mxu1  ;;  %v1692_v49 = vadd.f32 %v1691_v54, %v6034_v42 }
 0x4eb   :  { %v1761_v48 = vpop.f32.mrb[12].mxu0  ;;  %v1832_v13 = vpop.f32.mrb[18].mxu1 }
 0x4ec   :  { %v5359_v23 = vadd.f32 %v6869_v26, %v1761_v48  ;;  %v1763_v2 = vpop.f32.mrb[13].mxu0  ;;  %v3970_v63 = vpop.f32.mrb[19].mxu1  ;;  %v1833_v31 = vadd.f32 %v1832_v13, %v6911_v46 }
 0x4ed   :  { %v5361_v53 = vadd.f32 %v6870_v34, %v1763_v2 }
 0x4ee   :  { %v3280_v22 = vmul.f32 -1.442695, %v5359_v23 }
 0x4ef   :  { %v3281_v43 = vmul.f32 -1.442695, %v5361_v53 }
 0x4f0   :  { %5443 = vpow2.f32 %v3280_v22 }
 0x4f1   :  { %5445 = vpow2.f32 %v3281_v43 }
 0x4fa   :  { %v5444_v17 = vpop.eup %5443 }
 0x4fb   :  { %v1840_v30 = vadd.f32 1.0, %v5444_v17  ;;  %v5446_v10 = vpop.eup %5445 }
 0x4fc   :  { %v1847_v6 = vadd.f32 1.0, %v5446_v10 }
 0x4fd   :  { %5447 = vrcp.f32 %v1840_v30 }
 0x4fe   :  { %5449 = vrcp.f32 %v1847_v6 }
 0x507   :  { %v5448_v14 = vpop.eup %5447 }
 0x508   :  { %v1850_v45 = vmul.f32 %v5448_v14, %v1833_v31  ;;  %v5450_v30 = vpop.eup %5449 }
 0x509   :  { %v1853_v31 = vsub.f32 1.0, %v5450_v30 }
 0x50a   :  { %v1851_v48 = vadd.f32 %v1850_v45, %v1692_v49  ;;  %v1855_v49 = vmul.f32 %v5450_v30, %v6176_v40 }
 0x50b   :  { %v1925_v63 = vpop.f32.mrb[14].mxu0  ;;  %v1996_v23 = vpop.f32.mrb[20].mxu1 }
 0x50c   :  { %5451 = vtanh.f32 %v1851_v48  ;;  %v1926_v22 = vadd.f32 %v1925_v63, %v5830_v1  ;;  %v1927_v2 = vpop.f32.mrb[15].mxu0  ;;  %v4005_v43 = vpop.f32.mrb[21].mxu1 }
 0x50d   :  { %v1928_v53 = vadd.f32 %v1927_v2, %v6831_v32  ;;  %v1997_v43 = vadd.f32 %v1996_v23, %v6834_v3  ;;  %v6913_v23 = vld [vmem:[#allocation14_spill] sm:$0xff] }
 0x50e   :  { %v2000_v17 = vadd.f32 %v1926_v22, %v6832_v4 }
 0x50f   :  { %v2007_v13 = vadd.f32 %v1928_v53, %v6872_v11 }
 0x510   :  { %v3283_v10 = vmul.f32 -1.442695, %v2000_v17 }
 0x511   :  { %v3284_v54 = vmul.f32 -1.442695, %v2007_v13 }
 0x512   :  { %5453 = vpow2.f32 %v3283_v10 }
 0x513   :  { %5455 = vpow2.f32 %v3284_v54 }
 0x516   :  { %v5452_v6 = vpop.eup %5451 }
 0x517   :  { %v1854_v45 = vmul.f32 %v5452_v6, %v1853_v31 }
 0x519   :  { %v6307_v14 = vadd.f32 %v1855_v49, %v1854_v45  ;;  %v6914_v45 = vld [vmem:[#allocation9_spill] sm:$0xff]  ;;  %v6915_v49 = vld [vmem:[#allocation10_spill] sm:$0xff] }
 0x51b   :  { %3282 = vst [vmem:[%s6626_s5 + $0x10] sm:$0xff] %v6307_v14 }
 0x51c   :  { %v5454_v48 = vpop.eup %5453 }
 0x51d   :  { %v2004_v63 = vadd.f32 1.0, %v5454_v48  ;;  %v5456_v22 = vpop.eup %5455  ;;  %v6916_v48 = vld [vmem:[#allocation17_spill] sm:$0xff] }
 0x51e   :  { %v2011_v2 = vadd.f32 1.0, %v5456_v22  ;;  %v6918_v22 = vld [vmem:[#allocation12_spill] sm:$0xff] }
 0x51f   :  { %5457 = vrcp.f32 %v2004_v63  ;;  %v6917_v63 = vld [vmem:[#allocation11_spill] sm:$0xff] }
 0x520   :  { %5459 = vrcp.f32 %v2011_v2  ;;  %v6919_v2 = vld [vmem:[#allocation19_spill] sm:$0xff] }
 0x529   :  { %v5458_v53 = vpop.eup %5457 }
 0x52a   :  { %v2014_v17 = vmul.f32 %v5458_v53, %v1997_v43  ;;  %v5460_v10 = vpop.eup %5459  ;;  %v6920_v43 = vld [vmem:[#allocation13_spill] sm:$0xff]  ;;  %v6921_v53 = vld [vmem:[#allocation15_spill] sm:$0xff] }
 0x52b   :  { %v2017_v13 = vsub.f32 1.0, %v5460_v10  ;;  %v2019_v31 = vmul.f32 %v5460_v10, %v6185_v55  ;;  %v6912_v55 = vld [vmem:[#allocation8_spill] sm:$0xff]  ;;  %v6924_v10 = vld [vmem:[#allocation18_spill] sm:$0xff] }
 0x52c   :  { %v2015_v40 = vadd.f32 %v2014_v17, %v6835_v12  ;;  %v6922_v17 = vld [vmem:[#allocation20_spill] sm:$0xff] }
 0x52e   :  { %5461 = vtanh.f32 %v2015_v40  ;;  %v6923_v40 = vld [vmem:[#allocation16_spill] sm:$0xff] }
 0x538   :  { %v5462_v30 = vpop.eup %5461 }
 0x539   :  { %v2018_v54 = vmul.f32 %v5462_v30, %v2017_v13  ;;  %v6925_v13 = vld [vmem:[#allocation21_spill] sm:$0xff]  ;;  %v6926_v30 = vld [vmem:[#allocation22_spill] sm:$0xff] }
 0x53b   :  { %v6316_v6 = vadd.f32 %v2019_v31, %v2018_v54  ;;  %v6927_v54 = vld [vmem:[#allocation23_spill] sm:$0xff]  ;;  %v6928_v31 = vld [vmem:[#allocation24_spill] sm:$0xff] }
 0x53d   :  { %2086 = vmatmul.mubr.f32.vlgmr.msra.gmra.mrb[16].mxu0 %v6316_v6  ;;  %4039 = vmatmul.mubr.f32.vlgmr.msra.gmra.mrb[22].mxu1 %v6316_v6 }
 0x53e   :  { %4961 = vmatpush1.bf16.msra.mxu0 %v5855_v0  ;;  %4992 = vmatpush3.bf16.msra.mxu1 %v6836_v25 }
 0x53f   :  { %4963 = vmatprep.subr.bf16.mxu0 %v6837_v60  ;;  %4993 = vmatprep.subr.bf16.mxu1 %v6805_v21 }
 0x540   :  { %2226 = vmatprep.mubr.f32.mxu0 %v6807_v5  ;;  %4073 = vmatprep.mubr.msk.f32.mxu1 %vm5568_vm0, %v6807_v5 }
 0x542   :  { %4965 = vmatpush1.bf16.msra.mxu0 %v6838_v29  ;;  %4995 = vmatpush3.bf16.msra.mxu1 %v6839_v62 }
 0x543   :  { %4967 = vmatprep.subr.bf16.mxu0 %v6840_v57  ;;  %4996 = vmatprep.subr.bf16.mxu1 %v6805_v21 }
 0x546   :  { %4969 = vmatpush1.bf16.msra.mxu0 %v6841_v33  ;;  %4998 = vmatpush3.bf16.msra.mxu1 %v6842_v58 }
 0x547   :  { %4971 = vmatprep.subr.bf16.mxu0 %v6843_v52  ;;  %4999 = vmatprep.subr.bf16.mxu1 %v6805_v21 }
 0x54a   :  { %4973 = vmatpush1.bf16.msra.mxu0 %v6844_v35  ;;  %5001 = vmatpush3.bf16.msra.mxu1 %v6845_v8 }
 0x54b   :  { %4975 = vmatprep.subr.bf16.mxu0 %v6846_v61  ;;  %5002 = vmatprep.subr.bf16.mxu1 %v6805_v21 }
 0x54e   :  { %4977 = vmatpush1.bf16.msra.mxu0 %v5900_v38  ;;  %5004 = vmatpush3.bf16.msra.mxu1 %v5902_v47 }
 0x54f   :  { %4979 = vmatprep.subr.bf16.mxu0 %v6847_v44  ;;  %5005 = vmatprep.subr.bf16.mxu1 %v6805_v21 }
 0x552   :  { %4981 = vmatpush1.bf16.msra.mxu0 %v6848_v16  ;;  %5007 = vmatpush3.bf16.msra.mxu1 %v5912_v51 }
 0x553   :  { %4983 = vmatprep.subr.bf16.mxu0 %v5916_v7  ;;  %5008 = vmatprep.subr.bf16.mxu1 %v6805_v21 }
 0x556   :  { %4985 = vmatpush1.bf16.msra.mxu0 %v5920_v56  ;;  %5010 = vmatpush3.bf16.msra.mxu1 %v5922_v20 }
 0x557   :  { %4987 = vmatprep.subr.bf16.mxu0 %v5926_v15  ;;  %5011 = vmatprep.subr.bf16.mxu1 %v6805_v21 }
 0x55a   :  { %4989 = vmatpush1.bf16.msra.mxu0 %v5930_v39  ;;  %5013 = vmatpush3.bf16.msra.mxu1 %v5932_v24 }
 0x55b   :  { %5015 = vmatprep.subr.bf16.mxu0 %v5641_v9  ;;  %5046 = vmatprep.subr.bf16.mxu1 %v6805_v21 }
 0x55d   :  { %2227 = vmatmul.mubr.f32.vlgmr.msra.gmra.mrb[16].mxu0 %v6307_v14  ;;  %4074 = vmatmul.mubr.f32.vlgmr.msra.gmra.mrb[24].mxu1 %v6307_v14 }
 0x55e   :  { %5017 = vmatpush1.bf16.msra.mxu0 %v5646_v18  ;;  %5048 = vmatpush3.bf16.msra.mxu1 %v5666_v41 }
 0x55f   :  { %5019 = vmatprep.subr.bf16.mxu0 %v5649_v19  ;;  %5049 = vmatprep.subr.bf16.mxu1 %v6805_v21 }
 0x560   :  { %2390 = vmatprep.mubr.f32.mxu0 %v6807_v5  ;;  %4108 = vmatprep.mubr.msk.f32.mxu1 %vm5568_vm0, %v6807_v5 }
 0x562   :  { %5021 = vmatpush1.bf16.msra.mxu0 %v5653_v27  ;;  %5051 = vmatpush3.bf16.msra.mxu1 %v5676_v50 }
 0x563   :  { %5023 = vmatprep.subr.bf16.mxu0 %v5657_v28  ;;  %5052 = vmatprep.subr.bf16.mxu1 %v6805_v21 }
 0x566   :  { %5025 = vmatpush1.bf16.msra.mxu0 %v5661_v36  ;;  %5054 = vmatpush3.bf16.msra.mxu1 %v5688_v59 }
 0x567   :  { %5027 = vmatprep.subr.bf16.mxu0 %v5664_v37  ;;  %5055 = vmatprep.subr.bf16.mxu1 %v6805_v21 }
 0x56a   :  { %5029 = vmatpush1.bf16.msra.mxu0 %v6912_v55  ;;  %5057 = vmatpush3.bf16.msra.mxu1 %v6913_v23 }
 0x56b   :  { %5031 = vmatprep.subr.bf16.mxu0 %v6914_v45  ;;  %5058 = vmatprep.subr.bf16.mxu1 %v6805_v21 }
 0x56e   :  { %5033 = vmatpush1.bf16.msra.mxu0 %v6915_v49  ;;  %5060 = vmatpush3.bf16.msra.mxu1 %v6916_v48 }
 0x56f   :  { %5035 = vmatprep.subr.bf16.mxu0 %v6917_v63  ;;  %5061 = vmatprep.subr.bf16.mxu1 %v6805_v21 }
 0x572   :  { %5037 = vmatpush1.bf16.msra.mxu0 %v6918_v22  ;;  %5063 = vmatpush3.bf16.msra.mxu1 %v6919_v2 }
 0x573   :  { %5039 = vmatprep.subr.bf16.mxu0 %v6920_v43  ;;  %5064 = vmatprep.subr.bf16.mxu1 %v6805_v21  ;;  %v6938_v43 = vld [vmem:[#allocation34_spill] sm:$0xff] }
 0x576   :  { %5041 = vmatpush1.bf16.msra.mxu0 %v6921_v53  ;;  %5066 = vmatpush3.bf16.msra.mxu1 %v6922_v17  ;;  %v6929_v17 = vld [vmem:[#allocation25_spill] sm:$0xff] }
 0x577   :  { %5043 = vmatprep.subr.bf16.mxu0 %v6923_v40  ;;  %5067 = vmatprep.subr.bf16.mxu1 %v6805_v21  ;;  %v6936_v40 = vld [vmem:[#allocation32_spill] sm:$0xff]  ;;  %v6937_v53 = vld [vmem:[#allocation33_spill] sm:$0xff] }
 0x57a   :  { %5045 = vmatpush1.bf16.msra.mxu0 %v6924_v10  ;;  %5069 = vmatpush3.bf16.msra.mxu1 %v6925_v13  ;;  %v6931_v13 = vld [vmem:[#allocation27_spill] sm:$0xff]  ;;  %v6932_v10 = vld [vmem:[#allocation28_spill] sm:$0xff] }
 0x57b   :  { %5071 = vmatprep.subr.bf16.mxu0 %v6926_v30  ;;  %5102 = vmatprep.subr.bf16.mxu1 %v6805_v21  ;;  %v6930_v30 = vld [vmem:[#allocation26_spill] sm:$0xff] }
 0x57d   :  { %2391 = vmatmul.mubr.f32.vlgmr.msra.gmra.mrb[18].mxu0 %v6316_v6  ;;  %4109 = vmatmul.mubr.f32.vlgmr.msra.gmra.mrb[26].mxu1 %v6316_v6 }
 0x57e   :  { %5073 = vmatpush1.bf16.msra.mxu0 %v6927_v54  ;;  %5104 = vmatpush3.bf16.msra.mxu1 %v6928_v31  ;;  %v6933_v54 = vld [vmem:[#allocation29_spill] sm:$0xff]  ;;  %v6934_v31 = vld [vmem:[#allocation30_spill] sm:$0xff] }
 0x57f   :  { %5075 = vmatprep.subr.bf16.mxu0 %v6929_v17  ;;  %5105 = vmatprep.subr.bf16.mxu1 %v6805_v21  ;;  %v6935_v17 = vld [vmem:[#allocation31_spill] sm:$0xff] }
 0x580   :  { %2552 = vmatprep.mubr.f32.mxu0 %v6807_v5  ;;  %4143 = vmatprep.mubr.msk.f32.mxu1 %vm5568_vm0, %v6807_v5 }
 0x582   :  { %5077 = vmatpush1.bf16.msra.mxu0 %v6930_v30  ;;  %5107 = vmatpush3.bf16.msra.mxu1 %v6931_v13  ;;  %v6939_v13 = vld [vmem:[#allocation35_spill] sm:$0xff]  ;;  %v6941_v30 = vld [vmem:[#allocation37_spill] sm:$0xff] }
 0x583   :  { %5079 = vmatprep.subr.bf16.mxu0 %v6932_v10  ;;  %5108 = vmatprep.subr.bf16.mxu1 %v6805_v21  ;;  %v6940_v10 = vld [vmem:[#allocation36_spill] sm:$0xff] }
 0x586   :  { %5081 = vmatpush1.bf16.msra.mxu0 %v6933_v54  ;;  %5110 = vmatpush3.bf16.msra.mxu1 %v6934_v31  ;;  %v6942_v31 = vld [vmem:[#allocation38_spill] sm:$0xff]  ;;  %v6944_v54 = vld [vmem:[#allocation40_spill] sm:$0xff] }
 0x587   :  { %5083 = vmatprep.subr.bf16.mxu0 %v6935_v17  ;;  %5111 = vmatprep.subr.bf16.mxu1 %v6805_v21  ;;  %v6943_v17 = vld [vmem:[#allocation39_spill] sm:$0xff] }
 0x58a   :  { %5085 = vmatpush1.bf16.msra.mxu0 %v6936_v40  ;;  %5113 = vmatpush3.bf16.msra.mxu1 %v6937_v53  ;;  %v6945_v53 = vld [vmem:[#allocation41_spill] sm:$0xff]  ;;  %v6947_v40 = vld [vmem:[#allocation43_spill] sm:$0xff] }
 0x58b   :  { %5087 = vmatprep.subr.bf16.mxu0 %v6938_v43  ;;  %5114 = vmatprep.subr.bf16.mxu1 %v6805_v21  ;;  %v6946_v43 = vld [vmem:[#allocation42_spill] sm:$0xff] }
 0x58e   :  { %5089 = vmatpush1.bf16.msra.mxu0 %v6939_v13  ;;  %5116 = vmatpush3.bf16.msra.mxu1 %v6940_v10  ;;  %v6948_v10 = vld [vmem:[#allocation44_spill] sm:$0xff]  ;;  %v6950_v13 = vld [vmem:[#allocation46_spill] sm:$0xff] }
 0x58f   :  { %5091 = vmatprep.subr.bf16.mxu0 %v6941_v30  ;;  %5117 = vmatprep.subr.bf16.mxu1 %v6805_v21  ;;  %v6949_v30 = vld [vmem:[#allocation45_spill] sm:$0xff] }
 0x592   :  { %5093 = vmatpush1.bf16.msra.mxu0 %v6942_v31  ;;  %5119 = vmatpush3.bf16.msra.mxu1 %v6943_v17 }
 0x593   :  { %5095 = vmatprep.subr.bf16.mxu0 %v6944_v54  ;;  %5120 = vmatprep.subr.bf16.mxu1 %v6805_v21 }
 0x596   :  { %5097 = vmatpush1.bf16.msra.mxu0 %v6945_v53  ;;  %5122 = vmatpush3.bf16.msra.mxu1 %v6946_v43 }
 0x597   :  { %5099 = vmatprep.subr.bf16.mxu0 %v6947_v40  ;;  %5123 = vmatprep.subr.bf16.mxu1 %v6805_v21 }
 0x59a   :  { %5101 = vmatpush1.bf16.msra.mxu0 %v6948_v10  ;;  %5125 = vmatpush3.bf16.msra.mxu1 %v6949_v30 }
 0x59b   :  { %5127 = vmatprep.subr.bf16.mxu0 %v6950_v13  ;;  %5158 = vmatprep.subr.bf16.mxu1 %v6805_v21 }
 0x610   :  { %v2158_v17 = vpop.f32.mrb[22].mxu1 }
 0x611   :  { %v4040_v54 = vpop.f32.mrb[23].mxu1  ;;  %v2159_v23 = vadd.f32 %v2158_v17, %v6034_v42 }
 0x630   :  { %v2228_v31 = vpop.f32.mrb[16].mxu0  ;;  %v2299_v2 = vpop.f32.mrb[24].mxu1 }
 0x631   :  { %v5363_v53 = vadd.f32 %v6869_v26, %v2228_v31  ;;  %v2230_v22 = vpop.f32.mrb[17].mxu0  ;;  %v4075_v43 = vpop.f32.mrb[25].mxu1  ;;  %v2300_v45 = vadd.f32 %v2299_v2, %v6911_v46 }
 0x632   :  { %v5365_v40 = vadd.f32 %v6870_v34, %v2230_v22 }
 0x633   :  { %v3285_v63 = vmul.f32 -1.442695, %v5363_v53 }
 0x634   :  { %v3286_v48 = vmul.f32 -1.442695, %v5365_v40 }
 0x635   :  { %5463 = vpow2.f32 %v3285_v63 }
 0x636   :  { %5465 = vpow2.f32 %v3286_v48 }
 0x63f   :  { %v5464_v10 = vpop.eup %5463 }
 0x640   :  { %v2307_v30 = vadd.f32 1.0, %v5464_v10  ;;  %v5466_v13 = vpop.eup %5465 }
 0x641   :  { %v2314_v49 = vadd.f32 1.0, %v5466_v13 }
 0x642   :  { %5467 = vrcp.f32 %v2307_v30 }
 0x643   :  { %5469 = vrcp.f32 %v2314_v49 }
 0x64c   :  { %v5468_v54 = vpop.eup %5467 }
 0x64d   :  { %v2317_v55 = vmul.f32 %v5468_v54, %v2300_v45  ;;  %v5470_v30 = vpop.eup %5469 }
 0x64e   :  { %v2320_v45 = vsub.f32 1.0, %v5470_v30 }
 0x64f   :  { %v2318_v31 = vadd.f32 %v2317_v55, %v2159_v23  ;;  %v2322_v23 = vmul.f32 %v5470_v30, %v6307_v14 }
 0x650   :  { %v2392_v43 = vpop.f32.mrb[18].mxu0  ;;  %v2463_v53 = vpop.f32.mrb[26].mxu1 }
 0x651   :  { %5471 = vtanh.f32 %v2318_v31  ;;  %v2393_v63 = vadd.f32 %v2392_v43, %v5830_v1  ;;  %v2394_v22 = vpop.f32.mrb[19].mxu0  ;;  %v4110_v48 = vpop.f32.mrb[27].mxu1 }
 0x652   :  { %v2395_v40 = vadd.f32 %v2394_v22, %v6831_v32  ;;  %v2464_v48 = vadd.f32 %v2463_v53, %v6834_v3  ;;  %v6962_v53 = vld [vmem:[#allocation16_spill] sm:$0xff] }
 0x653   :  { %v2467_v10 = vadd.f32 %v2393_v63, %v6832_v4 }
 0x654   :  { %v2474_v2 = vadd.f32 %v2395_v40, %v6872_v11 }
 0x655   :  { %v3288_v13 = vmul.f32 -1.442695, %v2467_v10 }
 0x656   :  { %v3289_v17 = vmul.f32 -1.442695, %v2474_v2 }
 0x657   :  { %5473 = vpow2.f32 %v3288_v13 }
 0x658   :  { %5475 = vpow2.f32 %v3289_v17 }
 0x65b   :  { %v5472_v49 = vpop.eup %5471 }
 0x65c   :  { %v2321_v55 = vmul.f32 %v5472_v49, %v2320_v45 }
 0x65e   :  { %v6438_v54 = vadd.f32 %v2322_v23, %v2321_v55  ;;  %v6963_v55 = vld [vmem:[#allocation18_spill] sm:$0xff]  ;;  %v6964_v23 = vld [vmem:[#allocation21_spill] sm:$0xff] }
 0x660   :  { %3287 = vst [vmem:[%s6626_s5 + $0x18] sm:$0xff] %v6438_v54 }
 0x661   :  { %v5474_v31 = vpop.eup %5473 }
 0x662   :  { %v2471_v43 = vadd.f32 1.0, %v5474_v31  ;;  %v5476_v63 = vpop.eup %5475  ;;  %v6965_v31 = vld [vmem:[#allocation22_spill] sm:$0xff] }
 0x663   :  { %v2478_v22 = vadd.f32 1.0, %v5476_v63  ;;  %v6967_v63 = vld [vmem:[#allocation24_spill] sm:$0xff] }
 0x664   :  { %5477 = vrcp.f32 %v2471_v43  ;;  %v6966_v43 = vld [vmem:[#allocation23_spill] sm:$0xff] }
 0x665   :  { %5479 = vrcp.f32 %v2478_v22  ;;  %v6968_v22 = vld [vmem:[#allocation25_spill] sm:$0xff] }
 0x66e   :  { %v5478_v40 = vpop.eup %5477 }
 0x66f   :  { %v2481_v10 = vmul.f32 %v5478_v40, %v2464_v48  ;;  %v5480_v13 = vpop.eup %5479  ;;  %v6969_v48 = vld [vmem:[#allocation26_spill] sm:$0xff]  ;;  %v6970_v40 = vld [vmem:[#allocation27_spill] sm:$0xff] }
 0x670   :  { %v2484_v2 = vsub.f32 1.0, %v5480_v13  ;;  %v2486_v45 = vmul.f32 %v5480_v13, %v6316_v6  ;;  %v6961_v6 = vld [vmem:[#allocation20_spill] sm:$0xff]  ;;  %v6973_v13 = vld [vmem:[#allocation30_spill] sm:$0xff] }
 0x671   :  { %v2482_v14 = vadd.f32 %v2481_v10, %v6835_v12  ;;  %v6971_v10 = vld [vmem:[#allocation28_spill] sm:$0xff] }
 0x673   :  { %5481 = vtanh.f32 %v2482_v14  ;;  %v6972_v14 = vld [vmem:[#allocation29_spill] sm:$0xff] }
 0x67d   :  { %v5482_v30 = vpop.eup %5481 }
 0x67e   :  { %v2485_v17 = vmul.f32 %v5482_v30, %v2484_v2  ;;  %v6974_v2 = vld [vmem:[#allocation31_spill] sm:$0xff]  ;;  %v6975_v30 = vld [vmem:[#allocation32_spill] sm:$0xff] }
 0x680   :  { %v6447_v49 = vadd.f32 %v2486_v45, %v2485_v17  ;;  %v6976_v17 = vld [vmem:[#allocation33_spill] sm:$0xff]  ;;  %v6977_v45 = vld [vmem:[#allocation34_spill] sm:$0xff] }
 0x682   :  { %2553 = vmatmul.mubr.f32.vlgmr.msra.gmra.mrb[20].mxu0 %v6447_v49  ;;  %4144 = vmatmul.mubr.f32.vlgmr.msra.gmra.mrb[28].mxu1 %v6447_v49 }
 0x683   :  { %5129 = vmatpush1.bf16.msra.mxu0 %v5855_v0  ;;  %5160 = vmatpush3.bf16.msra.mxu1 %v6836_v25 }
 0x684   :  { %5131 = vmatprep.subr.bf16.mxu0 %v6837_v60  ;;  %5161 = vmatprep.subr.bf16.mxu1 %v6805_v21 }
 0x685   :  { %2693 = vmatprep.mubr.f32.mxu0 %v6807_v5  ;;  %4178 = vmatprep.mubr.msk.f32.mxu1 %vm5568_vm0, %v6807_v5 }
 0x687   :  { %5133 = vmatpush1.bf16.msra.mxu0 %v6838_v29  ;;  %5163 = vmatpush3.bf16.msra.mxu1 %v6839_v62 }
 0x688   :  { %5135 = vmatprep.subr.bf16.mxu0 %v6840_v57  ;;  %5164 = vmatprep.subr.bf16.mxu1 %v6805_v21 }
 0x68b   :  { %5137 = vmatpush1.bf16.msra.mxu0 %v6841_v33  ;;  %5166 = vmatpush3.bf16.msra.mxu1 %v6842_v58 }
 0x68c   :  { %5139 = vmatprep.subr.bf16.mxu0 %v6843_v52  ;;  %5167 = vmatprep.subr.bf16.mxu1 %v6805_v21 }
 0x68f   :  { %5141 = vmatpush1.bf16.msra.mxu0 %v6844_v35  ;;  %5169 = vmatpush3.bf16.msra.mxu1 %v6845_v8 }
 0x690   :  { %5143 = vmatprep.subr.bf16.mxu0 %v6846_v61  ;;  %5170 = vmatprep.subr.bf16.mxu1 %v6805_v21 }
 0x693   :  { %5145 = vmatpush1.bf16.msra.mxu0 %v5900_v38  ;;  %5172 = vmatpush3.bf16.msra.mxu1 %v5902_v47 }
 0x694   :  { %5147 = vmatprep.subr.bf16.mxu0 %v6847_v44  ;;  %5173 = vmatprep.subr.bf16.mxu1 %v6805_v21 }
 0x697   :  { %5149 = vmatpush1.bf16.msra.mxu0 %v6848_v16  ;;  %5175 = vmatpush3.bf16.msra.mxu1 %v5912_v51 }
 0x698   :  { %5151 = vmatprep.subr.bf16.mxu0 %v5916_v7  ;;  %5176 = vmatprep.subr.bf16.mxu1 %v6805_v21 }
 0x69b   :  { %5153 = vmatpush1.bf16.msra.mxu0 %v5920_v56  ;;  %5178 = vmatpush3.bf16.msra.mxu1 %v5922_v20 }
 0x69c   :  { %5155 = vmatprep.subr.bf16.mxu0 %v5926_v15  ;;  %5179 = vmatprep.subr.bf16.mxu1 %v6805_v21 }
 0x69f   :  { %5157 = vmatpush1.bf16.msra.mxu0 %v5930_v39  ;;  %5181 = vmatpush3.bf16.msra.mxu1 %v5932_v24 }
 0x6a0   :  { %5183 = vmatprep.subr.bf16.mxu0 %v5641_v9  ;;  %5214 = vmatprep.subr.bf16.mxu1 %v6805_v21  ;;  %v6951_v9 = vld [vmem:[#allocation8_spill] sm:$0xff] }
 0x6a2   :  { %2694 = vmatmul.mubr.f32.vlgmr.msra.gmra.mrb[20].mxu0 %v6438_v54  ;;  %4179 = vmatmul.mubr.f32.vlgmr.msra.gmra.mrb[30].mxu1 %v6438_v54 }
 0x6a3   :  { %5185 = vmatpush1.bf16.msra.mxu0 %v5646_v18  ;;  %5216 = vmatpush3.bf16.msra.mxu1 %v5666_v41  ;;  %v6952_v18 = vld [vmem:[#allocation14_spill] sm:$0xff]  ;;  %v6956_v41 = vld [vmem:[#allocation11_spill] sm:$0xff] }
 0x6a4   :  { %5187 = vmatprep.subr.bf16.mxu0 %v5649_v19  ;;  %5217 = vmatprep.subr.bf16.mxu1 %v6805_v21  ;;  %v6953_v19 = vld [vmem:[#allocation9_spill] sm:$0xff] }
 0x6a5   :  { %2857 = vmatprep.mubr.f32.mxu0 %v6807_v5  ;;  %4213 = vmatprep.mubr.msk.f32.mxu1 %vm5568_vm0, %v6807_v5 }
 0x6a7   :  { %5189 = vmatpush1.bf16.msra.mxu0 %v5653_v27  ;;  %5219 = vmatpush3.bf16.msra.mxu1 %v5676_v50  ;;  %v6954_v27 = vld [vmem:[#allocation10_spill] sm:$0xff]  ;;  %v6959_v50 = vld [vmem:[#allocation13_spill] sm:$0xff] }
 0x6a8   :  { %5191 = vmatprep.subr.bf16.mxu0 %v5657_v28  ;;  %5220 = vmatprep.subr.bf16.mxu1 %v6805_v21  ;;  %v6955_v28 = vld [vmem:[#allocation17_spill] sm:$0xff] }
 0x6ab   :  { %5193 = vmatpush1.bf16.msra.mxu0 %v5661_v36  ;;  %5222 = vmatpush3.bf16.msra.mxu1 %v5688_v59  ;;  %v6957_v36 = vld [vmem:[#allocation12_spill] sm:$0xff]  ;;  %v6960_v59 = vld [vmem:[#allocation15_spill] sm:$0xff] }
 0x6ac   :  { %5195 = vmatprep.subr.bf16.mxu0 %v5664_v37  ;;  %5223 = vmatprep.subr.bf16.mxu1 %v6805_v21  ;;  %v6958_v37 = vld [vmem:[#allocation19_spill] sm:$0xff] }
 0x6af   :  { %5197 = vmatpush1.bf16.msra.mxu0 %v6951_v9  ;;  %5225 = vmatpush3.bf16.msra.mxu1 %v6952_v18  ;;  %v6978_v9 = vld [vmem:[#allocation35_spill] sm:$0xff]  ;;  %v6979_v18 = vld [vmem:[#allocation36_spill] sm:$0xff] }
 0x6b0   :  { %5199 = vmatprep.subr.bf16.mxu0 %v6953_v19  ;;  %5226 = vmatprep.subr.bf16.mxu1 %v6805_v21  ;;  %v6980_v19 = vld [vmem:[#allocation37_spill] sm:$0xff] }
 0x6b3   :  { %5201 = vmatpush1.bf16.msra.mxu0 %v6954_v27  ;;  %5228 = vmatpush3.bf16.msra.mxu1 %v6955_v28  ;;  %v6981_v27 = vld [vmem:[#allocation38_spill] sm:$0xff]  ;;  %v6982_v28 = vld [vmem:[#allocation39_spill] sm:$0xff] }
 0x6b4   :  { %5203 = vmatprep.subr.bf16.mxu0 %v6956_v41  ;;  %5229 = vmatprep.subr.bf16.mxu1 %v6805_v21  ;;  %v6983_v41 = vld [vmem:[#allocation40_spill] sm:$0xff] }
 0x6b7   :  { %5205 = vmatpush1.bf16.msra.mxu0 %v6957_v36  ;;  %5231 = vmatpush3.bf16.msra.mxu1 %v6958_v37  ;;  %v6984_v36 = vld [vmem:[#allocation41_spill] sm:$0xff]  ;;  %v6985_v37 = vld [vmem:[#allocation42_spill] sm:$0xff] }
 0x6b8   :  { %5207 = vmatprep.subr.bf16.mxu0 %v6959_v50  ;;  %5232 = vmatprep.subr.bf16.mxu1 %v6805_v21  ;;  %v6986_v50 = vld [vmem:[#allocation43_spill] sm:$0xff] }
 0x6bb   :  { %5209 = vmatpush1.bf16.msra.mxu0 %v6960_v59  ;;  %5234 = vmatpush3.bf16.msra.mxu1 %v6961_v6  ;;  %v6987_v59 = vld [vmem:[#allocation44_spill] sm:$0xff]  ;;  %v6988_v6 = vld [vmem:[#allocation45_spill] sm:$0xff] }
 0x6bc   :  { %5211 = vmatprep.subr.bf16.mxu0 %v6962_v53  ;;  %5235 = vmatprep.subr.bf16.mxu1 %v6805_v21  ;;  %v6989_v53 = vld [vmem:[#allocation46_spill] sm:$0xff] }
 0x6bf   :  { %5213 = vmatpush1.bf16.msra.mxu0 %v6963_v55  ;;  %5237 = vmatpush3.bf16.msra.mxu1 %v6964_v23 }
 0x6c0   :  { %5239 = vmatprep.subr.bf16.mxu0 %v6965_v31  ;;  %5270 = vmatprep.subr.bf16.mxu1 %v6805_v21 }
 0x6c2   :  { %2858 = vmatmul.mubr.f32.vlgmr.msra.gmra.mrb[22].mxu0 %v6447_v49  ;;  %4214 = vmatmul.mubr.f32.vlgmr.msra.gmra.mrb[32].mxu1 %v6447_v49 }
 0x6c3   :  { %5241 = vmatpush1.bf16.msra.mxu0 %v6966_v43  ;;  %5272 = vmatpush3.bf16.msra.mxu1 %v6967_v63 }
 0x6c4   :  { %5243 = vmatprep.subr.bf16.mxu0 %v6968_v22  ;;  %5273 = vmatprep.subr.bf16.mxu1 %v6805_v21 }
 0x6c5   :  { %3019 = vmatprep.mubr.f32.mxu0 %v6807_v5  ;;  %4248 = vmatprep.mubr.msk.f32.mxu1 %vm5568_vm0, %v6807_v5 }
 0x6c7   :  { %5245 = vmatpush1.bf16.msra.mxu0 %v6969_v48  ;;  %5275 = vmatpush3.bf16.msra.mxu1 %v6970_v40 }
 0x6c8   :  { %5247 = vmatprep.subr.bf16.mxu0 %v6971_v10  ;;  %5276 = vmatprep.subr.bf16.mxu1 %v6805_v21 }
 0x6cb   :  { %5249 = vmatpush1.bf16.msra.mxu0 %v6972_v14  ;;  %5278 = vmatpush3.bf16.msra.mxu1 %v6973_v13 }
 0x6cc   :  { %5251 = vmatprep.subr.bf16.mxu0 %v6974_v2  ;;  %5279 = vmatprep.subr.bf16.mxu1 %v6805_v21 }
 0x6cf   :  { %5253 = vmatpush1.bf16.msra.mxu0 %v6975_v30  ;;  %5281 = vmatpush3.bf16.msra.mxu1 %v6976_v17 }
 0x6d0   :  { %5255 = vmatprep.subr.bf16.mxu0 %v6977_v45  ;;  %5282 = vmatprep.subr.bf16.mxu1 %v6805_v21 }
 0x6d3   :  { %5257 = vmatpush1.bf16.msra.mxu0 %v6978_v9  ;;  %5284 = vmatpush3.bf16.msra.mxu1 %v6979_v18 }
 0x6d4   :  { %5259 = vmatprep.subr.bf16.mxu0 %v6980_v19  ;;  %5285 = vmatprep.subr.bf16.mxu1 %v6805_v21 }
 0x6d7   :  { %5261 = vmatpush1.bf16.msra.mxu0 %v6981_v27  ;;  %5287 = vmatpush3.bf16.msra.mxu1 %v6982_v28 }
 0x6d8   :  { %5263 = vmatprep.subr.bf16.mxu0 %v6983_v41  ;;  %5288 = vmatprep.subr.bf16.mxu1 %v6805_v21 }
 0x6db   :  { %5265 = vmatpush1.bf16.msra.mxu0 %v6984_v36  ;;  %5290 = vmatpush3.bf16.msra.mxu1 %v6985_v37 }
 0x6dc   :  { %5267 = vmatprep.subr.bf16.mxu0 %v6986_v50  ;;  %5291 = vmatprep.subr.bf16.mxu1 %v6805_v21 }
 0x6df   :  { %5269 = vmatpush1.bf16.msra.mxu0 %v6987_v59  ;;  %5293 = vmatpush3.bf16.msra.mxu1 %v6988_v6 }
 0x6e0   :  { %5295 = vmatprep.subr.bf16.mxu0 %v6989_v53  ;;  %5326 = vmatprep.subr.bf16.mxu1 %v6805_v21 }
 0x755   :  { %v2625_v55 = vpop.f32.mrb[28].mxu1 }
 0x756   :  { %v4145_v23 = vpop.f32.mrb[29].mxu1  ;;  %v2626_v18 = vadd.f32 %v2625_v55, %v6034_v42 }
 0x775   :  { %v2695_v31 = vpop.f32.mrb[20].mxu0  ;;  %v2766_v43 = vpop.f32.mrb[30].mxu1 }
 0x776   :  { %v5367_v63 = vadd.f32 %v6869_v26, %v2695_v31  ;;  %v2697_v22 = vpop.f32.mrb[21].mxu0  ;;  %v4180_v48 = vpop.f32.mrb[31].mxu1  ;;  %v2767_v45 = vadd.f32 %v2766_v43, %v6911_v46 }
 0x777   :  { %v5369_v10 = vadd.f32 %v6870_v34, %v2697_v22 }
 0x778   :  { %v3290_v40 = vmul.f32 -1.442695, %v5367_v63 }
 0x779   :  { %v3291_v14 = vmul.f32 -1.442695, %v5369_v10 }
 0x77a   :  { %5483 = vpow2.f32 %v3290_v40 }
 0x77b   :  { %5485 = vpow2.f32 %v3291_v14 }
 0x784   :  { %v5484_v13 = vpop.eup %5483 }
 0x785   :  { %v2774_v2 = vadd.f32 1.0, %v5484_v13  ;;  %v5486_v30 = vpop.eup %5485 }
 0x786   :  { %v2781_v17 = vadd.f32 1.0, %v5486_v30 }
 0x787   :  { %5487 = vrcp.f32 %v2774_v2 }
 0x788   :  { %5489 = vrcp.f32 %v2781_v17 }
 0x791   :  { %v5488_v9 = vpop.eup %5487 }
 0x792   :  { %v2784_v19 = vmul.f32 %v5488_v9, %v2767_v45  ;;  %v5490_v31 = vpop.eup %5489 }
 0x793   :  { %v2787_v43 = vsub.f32 1.0, %v5490_v31  ;;  %v2789_v48 = vmul.f32 %v5490_v31, %v6438_v54 }
 0x794   :  { %v2785_v27 = vadd.f32 %v2784_v19, %v2626_v18 }
 0x795   :  { %v2859_v28 = vpop.f32.mrb[22].mxu0  ;;  %v2930_v41 = vpop.f32.mrb[32].mxu1 }
 0x796   :  { %5491 = vtanh.f32 %v2785_v27  ;;  %v2860_v36 = vadd.f32 %v2859_v28, %v5830_v1  ;;  %v2861_v37 = vpop.f32.mrb[23].mxu0  ;;  %v4215_v50 = vpop.f32.mrb[33].mxu1  ;;  %v2931_v10 = vadd.f32 %v2930_v41, %v6834_v3 }
 0x797   :  { %v2862_v59 = vadd.f32 %v2861_v37, %v6831_v32 }
 0x798   :  { %v2934_v6 = vadd.f32 %v2860_v36, %v6832_v4 }
 0x799   :  { %v2941_v23 = vadd.f32 %v2862_v59, %v6872_v11 }
 0x79a   :  { %v3293_v53 = vmul.f32 -1.442695, %v2934_v6 }
 0x79b   :  { %v3294_v55 = vmul.f32 -1.442695, %v2941_v23 }
 0x79c   :  { %5493 = vpow2.f32 %v3293_v53 }
 0x79d   :  { %5495 = vpow2.f32 %v3294_v55 }
 0x7a0   :  { %v5492_v63 = vpop.eup %5491 }
 0x7a1   :  { %v2788_v22 = vmul.f32 %v5492_v63, %v2787_v43 }
 0x7a3   :  { %v6569_v40 = vadd.f32 %v2789_v48, %v2788_v22 }
 0x7a5   :  { %3292 = vst [vmem:[%s6626_s5 + $0x20] sm:$0xff] %v6569_v40 }
 0x7a6   :  { %v5494_v1 = vpop.eup %5493 }
 0x7a7   :  { %v2938_v32 = vadd.f32 1.0, %v5494_v1  ;;  %v5496_v4 = vpop.eup %5495 }
 0x7a8   :  { %v2945_v11 = vadd.f32 1.0, %v5496_v4 }
 0x7a9   :  { %5497 = vrcp.f32 %v2938_v32 }
 0x7aa   :  { %5499 = vrcp.f32 %v2945_v11 }
 0x7b3   :  { %v5498_v14 = vpop.eup %5497 }
 0x7b4   :  { %v2948_v13 = vmul.f32 %v5498_v14, %v2931_v10  ;;  %v5500_v2 = vpop.eup %5499 }
 0x7b5   :  { %v2951_v30 = vsub.f32 1.0, %v5500_v2  ;;  %v2953_v9 = vmul.f32 %v5500_v2, %v6447_v49 }
 0x7b6   :  { %v2949_v54 = vadd.f32 %v2948_v13, %v6835_v12 }
 0x7b8   :  { %5501 = vtanh.f32 %v2949_v54 }
 0x7c2   :  { %v5502_v17 = vpop.eup %5501 }
 0x7c3   :  { %v2952_v45 = vmul.f32 %v5502_v17, %v2951_v30 }
 0x7c5   :  { %v2954_v18 = vadd.f32 %v2953_v9, %v2952_v45 }
 0x7c7   :  { %3020 = vmatmul.mubr.f32.vlgmr.msra.gmra.mrb[24].mxu0 %v2954_v18  ;;  %4249 = vmatmul.mubr.f32.vlgmr.msra.gmra.mrb[34].mxu1 %v2954_v18 }
 0x7c8   :  { %5297 = vmatpush1.bf16.msra.mxu0 %v5855_v0  ;;  %5328 = vmatpush3.bf16.msra.mxu1 %v6836_v25 }
 0x7c9   :  { %5299 = vmatprep.subr.bf16.mxu0 %v6837_v60  ;;  %5329 = vmatprep.subr.bf16.mxu1 %v6805_v21 }
 0x7ca   :  { %3160 = vmatprep.mubr.f32.mxu0 %v6807_v5  ;;  %4283 = vmatprep.mubr.msk.f32.mxu1 %vm5568_vm0, %v6807_v5 }
 0x7cc   :  { %5301 = vmatpush1.bf16.msra.mxu0 %v6838_v29  ;;  %5331 = vmatpush3.bf16.msra.mxu1 %v6839_v62 }
 0x7cd   :  { %5303 = vmatprep.subr.bf16.mxu0 %v6840_v57  ;;  %5332 = vmatprep.subr.bf16.mxu1 %v6805_v21 }
 0x7d0   :  { %5305 = vmatpush1.bf16.msra.mxu0 %v6841_v33  ;;  %5334 = vmatpush3.bf16.msra.mxu1 %v6842_v58 }
 0x7d1   :  { %5307 = vmatprep.subr.bf16.mxu0 %v6843_v52  ;;  %5335 = vmatprep.subr.bf16.mxu1 %v6805_v21 }
 0x7d4   :  { %5309 = vmatpush1.bf16.msra.mxu0 %v6844_v35  ;;  %5337 = vmatpush3.bf16.msra.mxu1 %v6845_v8 }
 0x7d5   :  { %5311 = vmatprep.subr.bf16.mxu0 %v6846_v61  ;;  %5338 = vmatprep.subr.bf16.mxu1 %v6805_v21 }
 0x7d8   :  { %5313 = vmatpush1.bf16.msra.mxu0 %v5900_v38  ;;  %5340 = vmatpush3.bf16.msra.mxu1 %v5902_v47 }
 0x7d9   :  { %5315 = vmatprep.subr.bf16.mxu0 %v6847_v44  ;;  %5341 = vmatprep.subr.bf16.mxu1 %v6805_v21 }
 0x7dc   :  { %5317 = vmatpush1.bf16.msra.mxu0 %v6848_v16  ;;  %5343 = vmatpush3.bf16.msra.mxu1 %v5912_v51 }
 0x7dd   :  { %5319 = vmatprep.subr.bf16.mxu0 %v5916_v7  ;;  %5344 = vmatprep.subr.bf16.mxu1 %v6805_v21 }
 0x7e0   :  { %5321 = vmatpush1.bf16.msra.mxu0 %v5920_v56  ;;  %5346 = vmatpush3.bf16.msra.mxu1 %v5922_v20 }
 0x7e1   :  { %5323 = vmatprep.subr.bf16.mxu0 %v5926_v15  ;;  %5347 = vmatprep.subr.bf16.mxu1 %v6805_v21 }
 0x7e4   :  { %5325 = vmatpush1.bf16.msra.mxu0 %v5930_v39  ;;  %5349 = vmatpush3.bf16.msra.mxu1 %v5932_v24 }
 0x7e7   :  { %3161 = vmatmul.mubr.f32.vlgmr.msra.gmra.mrb[24].mxu0 %v6569_v40  ;;  %4284 = vmatmul.mubr.f32.vlgmr.msra.gmra.mrb[36].mxu1 %v6569_v40 }
 0x89a   :  { %v3092_v0 = vpop.f32.mrb[34].mxu1 }
 0x89b   :  { %v4250_v5 = vpop.f32.mrb[35].mxu1  ;;  %v3093_v29 = vadd.f32 %v3092_v0, %v6034_v42 }
 0x8ba   :  { %v3162_v38 = vpop.f32.mrb[24].mxu0  ;;  %v3233_v47 = vpop.f32.mrb[36].mxu1 }
 0x8bb   :  { %v5371_v51 = vadd.f32 %v6869_v26, %v3162_v38  ;;  %v3164_v7 = vpop.f32.mrb[25].mxu0  ;;  %v4285_v56 = vpop.f32.mrb[37].mxu1  ;;  %v3234_v25 = vadd.f32 %v3233_v47, %v6911_v46 }
 0x8bc   :  { %v5373_v15 = vadd.f32 %v6870_v34, %v3164_v7 }
 0x8bd   :  { %v3295_v20 = vmul.f32 -1.442695, %v5371_v51 }
 0x8be   :  { %v3296_v21 = vmul.f32 -1.442695, %v5373_v15 }
 0x8bf   :  { %5503 = vpow2.f32 %v3295_v20 }
 0x8c0   :  { %5505 = vpow2.f32 %v3296_v21 }
 0x8c9   :  { %v5504_v39 = vpop.eup %5503 }
 0x8ca   :  { %v3241_v24 = vadd.f32 1.0, %v5504_v39  ;;  %v5506_v3 = vpop.eup %5505 }
 0x8cb   :  { %v3248_v12 = vadd.f32 1.0, %v5506_v3 }
 0x8cc   :  { %5507 = vrcp.f32 %v3241_v24 }
 0x8cd   :  { %5509 = vrcp.f32 %v3248_v12 }
 0x8d6   :  { %v5508_v60 = vpop.eup %5507 }
 0x8d7   :  { %v3251_v62 = vmul.f32 %v5508_v60, %v3234_v25  ;;  %v5510_v57 = vpop.eup %5509 }
 0x8d8   :  { %v3254_v33 = vsub.f32 1.0, %v5510_v57  ;;  %v3256_v52 = vmul.f32 %v5510_v57, %v6569_v40 }
 0x8d9   :  { %v3252_v26 = vadd.f32 %v3251_v62, %v3093_v29 }
 0x8db   :  { %5511 = vtanh.f32 %v3252_v26 }
 0x8e5   :  { %v5512_v34 = vpop.eup %5511 }
 0x8e6   :  { %v3255_v58 = vmul.f32 %v5512_v34, %v3254_v33 }
 0x8e8   :  { %v3257_v35 = vadd.f32 %v3256_v52, %v3255_v58 }
 0x8ea   :  { %3297 = vst [vmem:[%s6626_s5 + $0x28] sm:$0xff] %v3257_v35 }
 0x8eb   :  { %3264 = vsyncpa [#allocation3], 1 }
 0x8ec   :  { %3265 = vsyncpa [#allocation5], 1 }

</bundles_post_ra>
